<compile_context>
chip_gen: v7x
topology: tpu7x:2x2x1
jax: 0.10.0
libtpu: 0.0.40
codegen_flags: <defaults>
</compile_context>

<pallas_src>
import functools

import jax
import jax.numpy as jnp
from jax.experimental import pallas as pl
from jax.experimental.pallas import tpu as pltpu


def _conv_same_kernel(x_ref, w_ref, b_ref, o_ref, *, KH, KW, s, d):
    """Fused same-padded conv for one (batch, output-row-block) grid step.

    x_ref: (1, s*s, Hq, Wq, Cin)   phase-decomposed padded image (f32)
    w_ref: (KH*KW, Cin, Coutp)     conv weights (bf16, Cout padded to 128)
    b_ref: (1, Coutp)              bias (f32)
    o_ref: (1, TOH, OW, Coutp)     output row block (f32, lane-dense)
    """
    _, TOH, OW, Coutp = o_ref.shape
    ohb = pl.program_id(1)
    bias = b_ref[...]                                    # (1, Coutp) f32

    for r in range(TOH):                                 # static unroll
        acc = jnp.zeros((OW, Coutp), jnp.float32)
        for kh in range(KH):
            aH, rH = divmod(kh * d, s)
            hq = ohb * TOH + r + aH                      # dynamic row index
            for kw in range(KW):
                aW, rW = divmod(kw * d, s)
                # Tap window: contiguous slice thanks to the phase decomposition.
                lhs = x_ref[0, rH * s + rW, hq, aW:aW + OW, :]   # (OW, Cin) f32
                acc += jnp.dot(lhs.astype(jnp.bfloat16),
                               w_ref[kh * KW + kw],
                               preferred_element_type=jnp.float32)
        o_ref[0, r] = (acc + bias).astype(o_ref.dtype)   # (OW, 128) unmasked vst


@functools.partial(jax.jit, static_argnames=("stride", "dilation"))
def conv2d_same(imgs, weight, bias, *, stride=1, dilation=1):
    """imgs: (N, Cin, H, W) f32; weight: (Cout, Cin, KH, KW); bias: (Cout,) -> NCHW."""
    N, Cin, H, W = imgs.shape
    Cout, Cin_w, KH, KW = weight.shape
    assert Cin == Cin_w
    s, d = stride, dilation

    # --- "same" padding, identical arithmetic to Conv2dSame.forward ----------
    OH = (H + s - 1) // s
    OW = (W + s - 1) // s
    pad_H = max(0, (OH - 1) * s + (KH - 1) * d + 1 - H)
    pad_W = max(0, (OW - 1) * s + (KW - 1) * d + 1 - W)
    pad_top, pad_left = pad_H // 2, pad_W // 2

    # Phase decomposition geometry: h = hq*s + rh, w = wq*s + rw.  Tap (kh, kw)
    # with (aH, rH) = divmod(kh*d, s) reads x_ph[n, rH, rW, oh+aH, ow+aW, :],
    # i.e. a contiguous window -- no strided access inside the kernel.
    max_aH = ((KH - 1) * d) // s
    max_aW = ((KW - 1) * d) // s
    Hq, Wq = OH + max_aH, OW + max_aW
    pad_bottom = Hq * s - H - pad_top   # >= torch bottom pad; extra rows never read
    pad_right = Wq * s - W - pad_left

    x = jnp.pad(imgs.astype(jnp.float32),
                ((0, 0), (0, 0), (pad_top, pad_bottom), (pad_left, pad_right)))
    # NCHW padded -> (N, s*s, Hq, Wq, Cin); one fused pad/reshape/transpose pass.
    x = x.reshape(N, Cin, Hq, s, Wq, s).transpose(0, 3, 5, 2, 4, 1)
    x = x.reshape(N, s * s, Hq, Wq, Cin)

    # Weights -> (KH*KW, Cin, Coutp) bf16, Cout zero-padded to lane-dense 128.
    Coutp = max(128, ((Cout + 127) // 128) * 128)
    w = jnp.transpose(weight, (2, 3, 1, 0)).reshape(KH * KW, Cin, Cout)
    w = jnp.pad(w, ((0, 0), (0, 0), (0, Coutp - Cout))).astype(jnp.bfloat16)
    b = jnp.pad(bias, (0, Coutp - Cout)).astype(jnp.float32).reshape(1, Coutp)

    # Output-row block: largest divisor of OH <= 16 (bounded in-kernel unroll).
    TOH = 1
    for t in range(min(OH, 16), 0, -1):
        if OH % t == 0:
            TOH = t
            break
    OHB = OH // TOH

    kernel = functools.partial(_conv_same_kernel, KH=KH, KW=KW, s=s, d=d)
    out = pl.pallas_call(
        kernel,
        out_shape=jax.ShapeDtypeStruct((N, OH, OW, Coutp), jnp.float32),
        grid_spec=pltpu.PrefetchScalarGridSpec(
            num_scalar_prefetch=0,
            grid=(N, OHB),
            in_specs=[
                # Whole phase-decomposed image; resident across the row axis.
                pl.BlockSpec((1, s * s, Hq, Wq, Cin),
                             lambda n, j: (n, 0, 0, 0, 0)),
                pl.BlockSpec((KH * KW, Cin, Coutp), lambda n, j: (0, 0, 0)),
                pl.BlockSpec((1, Coutp), lambda n, j: (0, 0)),
            ],
            out_specs=pl.BlockSpec((1, TOH, OW, Coutp),
                                   lambda n, j: (n, j, 0, 0)),
        ),
        compiler_params=pltpu.CompilerParams(
            dimension_semantics=("parallel", "parallel")),
    )(x, w, b)

    # Drop channel padding, return NCHW (module contract).
    return jnp.transpose(out[..., :Cout], (0, 3, 1, 2))


if __name__ == "__main__":
    # Module config: Conv2dSame(in_channels=4, out_channels=8, kernel_size=3, stride=2)
    in_channels, out_channels, kernel_size, stride, dilation = 4, 8, 3, 2, 1

    key = jax.random.PRNGKey(0)
    kx, kw, kb = jax.random.split(key, 3)

    x = jax.random.normal(kx, (2, in_channels, 16, 16), dtype=jnp.float32)

    # Deterministic synthetic parameters (PyTorch Conv2d-like uniform init).
    fan_in = in_channels * kernel_size * kernel_size
    bound = 1.0 / (fan_in ** 0.5)
    weight = jax.random.uniform(
        kw, (out_channels, in_channels, kernel_size, kernel_size),
        dtype=jnp.float32, minval=-bound, maxval=bound)
    bias = jax.random.uniform(
        kb, (out_channels,), dtype=jnp.float32, minval=-bound, maxval=bound)

    out = conv2d_same(x, weight, bias, stride=stride, dilation=dilation)
    out = jax.block_until_ready(out)
    assert out.shape == (2, out_channels, 8, 8), out.shape

    # Reference: exact same asymmetric "same" padding as the torch module.
    H, W = x.shape[-2:]
    OH = (H + stride - 1) // stride
    OW = (W + stride - 1) // stride
    pad_H = max(0, (OH - 1) * stride + (kernel_size - 1) * dilation + 1 - H)
    pad_W = max(0, (OW - 1) * stride + (kernel_size - 1) * dilation + 1 - W)
    pads = ((pad_H // 2, pad_H - pad_H // 2), (pad_W // 2, pad_W - pad_W // 2))

    def ref_conv(xx, ww):
        return jax.lax.conv_general_dilated(
            xx, ww, (stride, stride), pads,
            rhs_dilation=(dilation, dilation),
            dimension_numbers=("NCHW", "OIHW", "NCHW"),
        ) + bias.reshape(1, -1, 1, 1)

    # Tight check against the same bf16-rounded operands the MXU path consumes.
    ref_bf16 = ref_conv(x.astype(jnp.bfloat16).astype(jnp.float32),
                        weight.astype(jnp.bfloat16).astype(jnp.float32))
    ref_bf16 = jax.block_until_ready(ref_bf16)
    assert jnp.allclose(out, ref_bf16, atol=1e-4, rtol=1e-4), float(
        jnp.max(jnp.abs(out - ref_bf16)))

    # Loose check against pure f32 module semantics (bf16 input rounding slack).
    ref_f32 = jax.block_until_ready(ref_conv(x, weight))
    assert jnp.allclose(out, ref_f32, atol=2e-2, rtol=2e-2), float(
        jnp.max(jnp.abs(out - ref_f32)))

    print("KERNEL_OK")
</pallas_src>

<mosaic_0001>
module attributes {stable_mosaic.version = 11 : i64} {
  func.func @_conv_same_kernel(%arg0: i32, %arg1: i32, %arg2: memref<1x4x9x9x4xf32, #tpu.memory_space<vmem>>, %arg3: memref<9x4x128xbf16, #tpu.memory_space<vmem>>, %arg4: memref<1x128xf32, #tpu.memory_space<vmem>>, %arg5: memref<1x8x8x128xf32, #tpu.memory_space<vmem>>) attributes {dimension_semantics = [#tpu.dimension_semantics<parallel>, #tpu.dimension_semantics<parallel>], iteration_bounds = array<i64: 2, 1>, scalar_prefetch = 0 : i64, scratch_operands = 0 : i64, tpu.core_type = #tpu.core_type<tc>, window_params = [{transform_indices = @transform_0, window_bounds = array<i64: 1, 4, 9, 9, 4>}, {pipeline_mode = #tpu.pipeline_mode<synchronous>, transform_indices = @transform_1, window_bounds = array<i64: 9, 4, 128>}, {pipeline_mode = #tpu.pipeline_mode<synchronous>, transform_indices = @transform_2, window_bounds = array<i64: 1, 128>}, {transform_indices = @transform_3, window_bounds = array<i64: 1, 8, 8, 128>}]} {
    %c0 = arith.constant 0 : index
    %c0_0 = arith.constant 0 : index
    %0 = vector.load %arg4[%c0, %c0_0] : memref<1x128xf32, #tpu.memory_space<vmem>>, vector<1x128xf32>
    %cst = arith.constant 0.000000e+00 : f32
    %1 = vector.broadcast %cst : f32 to vector<8x128xf32>
    %c8_i32 = arith.constant 8 : i32
    %2 = arith.muli %arg1, %c8_i32 : i32
    %c0_i32 = arith.constant 0 : i32
    %3 = arith.addi %2, %c0_i32 : i32
    %c0_i32_1 = arith.constant 0 : i32
    %4 = arith.addi %3, %c0_i32_1 : i32
    %c0_2 = arith.constant 0 : index
    %c0_3 = arith.constant 0 : index
    %5 = arith.index_cast %4 : i32 to index
    %c0_4 = arith.constant 0 : index
    %c0_5 = arith.constant 0 : index
    %6 = vector.load %arg2[%c0_2, %c0_3, %5, %c0_4, %c0_5] : memref<1x4x9x9x4xf32, #tpu.memory_space<vmem>>, vector<1x1x1x8x4xf32>
    %7 = vector.shape_cast %6 : vector<1x1x1x8x4xf32> to vector<8x4xf32>
    %8 = arith.truncf %7 : vector<8x4xf32> to vector<8x4xbf16>
    %c0_6 = arith.constant 0 : index
    %c0_7 = arith.constant 0 : index
    %c0_8 = arith.constant 0 : index
    %9 = vector.load %arg3[%c0_6, %c0_7, %c0_8] : memref<9x4x128xbf16, #tpu.memory_space<vmem>>, vector<1x4x128xbf16>
    %10 = vector.shape_cast %9 : vector<1x4x128xbf16> to vector<4x128xbf16>
    %cst_9 = arith.constant dense<0.000000e+00> : vector<8x128xf32>
    %11 = tpu.matmul %8, %10, %cst_9 {dimension_numbers = #tpu.dot_dimension_numbers<[1], [0], [0], [1], [0, 0, 1, 1], [], []>} : vector<8x4xbf16>, vector<4x128xbf16>, vector<8x128xf32> -> vector<8x128xf32>
    %12 = arith.addf %1, %11 : vector<8x128xf32>
    %c0_10 = arith.constant 0 : index
    %c1 = arith.constant 1 : index
    %13 = arith.index_cast %4 : i32 to index
    %c0_11 = arith.constant 0 : index
    %c0_12 = arith.constant 0 : index
    %14 = vector.load %arg2[%c0_10, %c1, %13, %c0_11, %c0_12] : memref<1x4x9x9x4xf32, #tpu.memory_space<vmem>>, vector<1x1x1x8x4xf32>
    %15 = vector.shape_cast %14 : vector<1x1x1x8x4xf32> to vector<8x4xf32>
    %16 = arith.truncf %15 : vector<8x4xf32> to vector<8x4xbf16>
    %c1_13 = arith.constant 1 : index
    %c0_14 = arith.constant 0 : index
    %c0_15 = arith.constant 0 : index
    %17 = vector.load %arg3[%c1_13, %c0_14, %c0_15] : memref<9x4x128xbf16, #tpu.memory_space<vmem>>, vector<1x4x128xbf16>
    %18 = vector.shape_cast %17 : vector<1x4x128xbf16> to vector<4x128xbf16>
    %cst_16 = arith.constant dense<0.000000e+00> : vector<8x128xf32>
    %19 = tpu.matmul %16, %18, %cst_16 {dimension_numbers = #tpu.dot_dimension_numbers<[1], [0], [0], [1], [0, 0, 1, 1], [], []>} : vector<8x4xbf16>, vector<4x128xbf16>, vector<8x128xf32> -> vector<8x128xf32>
    %20 = arith.addf %12, %19 : vector<8x128xf32>
    %c0_17 = arith.constant 0 : index
    %c0_18 = arith.constant 0 : index
    %21 = arith.index_cast %4 : i32 to index
    %c1_19 = arith.constant 1 : index
    %c0_20 = arith.constant 0 : index
    %22 = vector.load %arg2[%c0_17, %c0_18, %21, %c1_19, %c0_20] : memref<1x4x9x9x4xf32, #tpu.memory_space<vmem>>, vector<1x1x1x8x4xf32>
    %23 = vector.shape_cast %22 : vector<1x1x1x8x4xf32> to vector<8x4xf32>
    %24 = arith.truncf %23 : vector<8x4xf32> to vector<8x4xbf16>
    %c2 = arith.constant 2 : index
    %c0_21 = arith.constant 0 : index
    %c0_22 = arith.constant 0 : index
    %25 = vector.load %arg3[%c2, %c0_21, %c0_22] : memref<9x4x128xbf16, #tpu.memory_space<vmem>>, vector<1x4x128xbf16>
    %26 = vector.shape_cast %25 : vector<1x4x128xbf16> to vector<4x128xbf16>
    %cst_23 = arith.constant dense<0.000000e+00> : vector<8x128xf32>
    %27 = tpu.matmul %24, %26, %cst_23 {dimension_numbers = #tpu.dot_dimension_numbers<[1], [0], [0], [1], [0, 0, 1, 1], [], []>} : vector<8x4xbf16>, vector<4x128xbf16>, vector<8x128xf32> -> vector<8x128xf32>
    %28 = arith.addf %20, %27 : vector<8x128xf32>
    %c8_i32_24 = arith.constant 8 : i32
    %29 = arith.muli %arg1, %c8_i32_24 : i32
    %c0_i32_25 = arith.constant 0 : i32
    %30 = arith.addi %29, %c0_i32_25 : i32
    %c0_i32_26 = arith.constant 0 : i32
    %31 = arith.addi %30, %c0_i32_26 : i32
    %c0_27 = arith.constant 0 : index
    %c2_28 = arith.constant 2 : index
    %32 = arith.index_cast %31 : i32 to index
    %c0_29 = arith.constant 0 : index
    %c0_30 = arith.constant 0 : index
    %33 = vector.load %arg2[%c0_27, %c2_28, %32, %c0_29, %c0_30] : memref<1x4x9x9x4xf32, #tpu.memory_space<vmem>>, vector<1x1x1x8x4xf32>
    %34 = vector.shape_cast %33 : vector<1x1x1x8x4xf32> to vector<8x4xf32>
    %35 = arith.truncf %34 : vector<8x4xf32> to vector<8x4xbf16>
    %c3 = arith.constant 3 : index
    %c0_31 = arith.constant 0 : index
    %c0_32 = arith.constant 0 : index
    %36 = vector.load %arg3[%c3, %c0_31, %c0_32] : memref<9x4x128xbf16, #tpu.memory_space<vmem>>, vector<1x4x128xbf16>
    %37 = vector.shape_cast %36 : vector<1x4x128xbf16> to vector<4x128xbf16>
    %cst_33 = arith.constant dense<0.000000e+00> : vector<8x128xf32>
    %38 = tpu.matmul %35, %37, %cst_33 {dimension_numbers = #tpu.dot_dimension_numbers<[1], [0], [0], [1], [0, 0, 1, 1], [], []>} : vector<8x4xbf16>, vector<4x128xbf16>, vector<8x128xf32> -> vector<8x128xf32>
    %39 = arith.addf %28, %38 : vector<8x128xf32>
    %c0_34 = arith.constant 0 : index
    %c3_35 = arith.constant 3 : index
    %40 = arith.index_cast %31 : i32 to index
    %c0_36 = arith.constant 0 : index
    %c0_37 = arith.constant 0 : index
    %41 = vector.load %arg2[%c0_34, %c3_35, %40, %c0_36, %c0_37] : memref<1x4x9x9x4xf32, #tpu.memory_space<vmem>>, vector<1x1x1x8x4xf32>
    %42 = vector.shape_cast %41 : vector<1x1x1x8x4xf32> to vector<8x4xf32>
    %43 = arith.truncf %42 : vector<8x4xf32> to vector<8x4xbf16>
    %c4 = arith.constant 4 : index
    %c0_38 = arith.constant 0 : index
    %c0_39 = arith.constant 0 : index
    %44 = vector.load %arg3[%c4, %c0_38, %c0_39] : memref<9x4x128xbf16, #tpu.memory_space<vmem>>, vector<1x4x128xbf16>
    %45 = vector.shape_cast %44 : vector<1x4x128xbf16> to vector<4x128xbf16>
    %cst_40 = arith.constant dense<0.000000e+00> : vector<8x128xf32>
    %46 = tpu.matmul %43, %45, %cst_40 {dimension_numbers = #tpu.dot_dimension_numbers<[1], [0], [0], [1], [0, 0, 1, 1], [], []>} : vector<8x4xbf16>, vector<4x128xbf16>, vector<8x128xf32> -> vector<8x128xf32>
    %47 = arith.addf %39, %46 : vector<8x128xf32>
    %c0_41 = arith.constant 0 : index
    %c2_42 = arith.constant 2 : index
    %48 = arith.index_cast %31 : i32 to index
    %c1_43 = arith.constant 1 : index
    %c0_44 = arith.constant 0 : index
    %49 = vector.load %arg2[%c0_41, %c2_42, %48, %c1_43, %c0_44] : memref<1x4x9x9x4xf32, #tpu.memory_space<vmem>>, vector<1x1x1x8x4xf32>
    %50 = vector.shape_cast %49 : vector<1x1x1x8x4xf32> to vector<8x4xf32>
    %51 = arith.truncf %50 : vector<8x4xf32> to vector<8x4xbf16>
    %c5 = arith.constant 5 : index
    %c0_45 = arith.constant 0 : index
    %c0_46 = arith.constant 0 : index
    %52 = vector.load %arg3[%c5, %c0_45, %c0_46] : memref<9x4x128xbf16, #tpu.memory_space<vmem>>, vector<1x4x128xbf16>
    %53 = vector.shape_cast %52 : vector<1x4x128xbf16> to vector<4x128xbf16>
    %cst_47 = arith.constant dense<0.000000e+00> : vector<8x128xf32>
    %54 = tpu.matmul %51, %53, %cst_47 {dimension_numbers = #tpu.dot_dimension_numbers<[1], [0], [0], [1], [0, 0, 1, 1], [], []>} : vector<8x4xbf16>, vector<4x128xbf16>, vector<8x128xf32> -> vector<8x128xf32>
    %55 = arith.addf %47, %54 : vector<8x128xf32>
    %c8_i32_48 = arith.constant 8 : i32
    %56 = arith.muli %arg1, %c8_i32_48 : i32
    %c0_i32_49 = arith.constant 0 : i32
    %57 = arith.addi %56, %c0_i32_49 : i32
    %c1_i32 = arith.constant 1 : i32
    %58 = arith.addi %57, %c1_i32 : i32
    %c0_50 = arith.constant 0 : index
    %c0_51 = arith.constant 0 : index
    %59 = arith.index_cast %58 : i32 to index
    %c0_52 = arith.constant 0 : index
    %c0_53 = arith.constant 0 : index
    %60 = vector.load %arg2[%c0_50, %c0_51, %59, %c0_52, %c0_53] : memref<1x4x9x9x4xf32, #tpu.memory_space<vmem>>, vector<1x1x1x8x4xf32>
    %61 = vector.shape_cast %60 : vector<1x1x1x8x4xf32> to vector<8x4xf32>
    %62 = arith.truncf %61 : vector<8x4xf32> to vector<8x4xbf16>
    %c6 = arith.constant 6 : index
    %c0_54 = arith.constant 0 : index
    %c0_55 = arith.constant 0 : index
    %63 = vector.load %arg3[%c6, %c0_54, %c0_55] : memref<9x4x128xbf16, #tpu.memory_space<vmem>>, vector<1x4x128xbf16>
    %64 = vector.shape_cast %63 : vector<1x4x128xbf16> to vector<4x128xbf16>
    %cst_56 = arith.constant dense<0.000000e+00> : vector<8x128xf32>
    %65 = tpu.matmul %62, %64, %cst_56 {dimension_numbers = #tpu.dot_dimension_numbers<[1], [0], [0], [1], [0, 0, 1, 1], [], []>} : vector<8x4xbf16>, vector<4x128xbf16>, vector<8x128xf32> -> vector<8x128xf32>
    %66 = arith.addf %55, %65 : vector<8x128xf32>
    %c0_57 = arith.constant 0 : index
    %c1_58 = arith.constant 1 : index
    %67 = arith.index_cast %58 : i32 to index
    %c0_59 = arith.constant 0 : index
    %c0_60 = arith.constant 0 : index
    %68 = vector.load %arg2[%c0_57, %c1_58, %67, %c0_59, %c0_60] : memref<1x4x9x9x4xf32, #tpu.memory_space<vmem>>, vector<1x1x1x8x4xf32>
    %69 = vector.shape_cast %68 : vector<1x1x1x8x4xf32> to vector<8x4xf32>
    %70 = arith.truncf %69 : vector<8x4xf32> to vector<8x4xbf16>
    %c7 = arith.constant 7 : index
    %c0_61 = arith.constant 0 : index
    %c0_62 = arith.constant 0 : index
    %71 = vector.load %arg3[%c7, %c0_61, %c0_62] : memref<9x4x128xbf16, #tpu.memory_space<vmem>>, vector<1x4x128xbf16>
    %72 = vector.shape_cast %71 : vector<1x4x128xbf16> to vector<4x128xbf16>
    %cst_63 = arith.constant dense<0.000000e+00> : vector<8x128xf32>
    %73 = tpu.matmul %70, %72, %cst_63 {dimension_numbers = #tpu.dot_dimension_numbers<[1], [0], [0], [1], [0, 0, 1, 1], [], []>} : vector<8x4xbf16>, vector<4x128xbf16>, vector<8x128xf32> -> vector<8x128xf32>
    %74 = arith.addf %66, %73 : vector<8x128xf32>
    %c0_64 = arith.constant 0 : index
    %c0_65 = arith.constant 0 : index
    %75 = arith.index_cast %58 : i32 to index
    %c1_66 = arith.constant 1 : index
    %c0_67 = arith.constant 0 : index
    %76 = vector.load %arg2[%c0_64, %c0_65, %75, %c1_66, %c0_67] : memref<1x4x9x9x4xf32, #tpu.memory_space<vmem>>, vector<1x1x1x8x4xf32>
    %77 = vector.shape_cast %76 : vector<1x1x1x8x4xf32> to vector<8x4xf32>
    %78 = arith.truncf %77 : vector<8x4xf32> to vector<8x4xbf16>
    %c8 = arith.constant 8 : index
    %c0_68 = arith.constant 0 : index
    %c0_69 = arith.constant 0 : index
    %79 = vector.load %arg3[%c8, %c0_68, %c0_69] : memref<9x4x128xbf16, #tpu.memory_space<vmem>>, vector<1x4x128xbf16>
    %80 = vector.shape_cast %79 : vector<1x4x128xbf16> to vector<4x128xbf16>
    %cst_70 = arith.constant dense<0.000000e+00> : vector<8x128xf32>
    %81 = tpu.matmul %78, %80, %cst_70 {dimension_numbers = #tpu.dot_dimension_numbers<[1], [0], [0], [1], [0, 0, 1, 1], [], []>} : vector<8x4xbf16>, vector<4x128xbf16>, vector<8x128xf32> -> vector<8x128xf32>
    %82 = arith.addf %74, %81 : vector<8x128xf32>
    %83 = vector.broadcast %0 : vector<1x128xf32> to vector<8x128xf32>
    %84 = arith.addf %82, %83 : vector<8x128xf32>
    %c0_71 = arith.constant 0 : index
    %c0_72 = arith.constant 0 : index
    %c0_73 = arith.constant 0 : index
    %c0_74 = arith.constant 0 : index
    %85 = vector.load %arg5[%c0_71, %c0_72, %c0_73, %c0_74] : memref<1x8x8x128xf32, #tpu.memory_space<vmem>>, vector<1x1x8x128xf32>
    %86 = vector.shape_cast %85 : vector<1x1x8x128xf32> to vector<8x128xf32>
    %87 = vector.shape_cast %84 : vector<8x128xf32> to vector<1x1x8x128xf32>
    tpu.vector_store %arg5[%c0_71, %c0_72, %c0_73, %c0_74], %87 {strides = array<i32>} : memref<1x8x8x128xf32, #tpu.memory_space<vmem>>, vector<1x1x8x128xf32>,
    %cst_75 = arith.constant 0.000000e+00 : f32
    %88 = vector.broadcast %cst_75 : f32 to vector<8x128xf32>
    %c8_i32_76 = arith.constant 8 : i32
    %89 = arith.muli %arg1, %c8_i32_76 : i32
    %c1_i32_77 = arith.constant 1 : i32
    %90 = arith.addi %89, %c1_i32_77 : i32
    %c0_i32_78 = arith.constant 0 : i32
    %91 = arith.addi %90, %c0_i32_78 : i32
    %c0_79 = arith.constant 0 : index
    %c0_80 = arith.constant 0 : index
    %92 = arith.index_cast %91 : i32 to index
    %c0_81 = arith.constant 0 : index
    %c0_82 = arith.constant 0 : index
    %93 = vector.load %arg2[%c0_79, %c0_80, %92, %c0_81, %c0_82] : memref<1x4x9x9x4xf32, #tpu.memory_space<vmem>>, vector<1x1x1x8x4xf32>
    %94 = vector.shape_cast %93 : vector<1x1x1x8x4xf32> to vector<8x4xf32>
    %95 = arith.truncf %94 : vector<8x4xf32> to vector<8x4xbf16>
    %c0_83 = arith.constant 0 : index
    %c0_84 = arith.constant 0 : index
    %c0_85 = arith.constant 0 : index
    %96 = vector.load %arg3[%c0_83, %c0_84, %c0_85] : memref<9x4x128xbf16, #tpu.memory_space<vmem>>, vector<1x4x128xbf16>
    %97 = vector.shape_cast %96 : vector<1x4x128xbf16> to vector<4x128xbf16>
    %cst_86 = arith.constant dense<0.000000e+00> : vector<8x128xf32>
    %98 = tpu.matmul %95, %97, %cst_86 {dimension_numbers = #tpu.dot_dimension_numbers<[1], [0], [0], [1], [0, 0, 1, 1], [], []>} : vector<8x4xbf16>, vector<4x128xbf16>, vector<8x128xf32> -> vector<8x128xf32>
    %99 = arith.addf %88, %98 : vector<8x128xf32>
    %c0_87 = arith.constant 0 : index
    %c1_88 = arith.constant 1 : index
    %100 = arith.index_cast %91 : i32 to index
    %c0_89 = arith.constant 0 : index
    %c0_90 = arith.constant 0 : index
    %101 = vector.load %arg2[%c0_87, %c1_88, %100, %c0_89, %c0_90] : memref<1x4x9x9x4xf32, #tpu.memory_space<vmem>>, vector<1x1x1x8x4xf32>
    %102 = vector.shape_cast %101 : vector<1x1x1x8x4xf32> to vector<8x4xf32>
    %103 = arith.truncf %102 : vector<8x4xf32> to vector<8x4xbf16>
    %c1_91 = arith.constant 1 : index
    %c0_92 = arith.constant 0 : index
    %c0_93 = arith.constant 0 : index
    %104 = vector.load %arg3[%c1_91, %c0_92, %c0_93] : memref<9x4x128xbf16, #tpu.memory_space<vmem>>, vector<1x4x128xbf16>
    %105 = vector.shape_cast %104 : vector<1x4x128xbf16> to vector<4x128xbf16>
    %cst_94 = arith.constant dense<0.000000e+00> : vector<8x128xf32>
    %106 = tpu.matmul %103, %105, %cst_94 {dimension_numbers = #tpu.dot_dimension_numbers<[1], [0], [0], [1], [0, 0, 1, 1], [], []>} : vector<8x4xbf16>, vector<4x128xbf16>, vector<8x128xf32> -> vector<8x128xf32>
    %107 = arith.addf %99, %106 : vector<8x128xf32>
    %c0_95 = arith.constant 0 : index
    %c0_96 = arith.constant 0 : index
    %108 = arith.index_cast %91 : i32 to index
    %c1_97 = arith.constant 1 : index
    %c0_98 = arith.constant 0 : index
    %109 = vector.load %arg2[%c0_95, %c0_96, %108, %c1_97, %c0_98] : memref<1x4x9x9x4xf32, #tpu.memory_space<vmem>>, vector<1x1x1x8x4xf32>
    %110 = vector.shape_cast %109 : vector<1x1x1x8x4xf32> to vector<8x4xf32>
    %111 = arith.truncf %110 : vector<8x4xf32> to vector<8x4xbf16>
    %c2_99 = arith.constant 2 : index
    %c0_100 = arith.constant 0 : index
    %c0_101 = arith.constant 0 : index
    %112 = vector.load %arg3[%c2_99, %c0_100, %c0_101] : memref<9x4x128xbf16, #tpu.memory_space<vmem>>, vector<1x4x128xbf16>
    %113 = vector.shape_cast %112 : vector<1x4x128xbf16> to vector<4x128xbf16>
    %cst_102 = arith.constant dense<0.000000e+00> : vector<8x128xf32>
    %114 = tpu.matmul %111, %113, %cst_102 {dimension_numbers = #tpu.dot_dimension_numbers<[1], [0], [0], [1], [0, 0, 1, 1], [], []>} : vector<8x4xbf16>, vector<4x128xbf16>, vector<8x128xf32> -> vector<8x128xf32>
    %115 = arith.addf %107, %114 : vector<8x128xf32>
    %c8_i32_103 = arith.constant 8 : i32
    %116 = arith.muli %arg1, %c8_i32_103 : i32
    %c1_i32_104 = arith.constant 1 : i32
    %117 = arith.addi %116, %c1_i32_104 : i32
    %c0_i32_105 = arith.constant 0 : i32
    %118 = arith.addi %117, %c0_i32_105 : i32
    %c0_106 = arith.constant 0 : index
    %c2_107 = arith.constant 2 : index
    %119 = arith.index_cast %118 : i32 to index
    %c0_108 = arith.constant 0 : index
    %c0_109 = arith.constant 0 : index
    %120 = vector.load %arg2[%c0_106, %c2_107, %119, %c0_108, %c0_109] : memref<1x4x9x9x4xf32, #tpu.memory_space<vmem>>, vector<1x1x1x8x4xf32>
    %121 = vector.shape_cast %120 : vector<1x1x1x8x4xf32> to vector<8x4xf32>
    %122 = arith.truncf %121 : vector<8x4xf32> to vector<8x4xbf16>
    %c3_110 = arith.constant 3 : index
    %c0_111 = arith.constant 0 : index
    %c0_112 = arith.constant 0 : index
    %123 = vector.load %arg3[%c3_110, %c0_111, %c0_112] : memref<9x4x128xbf16, #tpu.memory_space<vmem>>, vector<1x4x128xbf16>
    %124 = vector.shape_cast %123 : vector<1x4x128xbf16> to vector<4x128xbf16>
    %cst_113 = arith.constant dense<0.000000e+00> : vector<8x128xf32>
    %125 = tpu.matmul %122, %124, %cst_113 {dimension_numbers = #tpu.dot_dimension_numbers<[1], [0], [0], [1], [0, 0, 1, 1], [], []>} : vector<8x4xbf16>, vector<4x128xbf16>, vector<8x128xf32> -> vector<8x128xf32>
    %126 = arith.addf %115, %125 : vector<8x128xf32>
    %c0_114 = arith.constant 0 : index
    %c3_115 = arith.constant 3 : index
    %127 = arith.index_cast %118 : i32 to index
    %c0_116 = arith.constant 0 : index
    %c0_117 = arith.constant 0 : index
    %128 = vector.load %arg2[%c0_114, %c3_115, %127, %c0_116, %c0_117] : memref<1x4x9x9x4xf32, #tpu.memory_space<vmem>>, vector<1x1x1x8x4xf32>
    %129 = vector.shape_cast %128 : vector<1x1x1x8x4xf32> to vector<8x4xf32>
    %130 = arith.truncf %129 : vector<8x4xf32> to vector<8x4xbf16>
    %c4_118 = arith.constant 4 : index
    %c0_119 = arith.constant 0 : index
    %c0_120 = arith.constant 0 : index
    %131 = vector.load %arg3[%c4_118, %c0_119, %c0_120] : memref<9x4x128xbf16, #tpu.memory_space<vmem>>, vector<1x4x128xbf16>
    %132 = vector.shape_cast %131 : vector<1x4x128xbf16> to vector<4x128xbf16>
    %cst_121 = arith.constant dense<0.000000e+00> : vector<8x128xf32>
    %133 = tpu.matmul %130, %132, %cst_121 {dimension_numbers = #tpu.dot_dimension_numbers<[1], [0], [0], [1], [0, 0, 1, 1], [], []>} : vector<8x4xbf16>, vector<4x128xbf16>, vector<8x128xf32> -> vector<8x128xf32>
    %134 = arith.addf %126, %133 : vector<8x128xf32>
    %c0_122 = arith.constant 0 : index
    %c2_123 = arith.constant 2 : index
    %135 = arith.index_cast %118 : i32 to index
    %c1_124 = arith.constant 1 : index
    %c0_125 = arith.constant 0 : index
    %136 = vector.load %arg2[%c0_122, %c2_123, %135, %c1_124, %c0_125] : memref<1x4x9x9x4xf32, #tpu.memory_space<vmem>>, vector<1x1x1x8x4xf32>
    %137 = vector.shape_cast %136 : vector<1x1x1x8x4xf32> to vector<8x4xf32>
    %138 = arith.truncf %137 : vector<8x4xf32> to vector<8x4xbf16>
    %c5_126 = arith.constant 5 : index
    %c0_127 = arith.constant 0 : index
    %c0_128 = arith.constant 0 : index
    %139 = vector.load %arg3[%c5_126, %c0_127, %c0_128] : memref<9x4x128xbf16, #tpu.memory_space<vmem>>, vector<1x4x128xbf16>
    %140 = vector.shape_cast %139 : vector<1x4x128xbf16> to vector<4x128xbf16>
    %cst_129 = arith.constant dense<0.000000e+00> : vector<8x128xf32>
    %141 = tpu.matmul %138, %140, %cst_129 {dimension_numbers = #tpu.dot_dimension_numbers<[1], [0], [0], [1], [0, 0, 1, 1], [], []>} : vector<8x4xbf16>, vector<4x128xbf16>, vector<8x128xf32> -> vector<8x128xf32>
    %142 = arith.addf %134, %141 : vector<8x128xf32>
    %c8_i32_130 = arith.constant 8 : i32
    %143 = arith.muli %arg1, %c8_i32_130 : i32
    %c1_i32_131 = arith.constant 1 : i32
    %144 = arith.addi %143, %c1_i32_131 : i32
    %c1_i32_132 = arith.constant 1 : i32
    %145 = arith.addi %144, %c1_i32_132 : i32
    %c0_133 = arith.constant 0 : index
    %c0_134 = arith.constant 0 : index
    %146 = arith.index_cast %145 : i32 to index
    %c0_135 = arith.constant 0 : index
    %c0_136 = arith.constant 0 : index
    %147 = vector.load %arg2[%c0_133, %c0_134, %146, %c0_135, %c0_136] : memref<1x4x9x9x4xf32, #tpu.memory_space<vmem>>, vector<1x1x1x8x4xf32>
    %148 = vector.shape_cast %147 : vector<1x1x1x8x4xf32> to vector<8x4xf32>
    %149 = arith.truncf %148 : vector<8x4xf32> to vector<8x4xbf16>
    %c6_137 = arith.constant 6 : index
    %c0_138 = arith.constant 0 : index
    %c0_139 = arith.constant 0 : index
    %150 = vector.load %arg3[%c6_137, %c0_138, %c0_139] : memref<9x4x128xbf16, #tpu.memory_space<vmem>>, vector<1x4x128xbf16>
    %151 = vector.shape_cast %150 : vector<1x4x128xbf16> to vector<4x128xbf16>
    %cst_140 = arith.constant dense<0.000000e+00> : vector<8x128xf32>
    %152 = tpu.matmul %149, %151, %cst_140 {dimension_numbers = #tpu.dot_dimension_numbers<[1], [0], [0], [1], [0, 0, 1, 1], [], []>} : vector<8x4xbf16>, vector<4x128xbf16>, vector<8x128xf32> -> vector<8x128xf32>
    %153 = arith.addf %142, %152 : vector<8x128xf32>
    %c0_141 = arith.constant 0 : index
    %c1_142 = arith.constant 1 : index
    %154 = arith.index_cast %145 : i32 to index
    %c0_143 = arith.constant 0 : index
    %c0_144 = arith.constant 0 : index
    %155 = vector.load %arg2[%c0_141, %c1_142, %154, %c0_143, %c0_144] : memref<1x4x9x9x4xf32, #tpu.memory_space<vmem>>, vector<1x1x1x8x4xf32>
    %156 = vector.shape_cast %155 : vector<1x1x1x8x4xf32> to vector<8x4xf32>
    %157 = arith.truncf %156 : vector<8x4xf32> to vector<8x4xbf16>
    %c7_145 = arith.constant 7 : index
    %c0_146 = arith.constant 0 : index
    %c0_147 = arith.constant 0 : index
    %158 = vector.load %arg3[%c7_145, %c0_146, %c0_147] : memref<9x4x128xbf16, #tpu.memory_space<vmem>>, vector<1x4x128xbf16>
    %159 = vector.shape_cast %158 : vector<1x4x128xbf16> to vector<4x128xbf16>
    %cst_148 = arith.constant dense<0.000000e+00> : vector<8x128xf32>
    %160 = tpu.matmul %157, %159, %cst_148 {dimension_numbers = #tpu.dot_dimension_numbers<[1], [0], [0], [1], [0, 0, 1, 1], [], []>} : vector<8x4xbf16>, vector<4x128xbf16>, vector<8x128xf32> -> vector<8x128xf32>
    %161 = arith.addf %153, %160 : vector<8x128xf32>
    %c0_149 = arith.constant 0 : index
    %c0_150 = arith.constant 0 : index
    %162 = arith.index_cast %145 : i32 to index
    %c1_151 = arith.constant 1 : index
    %c0_152 = arith.constant 0 : index
    %163 = vector.load %arg2[%c0_149, %c0_150, %162, %c1_151, %c0_152] : memref<1x4x9x9x4xf32, #tpu.memory_space<vmem>>, vector<1x1x1x8x4xf32>
    %164 = vector.shape_cast %163 : vector<1x1x1x8x4xf32> to vector<8x4xf32>
    %165 = arith.truncf %164 : vector<8x4xf32> to vector<8x4xbf16>
    %c8_153 = arith.constant 8 : index
    %c0_154 = arith.constant 0 : index
    %c0_155 = arith.constant 0 : index
    %166 = vector.load %arg3[%c8_153, %c0_154, %c0_155] : memref<9x4x128xbf16, #tpu.memory_space<vmem>>, vector<1x4x128xbf16>
    %167 = vector.shape_cast %166 : vector<1x4x128xbf16> to vector<4x128xbf16>
    %cst_156 = arith.constant dense<0.000000e+00> : vector<8x128xf32>
    %168 = tpu.matmul %165, %167, %cst_156 {dimension_numbers = #tpu.dot_dimension_numbers<[1], [0], [0], [1], [0, 0, 1, 1], [], []>} : vector<8x4xbf16>, vector<4x128xbf16>, vector<8x128xf32> -> vector<8x128xf32>
    %169 = arith.addf %161, %168 : vector<8x128xf32>
    %170 = vector.broadcast %0 : vector<1x128xf32> to vector<8x128xf32>
    %171 = arith.addf %169, %170 : vector<8x128xf32>
    %c0_157 = arith.constant 0 : index
    %c1_158 = arith.constant 1 : index
    %c0_159 = arith.constant 0 : index
    %c0_160 = arith.constant 0 : index
    %172 = vector.load %arg5[%c0_157, %c1_158, %c0_159, %c0_160] : memref<1x8x8x128xf32, #tpu.memory_space<vmem>>, vector<1x1x8x128xf32>
    %173 = vector.shape_cast %172 : vector<1x1x8x128xf32> to vector<8x128xf32>
    %174 = vector.shape_cast %171 : vector<8x128xf32> to vector<1x1x8x128xf32>
    tpu.vector_store %arg5[%c0_157, %c1_158, %c0_159, %c0_160], %174 {strides = array<i32>} : memref<1x8x8x128xf32, #tpu.memory_space<vmem>>, vector<1x1x8x128xf32>,
    %cst_161 = arith.constant 0.000000e+00 : f32
    %175 = vector.broadcast %cst_161 : f32 to vector<8x128xf32>
    %c8_i32_162 = arith.constant 8 : i32
    %176 = arith.muli %arg1, %c8_i32_162 : i32
    %c2_i32 = arith.constant 2 : i32
    %177 = arith.addi %176, %c2_i32 : i32
    %c0_i32_163 = arith.constant 0 : i32
    %178 = arith.addi %177, %c0_i32_163 : i32
    %c0_164 = arith.constant 0 : index
    %c0_165 = arith.constant 0 : index
    %179 = arith.index_cast %178 : i32 to index
    %c0_166 = arith.constant 0 : index
    %c0_167 = arith.constant 0 : index
    %180 = vector.load %arg2[%c0_164, %c0_165, %179, %c0_166, %c0_167] : memref<1x4x9x9x4xf32, #tpu.memory_space<vmem>>, vector<1x1x1x8x4xf32>
    %181 = vector.shape_cast %180 : vector<1x1x1x8x4xf32> to vector<8x4xf32>
    %182 = arith.truncf %181 : vector<8x4xf32> to vector<8x4xbf16>
    %c0_168 = arith.constant 0 : index
    %c0_169 = arith.constant 0 : index
    %c0_170 = arith.constant 0 : index
    %183 = vector.load %arg3[%c0_168, %c0_169, %c0_170] : memref<9x4x128xbf16, #tpu.memory_space<vmem>>, vector<1x4x128xbf16>
    %184 = vector.shape_cast %183 : vector<1x4x128xbf16> to vector<4x128xbf16>
    %cst_171 = arith.constant dense<0.000000e+00> : vector<8x128xf32>
    %185 = tpu.matmul %182, %184, %cst_171 {dimension_numbers = #tpu.dot_dimension_numbers<[1], [0], [0], [1], [0, 0, 1, 1], [], []>} : vector<8x4xbf16>, vector<4x128xbf16>, vector<8x128xf32> -> vector<8x128xf32>
    %186 = arith.addf %175, %185 : vector<8x128xf32>
    %c0_172 = arith.constant 0 : index
    %c1_173 = arith.constant 1 : index
    %187 = arith.index_cast %178 : i32 to index
    %c0_174 = arith.constant 0 : index
    %c0_175 = arith.constant 0 : index
    %188 = vector.load %arg2[%c0_172, %c1_173, %187, %c0_174, %c0_175] : memref<1x4x9x9x4xf32, #tpu.memory_space<vmem>>, vector<1x1x1x8x4xf32>
    %189 = vector.shape_cast %188 : vector<1x1x1x8x4xf32> to vector<8x4xf32>
    %190 = arith.truncf %189 : vector<8x4xf32> to vector<8x4xbf16>
    %c1_176 = arith.constant 1 : index
    %c0_177 = arith.constant 0 : index
    %c0_178 = arith.constant 0 : index
    %191 = vector.load %arg3[%c1_176, %c0_177, %c0_178] : memref<9x4x128xbf16, #tpu.memory_space<vmem>>, vector<1x4x128xbf16>
    %192 = vector.shape_cast %191 : vector<1x4x128xbf16> to vector<4x128xbf16>
    %cst_179 = arith.constant dense<0.000000e+00> : vector<8x128xf32>
    %193 = tpu.matmul %190, %192, %cst_179 {dimension_numbers = #tpu.dot_dimension_numbers<[1], [0], [0], [1], [0, 0, 1, 1], [], []>} : vector<8x4xbf16>, vector<4x128xbf16>, vector<8x128xf32> -> vector<8x128xf32>
    %194 = arith.addf %186, %193 : vector<8x128xf32>
    %c0_180 = arith.constant 0 : index
    %c0_181 = arith.constant 0 : index
    %195 = arith.index_cast %178 : i32 to index
    %c1_182 = arith.constant 1 : index
    %c0_183 = arith.constant 0 : index
    %196 = vector.load %arg2[%c0_180, %c0_181, %195, %c1_182, %c0_183] : memref<1x4x9x9x4xf32, #tpu.memory_space<vmem>>, vector<1x1x1x8x4xf32>
    %197 = vector.shape_cast %196 : vector<1x1x1x8x4xf32> to vector<8x4xf32>
    %198 = arith.truncf %197 : vector<8x4xf32> to vector<8x4xbf16>
    %c2_184 = arith.constant 2 : index
    %c0_185 = arith.constant 0 : index
    %c0_186 = arith.constant 0 : index
    %199 = vector.load %arg3[%c2_184, %c0_185, %c0_186] : memref<9x4x128xbf16, #tpu.memory_space<vmem>>, vector<1x4x128xbf16>
    %200 = vector.shape_cast %199 : vector<1x4x128xbf16> to vector<4x128xbf16>
    %cst_187 = arith.constant dense<0.000000e+00> : vector<8x128xf32>
    %201 = tpu.matmul %198, %200, %cst_187 {dimension_numbers = #tpu.dot_dimension_numbers<[1], [0], [0], [1], [0, 0, 1, 1], [], []>} : vector<8x4xbf16>, vector<4x128xbf16>, vector<8x128xf32> -> vector<8x128xf32>
    %202 = arith.addf %194, %201 : vector<8x128xf32>
    %c8_i32_188 = arith.constant 8 : i32
    %203 = arith.muli %arg1, %c8_i32_188 : i32
    %c2_i32_189 = arith.constant 2 : i32
    %204 = arith.addi %203, %c2_i32_189 : i32
    %c0_i32_190 = arith.constant 0 : i32
    %205 = arith.addi %204, %c0_i32_190 : i32
    %c0_191 = arith.constant 0 : index
    %c2_192 = arith.constant 2 : index
    %206 = arith.index_cast %205 : i32 to index
    %c0_193 = arith.constant 0 : index
    %c0_194 = arith.constant 0 : index
    %207 = vector.load %arg2[%c0_191, %c2_192, %206, %c0_193, %c0_194] : memref<1x4x9x9x4xf32, #tpu.memory_space<vmem>>, vector<1x1x1x8x4xf32>
    %208 = vector.shape_cast %207 : vector<1x1x1x8x4xf32> to vector<8x4xf32>
    %209 = arith.truncf %208 : vector<8x4xf32> to vector<8x4xbf16>
    %c3_195 = arith.constant 3 : index
    %c0_196 = arith.constant 0 : index
    %c0_197 = arith.constant 0 : index
    %210 = vector.load %arg3[%c3_195, %c0_196, %c0_197] : memref<9x4x128xbf16, #tpu.memory_space<vmem>>, vector<1x4x128xbf16>
    %211 = vector.shape_cast %210 : vector<1x4x128xbf16> to vector<4x128xbf16>
    %cst_198 = arith.constant dense<0.000000e+00> : vector<8x128xf32>
    %212 = tpu.matmul %209, %211, %cst_198 {dimension_numbers = #tpu.dot_dimension_numbers<[1], [0], [0], [1], [0, 0, 1, 1], [], []>} : vector<8x4xbf16>, vector<4x128xbf16>, vector<8x128xf32> -> vector<8x128xf32>
    %213 = arith.addf %202, %212 : vector<8x128xf32>
    %c0_199 = arith.constant 0 : index
    %c3_200 = arith.constant 3 : index
    %214 = arith.index_cast %205 : i32 to index
    %c0_201 = arith.constant 0 : index
    %c0_202 = arith.constant 0 : index
    %215 = vector.load %arg2[%c0_199, %c3_200, %214, %c0_201, %c0_202] : memref<1x4x9x9x4xf32, #tpu.memory_space<vmem>>, vector<1x1x1x8x4xf32>
    %216 = vector.shape_cast %215 : vector<1x1x1x8x4xf32> to vector<8x4xf32>
    %217 = arith.truncf %216 : vector<8x4xf32> to vector<8x4xbf16>
    %c4_203 = arith.constant 4 : index
    %c0_204 = arith.constant 0 : index
    %c0_205 = arith.constant 0 : index
    %218 = vector.load %arg3[%c4_203, %c0_204, %c0_205] : memref<9x4x128xbf16, #tpu.memory_space<vmem>>, vector<1x4x128xbf16>
    %219 = vector.shape_cast %218 : vector<1x4x128xbf16> to vector<4x128xbf16>
    %cst_206 = arith.constant dense<0.000000e+00> : vector<8x128xf32>
    %220 = tpu.matmul %217, %219, %cst_206 {dimension_numbers = #tpu.dot_dimension_numbers<[1], [0], [0], [1], [0, 0, 1, 1], [], []>} : vector<8x4xbf16>, vector<4x128xbf16>, vector<8x128xf32> -> vector<8x128xf32>
    %221 = arith.addf %213, %220 : vector<8x128xf32>
    %c0_207 = arith.constant 0 : index
    %c2_208 = arith.constant 2 : index
    %222 = arith.index_cast %205 : i32 to index
    %c1_209 = arith.constant 1 : index
    %c0_210 = arith.constant 0 : index
    %223 = vector.load %arg2[%c0_207, %c2_208, %222, %c1_209, %c0_210] : memref<1x4x9x9x4xf32, #tpu.memory_space<vmem>>, vector<1x1x1x8x4xf32>
    %224 = vector.shape_cast %223 : vector<1x1x1x8x4xf32> to vector<8x4xf32>
    %225 = arith.truncf %224 : vector<8x4xf32> to vector<8x4xbf16>
    %c5_211 = arith.constant 5 : index
    %c0_212 = arith.constant 0 : index
    %c0_213 = arith.constant 0 : index
    %226 = vector.load %arg3[%c5_211, %c0_212, %c0_213] : memref<9x4x128xbf16, #tpu.memory_space<vmem>>, vector<1x4x128xbf16>
    %227 = vector.shape_cast %226 : vector<1x4x128xbf16> to vector<4x128xbf16>
    %cst_214 = arith.constant dense<0.000000e+00> : vector<8x128xf32>
    %228 = tpu.matmul %225, %227, %cst_214 {dimension_numbers = #tpu.dot_dimension_numbers<[1], [0], [0], [1], [0, 0, 1, 1], [], []>} : vector<8x4xbf16>, vector<4x128xbf16>, vector<8x128xf32> -> vector<8x128xf32>
    %229 = arith.addf %221, %228 : vector<8x128xf32>
    %c8_i32_215 = arith.constant 8 : i32
    %230 = arith.muli %arg1, %c8_i32_215 : i32
    %c2_i32_216 = arith.constant 2 : i32
    %231 = arith.addi %230, %c2_i32_216 : i32
    %c1_i32_217 = arith.constant 1 : i32
    %232 = arith.addi %231, %c1_i32_217 : i32
    %c0_218 = arith.constant 0 : index
    %c0_219 = arith.constant 0 : index
    %233 = arith.index_cast %232 : i32 to index
    %c0_220 = arith.constant 0 : index
    %c0_221 = arith.constant 0 : index
    %234 = vector.load %arg2[%c0_218, %c0_219, %233, %c0_220, %c0_221] : memref<1x4x9x9x4xf32, #tpu.memory_space<vmem>>, vector<1x1x1x8x4xf32>
    %235 = vector.shape_cast %234 : vector<1x1x1x8x4xf32> to vector<8x4xf32>
    %236 = arith.truncf %235 : vector<8x4xf32> to vector<8x4xbf16>
    %c6_222 = arith.constant 6 : index
    %c0_223 = arith.constant 0 : index
    %c0_224 = arith.constant 0 : index
    %237 = vector.load %arg3[%c6_222, %c0_223, %c0_224] : memref<9x4x128xbf16, #tpu.memory_space<vmem>>, vector<1x4x128xbf16>
    %238 = vector.shape_cast %237 : vector<1x4x128xbf16> to vector<4x128xbf16>
    %cst_225 = arith.constant dense<0.000000e+00> : vector<8x128xf32>
    %239 = tpu.matmul %236, %238, %cst_225 {dimension_numbers = #tpu.dot_dimension_numbers<[1], [0], [0], [1], [0, 0, 1, 1], [], []>} : vector<8x4xbf16>, vector<4x128xbf16>, vector<8x128xf32> -> vector<8x128xf32>
    %240 = arith.addf %229, %239 : vector<8x128xf32>
    %c0_226 = arith.constant 0 : index
    %c1_227 = arith.constant 1 : index
    %241 = arith.index_cast %232 : i32 to index
    %c0_228 = arith.constant 0 : index
    %c0_229 = arith.constant 0 : index
    %242 = vector.load %arg2[%c0_226, %c1_227, %241, %c0_228, %c0_229] : memref<1x4x9x9x4xf32, #tpu.memory_space<vmem>>, vector<1x1x1x8x4xf32>
    %243 = vector.shape_cast %242 : vector<1x1x1x8x4xf32> to vector<8x4xf32>
    %244 = arith.truncf %243 : vector<8x4xf32> to vector<8x4xbf16>
    %c7_230 = arith.constant 7 : index
    %c0_231 = arith.constant 0 : index
    %c0_232 = arith.constant 0 : index
    %245 = vector.load %arg3[%c7_230, %c0_231, %c0_232] : memref<9x4x128xbf16, #tpu.memory_space<vmem>>, vector<1x4x128xbf16>
    %246 = vector.shape_cast %245 : vector<1x4x128xbf16> to vector<4x128xbf16>
    %cst_233 = arith.constant dense<0.000000e+00> : vector<8x128xf32>
    %247 = tpu.matmul %244, %246, %cst_233 {dimension_numbers = #tpu.dot_dimension_numbers<[1], [0], [0], [1], [0, 0, 1, 1], [], []>} : vector<8x4xbf16>, vector<4x128xbf16>, vector<8x128xf32> -> vector<8x128xf32>
    %248 = arith.addf %240, %247 : vector<8x128xf32>
    %c0_234 = arith.constant 0 : index
    %c0_235 = arith.constant 0 : index
    %249 = arith.index_cast %232 : i32 to index
    %c1_236 = arith.constant 1 : index
    %c0_237 = arith.constant 0 : index
    %250 = vector.load %arg2[%c0_234, %c0_235, %249, %c1_236, %c0_237] : memref<1x4x9x9x4xf32, #tpu.memory_space<vmem>>, vector<1x1x1x8x4xf32>
    %251 = vector.shape_cast %250 : vector<1x1x1x8x4xf32> to vector<8x4xf32>
    %252 = arith.truncf %251 : vector<8x4xf32> to vector<8x4xbf16>
    %c8_238 = arith.constant 8 : index
    %c0_239 = arith.constant 0 : index
    %c0_240 = arith.constant 0 : index
    %253 = vector.load %arg3[%c8_238, %c0_239, %c0_240] : memref<9x4x128xbf16, #tpu.memory_space<vmem>>, vector<1x4x128xbf16>
    %254 = vector.shape_cast %253 : vector<1x4x128xbf16> to vector<4x128xbf16>
    %cst_241 = arith.constant dense<0.000000e+00> : vector<8x128xf32>
    %255 = tpu.matmul %252, %254, %cst_241 {dimension_numbers = #tpu.dot_dimension_numbers<[1], [0], [0], [1], [0, 0, 1, 1], [], []>} : vector<8x4xbf16>, vector<4x128xbf16>, vector<8x128xf32> -> vector<8x128xf32>
    %256 = arith.addf %248, %255 : vector<8x128xf32>
    %257 = vector.broadcast %0 : vector<1x128xf32> to vector<8x128xf32>
    %258 = arith.addf %256, %257 : vector<8x128xf32>
    %c0_242 = arith.constant 0 : index
    %c2_243 = arith.constant 2 : index
    %c0_244 = arith.constant 0 : index
    %c0_245 = arith.constant 0 : index
    %259 = vector.load %arg5[%c0_242, %c2_243, %c0_244, %c0_245] : memref<1x8x8x128xf32, #tpu.memory_space<vmem>>, vector<1x1x8x128xf32>
    %260 = vector.shape_cast %259 : vector<1x1x8x128xf32> to vector<8x128xf32>
    %261 = vector.shape_cast %258 : vector<8x128xf32> to vector<1x1x8x128xf32>
    tpu.vector_store %arg5[%c0_242, %c2_243, %c0_244, %c0_245], %261 {strides = array<i32>} : memref<1x8x8x128xf32, #tpu.memory_space<vmem>>, vector<1x1x8x128xf32>,
    %cst_246 = arith.constant 0.000000e+00 : f32
    %262 = vector.broadcast %cst_246 : f32 to vector<8x128xf32>
    %c8_i32_247 = arith.constant 8 : i32
    %263 = arith.muli %arg1, %c8_i32_247 : i32
    %c3_i32 = arith.constant 3 : i32
    %264 = arith.addi %263, %c3_i32 : i32
    %c0_i32_248 = arith.constant 0 : i32
    %265 = arith.addi %264, %c0_i32_248 : i32
    %c0_249 = arith.constant 0 : index
    %c0_250 = arith.constant 0 : index
    %266 = arith.index_cast %265 : i32 to index
    %c0_251 = arith.constant 0 : index
    %c0_252 = arith.constant 0 : index
    %267 = vector.load %arg2[%c0_249, %c0_250, %266, %c0_251, %c0_252] : memref<1x4x9x9x4xf32, #tpu.memory_space<vmem>>, vector<1x1x1x8x4xf32>
    %268 = vector.shape_cast %267 : vector<1x1x1x8x4xf32> to vector<8x4xf32>
    %269 = arith.truncf %268 : vector<8x4xf32> to vector<8x4xbf16>
    %c0_253 = arith.constant 0 : index
    %c0_254 = arith.constant 0 : index
    %c0_255 = arith.constant 0 : index
    %270 = vector.load %arg3[%c0_253, %c0_254, %c0_255] : memref<9x4x128xbf16, #tpu.memory_space<vmem>>, vector<1x4x128xbf16>
    %271 = vector.shape_cast %270 : vector<1x4x128xbf16> to vector<4x128xbf16>
    %cst_256 = arith.constant dense<0.000000e+00> : vector<8x128xf32>
    %272 = tpu.matmul %269, %271, %cst_256 {dimension_numbers = #tpu.dot_dimension_numbers<[1], [0], [0], [1], [0, 0, 1, 1], [], []>} : vector<8x4xbf16>, vector<4x128xbf16>, vector<8x128xf32> -> vector<8x128xf32>
    %273 = arith.addf %262, %272 : vector<8x128xf32>
    %c0_257 = arith.constant 0 : index
    %c1_258 = arith.constant 1 : index
    %274 = arith.index_cast %265 : i32 to index
    %c0_259 = arith.constant 0 : index
    %c0_260 = arith.constant 0 : index
    %275 = vector.load %arg2[%c0_257, %c1_258, %274, %c0_259, %c0_260] : memref<1x4x9x9x4xf32, #tpu.memory_space<vmem>>, vector<1x1x1x8x4xf32>
    %276 = vector.shape_cast %275 : vector<1x1x1x8x4xf32> to vector<8x4xf32>
    %277 = arith.truncf %276 : vector<8x4xf32> to vector<8x4xbf16>
    %c1_261 = arith.constant 1 : index
    %c0_262 = arith.constant 0 : index
    %c0_263 = arith.constant 0 : index
    %278 = vector.load %arg3[%c1_261, %c0_262, %c0_263] : memref<9x4x128xbf16, #tpu.memory_space<vmem>>, vector<1x4x128xbf16>
    %279 = vector.shape_cast %278 : vector<1x4x128xbf16> to vector<4x128xbf16>
    %cst_264 = arith.constant dense<0.000000e+00> : vector<8x128xf32>
    %280 = tpu.matmul %277, %279, %cst_264 {dimension_numbers = #tpu.dot_dimension_numbers<[1], [0], [0], [1], [0, 0, 1, 1], [], []>} : vector<8x4xbf16>, vector<4x128xbf16>, vector<8x128xf32> -> vector<8x128xf32>
    %281 = arith.addf %273, %280 : vector<8x128xf32>
    %c0_265 = arith.constant 0 : index
    %c0_266 = arith.constant 0 : index
    %282 = arith.index_cast %265 : i32 to index
    %c1_267 = arith.constant 1 : index
    %c0_268 = arith.constant 0 : index
    %283 = vector.load %arg2[%c0_265, %c0_266, %282, %c1_267, %c0_268] : memref<1x4x9x9x4xf32, #tpu.memory_space<vmem>>, vector<1x1x1x8x4xf32>
    %284 = vector.shape_cast %283 : vector<1x1x1x8x4xf32> to vector<8x4xf32>
    %285 = arith.truncf %284 : vector<8x4xf32> to vector<8x4xbf16>
    %c2_269 = arith.constant 2 : index
    %c0_270 = arith.constant 0 : index
    %c0_271 = arith.constant 0 : index
    %286 = vector.load %arg3[%c2_269, %c0_270, %c0_271] : memref<9x4x128xbf16, #tpu.memory_space<vmem>>, vector<1x4x128xbf16>
    %287 = vector.shape_cast %286 : vector<1x4x128xbf16> to vector<4x128xbf16>
    %cst_272 = arith.constant dense<0.000000e+00> : vector<8x128xf32>
    %288 = tpu.matmul %285, %287, %cst_272 {dimension_numbers = #tpu.dot_dimension_numbers<[1], [0], [0], [1], [0, 0, 1, 1], [], []>} : vector<8x4xbf16>, vector<4x128xbf16>, vector<8x128xf32> -> vector<8x128xf32>
    %289 = arith.addf %281, %288 : vector<8x128xf32>
    %c8_i32_273 = arith.constant 8 : i32
    %290 = arith.muli %arg1, %c8_i32_273 : i32
    %c3_i32_274 = arith.constant 3 : i32
    %291 = arith.addi %290, %c3_i32_274 : i32
    %c0_i32_275 = arith.constant 0 : i32
    %292 = arith.addi %291, %c0_i32_275 : i32
    %c0_276 = arith.constant 0 : index
    %c2_277 = arith.constant 2 : index
    %293 = arith.index_cast %292 : i32 to index
    %c0_278 = arith.constant 0 : index
    %c0_279 = arith.constant 0 : index
    %294 = vector.load %arg2[%c0_276, %c2_277, %293, %c0_278, %c0_279] : memref<1x4x9x9x4xf32, #tpu.memory_space<vmem>>, vector<1x1x1x8x4xf32>
    %295 = vector.shape_cast %294 : vector<1x1x1x8x4xf32> to vector<8x4xf32>
    %296 = arith.truncf %295 : vector<8x4xf32> to vector<8x4xbf16>
    %c3_280 = arith.constant 3 : index
    %c0_281 = arith.constant 0 : index
    %c0_282 = arith.constant 0 : index
    %297 = vector.load %arg3[%c3_280, %c0_281, %c0_282] : memref<9x4x128xbf16, #tpu.memory_space<vmem>>, vector<1x4x128xbf16>
    %298 = vector.shape_cast %297 : vector<1x4x128xbf16> to vector<4x128xbf16>
    %cst_283 = arith.constant dense<0.000000e+00> : vector<8x128xf32>
    %299 = tpu.matmul %296, %298, %cst_283 {dimension_numbers = #tpu.dot_dimension_numbers<[1], [0], [0], [1], [0, 0, 1, 1], [], []>} : vector<8x4xbf16>, vector<4x128xbf16>, vector<8x128xf32> -> vector<8x128xf32>
    %300 = arith.addf %289, %299 : vector<8x128xf32>
    %c0_284 = arith.constant 0 : index
    %c3_285 = arith.constant 3 : index
    %301 = arith.index_cast %292 : i32 to index
    %c0_286 = arith.constant 0 : index
    %c0_287 = arith.constant 0 : index
    %302 = vector.load %arg2[%c0_284, %c3_285, %301, %c0_286, %c0_287] : memref<1x4x9x9x4xf32, #tpu.memory_space<vmem>>, vector<1x1x1x8x4xf32>
    %303 = vector.shape_cast %302 : vector<1x1x1x8x4xf32> to vector<8x4xf32>
    %304 = arith.truncf %303 : vector<8x4xf32> to vector<8x4xbf16>
    %c4_288 = arith.constant 4 : index
    %c0_289 = arith.constant 0 : index
    %c0_290 = arith.constant 0 : index
    %305 = vector.load %arg3[%c4_288, %c0_289, %c0_290] : memref<9x4x128xbf16, #tpu.memory_space<vmem>>, vector<1x4x128xbf16>
    %306 = vector.shape_cast %305 : vector<1x4x128xbf16> to vector<4x128xbf16>
    %cst_291 = arith.constant dense<0.000000e+00> : vector<8x128xf32>
    %307 = tpu.matmul %304, %306, %cst_291 {dimension_numbers = #tpu.dot_dimension_numbers<[1], [0], [0], [1], [0, 0, 1, 1], [], []>} : vector<8x4xbf16>, vector<4x128xbf16>, vector<8x128xf32> -> vector<8x128xf32>
    %308 = arith.addf %300, %307 : vector<8x128xf32>
    %c0_292 = arith.constant 0 : index
    %c2_293 = arith.constant 2 : index
    %309 = arith.index_cast %292 : i32 to index
    %c1_294 = arith.constant 1 : index
    %c0_295 = arith.constant 0 : index
    %310 = vector.load %arg2[%c0_292, %c2_293, %309, %c1_294, %c0_295] : memref<1x4x9x9x4xf32, #tpu.memory_space<vmem>>, vector<1x1x1x8x4xf32>
    %311 = vector.shape_cast %310 : vector<1x1x1x8x4xf32> to vector<8x4xf32>
    %312 = arith.truncf %311 : vector<8x4xf32> to vector<8x4xbf16>
    %c5_296 = arith.constant 5 : index
    %c0_297 = arith.constant 0 : index
    %c0_298 = arith.constant 0 : index
    %313 = vector.load %arg3[%c5_296, %c0_297, %c0_298] : memref<9x4x128xbf16, #tpu.memory_space<vmem>>, vector<1x4x128xbf16>
    %314 = vector.shape_cast %313 : vector<1x4x128xbf16> to vector<4x128xbf16>
    %cst_299 = arith.constant dense<0.000000e+00> : vector<8x128xf32>
    %315 = tpu.matmul %312, %314, %cst_299 {dimension_numbers = #tpu.dot_dimension_numbers<[1], [0], [0], [1], [0, 0, 1, 1], [], []>} : vector<8x4xbf16>, vector<4x128xbf16>, vector<8x128xf32> -> vector<8x128xf32>
    %316 = arith.addf %308, %315 : vector<8x128xf32>
    %c8_i32_300 = arith.constant 8 : i32
    %317 = arith.muli %arg1, %c8_i32_300 : i32
    %c3_i32_301 = arith.constant 3 : i32
    %318 = arith.addi %317, %c3_i32_301 : i32
    %c1_i32_302 = arith.constant 1 : i32
    %319 = arith.addi %318, %c1_i32_302 : i32
    %c0_303 = arith.constant 0 : index
    %c0_304 = arith.constant 0 : index
    %320 = arith.index_cast %319 : i32 to index
    %c0_305 = arith.constant 0 : index
    %c0_306 = arith.constant 0 : index
    %321 = vector.load %arg2[%c0_303, %c0_304, %320, %c0_305, %c0_306] : memref<1x4x9x9x4xf32, #tpu.memory_space<vmem>>, vector<1x1x1x8x4xf32>
    %322 = vector.shape_cast %321 : vector<1x1x1x8x4xf32> to vector<8x4xf32>
    %323 = arith.truncf %322 : vector<8x4xf32> to vector<8x4xbf16>
    %c6_307 = arith.constant 6 : index
    %c0_308 = arith.constant 0 : index
    %c0_309 = arith.constant 0 : index
    %324 = vector.load %arg3[%c6_307, %c0_308, %c0_309] : memref<9x4x128xbf16, #tpu.memory_space<vmem>>, vector<1x4x128xbf16>
    %325 = vector.shape_cast %324 : vector<1x4x128xbf16> to vector<4x128xbf16>
    %cst_310 = arith.constant dense<0.000000e+00> : vector<8x128xf32>
    %326 = tpu.matmul %323, %325, %cst_310 {dimension_numbers = #tpu.dot_dimension_numbers<[1], [0], [0], [1], [0, 0, 1, 1], [], []>} : vector<8x4xbf16>, vector<4x128xbf16>, vector<8x128xf32> -> vector<8x128xf32>
    %327 = arith.addf %316, %326 : vector<8x128xf32>
    %c0_311 = arith.constant 0 : index
    %c1_312 = arith.constant 1 : index
    %328 = arith.index_cast %319 : i32 to index
    %c0_313 = arith.constant 0 : index
    %c0_314 = arith.constant 0 : index
    %329 = vector.load %arg2[%c0_311, %c1_312, %328, %c0_313, %c0_314] : memref<1x4x9x9x4xf32, #tpu.memory_space<vmem>>, vector<1x1x1x8x4xf32>
    %330 = vector.shape_cast %329 : vector<1x1x1x8x4xf32> to vector<8x4xf32>
    %331 = arith.truncf %330 : vector<8x4xf32> to vector<8x4xbf16>
    %c7_315 = arith.constant 7 : index
    %c0_316 = arith.constant 0 : index
    %c0_317 = arith.constant 0 : index
    %332 = vector.load %arg3[%c7_315, %c0_316, %c0_317] : memref<9x4x128xbf16, #tpu.memory_space<vmem>>, vector<1x4x128xbf16>
    %333 = vector.shape_cast %332 : vector<1x4x128xbf16> to vector<4x128xbf16>
    %cst_318 = arith.constant dense<0.000000e+00> : vector<8x128xf32>
    %334 = tpu.matmul %331, %333, %cst_318 {dimension_numbers = #tpu.dot_dimension_numbers<[1], [0], [0], [1], [0, 0, 1, 1], [], []>} : vector<8x4xbf16>, vector<4x128xbf16>, vector<8x128xf32> -> vector<8x128xf32>
    %335 = arith.addf %327, %334 : vector<8x128xf32>
    %c0_319 = arith.constant 0 : index
    %c0_320 = arith.constant 0 : index
    %336 = arith.index_cast %319 : i32 to index
    %c1_321 = arith.constant 1 : index
    %c0_322 = arith.constant 0 : index
    %337 = vector.load %arg2[%c0_319, %c0_320, %336, %c1_321, %c0_322] : memref<1x4x9x9x4xf32, #tpu.memory_space<vmem>>, vector<1x1x1x8x4xf32>
    %338 = vector.shape_cast %337 : vector<1x1x1x8x4xf32> to vector<8x4xf32>
    %339 = arith.truncf %338 : vector<8x4xf32> to vector<8x4xbf16>
    %c8_323 = arith.constant 8 : index
    %c0_324 = arith.constant 0 : index
    %c0_325 = arith.constant 0 : index
    %340 = vector.load %arg3[%c8_323, %c0_324, %c0_325] : memref<9x4x128xbf16, #tpu.memory_space<vmem>>, vector<1x4x128xbf16>
    %341 = vector.shape_cast %340 : vector<1x4x128xbf16> to vector<4x128xbf16>
    %cst_326 = arith.constant dense<0.000000e+00> : vector<8x128xf32>
    %342 = tpu.matmul %339, %341, %cst_326 {dimension_numbers = #tpu.dot_dimension_numbers<[1], [0], [0], [1], [0, 0, 1, 1], [], []>} : vector<8x4xbf16>, vector<4x128xbf16>, vector<8x128xf32> -> vector<8x128xf32>
    %343 = arith.addf %335, %342 : vector<8x128xf32>
    %344 = vector.broadcast %0 : vector<1x128xf32> to vector<8x128xf32>
    %345 = arith.addf %343, %344 : vector<8x128xf32>
    %c0_327 = arith.constant 0 : index
    %c3_328 = arith.constant 3 : index
    %c0_329 = arith.constant 0 : index
    %c0_330 = arith.constant 0 : index
    %346 = vector.load %arg5[%c0_327, %c3_328, %c0_329, %c0_330] : memref<1x8x8x128xf32, #tpu.memory_space<vmem>>, vector<1x1x8x128xf32>
    %347 = vector.shape_cast %346 : vector<1x1x8x128xf32> to vector<8x128xf32>
    %348 = vector.shape_cast %345 : vector<8x128xf32> to vector<1x1x8x128xf32>
    tpu.vector_store %arg5[%c0_327, %c3_328, %c0_329, %c0_330], %348 {strides = array<i32>} : memref<1x8x8x128xf32, #tpu.memory_space<vmem>>, vector<1x1x8x128xf32>,
    %cst_331 = arith.constant 0.000000e+00 : f32
    %349 = vector.broadcast %cst_331 : f32 to vector<8x128xf32>
    %c8_i32_332 = arith.constant 8 : i32
    %350 = arith.muli %arg1, %c8_i32_332 : i32
    %c4_i32 = arith.constant 4 : i32
    %351 = arith.addi %350, %c4_i32 : i32
    %c0_i32_333 = arith.constant 0 : i32
    %352 = arith.addi %351, %c0_i32_333 : i32
    %c0_334 = arith.constant 0 : index
    %c0_335 = arith.constant 0 : index
    %353 = arith.index_cast %352 : i32 to index
    %c0_336 = arith.constant 0 : index
    %c0_337 = arith.constant 0 : index
    %354 = vector.load %arg2[%c0_334, %c0_335, %353, %c0_336, %c0_337] : memref<1x4x9x9x4xf32, #tpu.memory_space<vmem>>, vector<1x1x1x8x4xf32>
    %355 = vector.shape_cast %354 : vector<1x1x1x8x4xf32> to vector<8x4xf32>
    %356 = arith.truncf %355 : vector<8x4xf32> to vector<8x4xbf16>
    %c0_338 = arith.constant 0 : index
    %c0_339 = arith.constant 0 : index
    %c0_340 = arith.constant 0 : index
    %357 = vector.load %arg3[%c0_338, %c0_339, %c0_340] : memref<9x4x128xbf16, #tpu.memory_space<vmem>>, vector<1x4x128xbf16>
    %358 = vector.shape_cast %357 : vector<1x4x128xbf16> to vector<4x128xbf16>
    %cst_341 = arith.constant dense<0.000000e+00> : vector<8x128xf32>
    %359 = tpu.matmul %356, %358, %cst_341 {dimension_numbers = #tpu.dot_dimension_numbers<[1], [0], [0], [1], [0, 0, 1, 1], [], []>} : vector<8x4xbf16>, vector<4x128xbf16>, vector<8x128xf32> -> vector<8x128xf32>
    %360 = arith.addf %349, %359 : vector<8x128xf32>
    %c0_342 = arith.constant 0 : index
    %c1_343 = arith.constant 1 : index
    %361 = arith.index_cast %352 : i32 to index
    %c0_344 = arith.constant 0 : index
    %c0_345 = arith.constant 0 : index
    %362 = vector.load %arg2[%c0_342, %c1_343, %361, %c0_344, %c0_345] : memref<1x4x9x9x4xf32, #tpu.memory_space<vmem>>, vector<1x1x1x8x4xf32>
    %363 = vector.shape_cast %362 : vector<1x1x1x8x4xf32> to vector<8x4xf32>
    %364 = arith.truncf %363 : vector<8x4xf32> to vector<8x4xbf16>
    %c1_346 = arith.constant 1 : index
    %c0_347 = arith.constant 0 : index
    %c0_348 = arith.constant 0 : index
    %365 = vector.load %arg3[%c1_346, %c0_347, %c0_348] : memref<9x4x128xbf16, #tpu.memory_space<vmem>>, vector<1x4x128xbf16>
    %366 = vector.shape_cast %365 : vector<1x4x128xbf16> to vector<4x128xbf16>
    %cst_349 = arith.constant dense<0.000000e+00> : vector<8x128xf32>
    %367 = tpu.matmul %364, %366, %cst_349 {dimension_numbers = #tpu.dot_dimension_numbers<[1], [0], [0], [1], [0, 0, 1, 1], [], []>} : vector<8x4xbf16>, vector<4x128xbf16>, vector<8x128xf32> -> vector<8x128xf32>
    %368 = arith.addf %360, %367 : vector<8x128xf32>
    %c0_350 = arith.constant 0 : index
    %c0_351 = arith.constant 0 : index
    %369 = arith.index_cast %352 : i32 to index
    %c1_352 = arith.constant 1 : index
    %c0_353 = arith.constant 0 : index
    %370 = vector.load %arg2[%c0_350, %c0_351, %369, %c1_352, %c0_353] : memref<1x4x9x9x4xf32, #tpu.memory_space<vmem>>, vector<1x1x1x8x4xf32>
    %371 = vector.shape_cast %370 : vector<1x1x1x8x4xf32> to vector<8x4xf32>
    %372 = arith.truncf %371 : vector<8x4xf32> to vector<8x4xbf16>
    %c2_354 = arith.constant 2 : index
    %c0_355 = arith.constant 0 : index
    %c0_356 = arith.constant 0 : index
    %373 = vector.load %arg3[%c2_354, %c0_355, %c0_356] : memref<9x4x128xbf16, #tpu.memory_space<vmem>>, vector<1x4x128xbf16>
    %374 = vector.shape_cast %373 : vector<1x4x128xbf16> to vector<4x128xbf16>
    %cst_357 = arith.constant dense<0.000000e+00> : vector<8x128xf32>
    %375 = tpu.matmul %372, %374, %cst_357 {dimension_numbers = #tpu.dot_dimension_numbers<[1], [0], [0], [1], [0, 0, 1, 1], [], []>} : vector<8x4xbf16>, vector<4x128xbf16>, vector<8x128xf32> -> vector<8x128xf32>
    %376 = arith.addf %368, %375 : vector<8x128xf32>
    %c8_i32_358 = arith.constant 8 : i32
    %377 = arith.muli %arg1, %c8_i32_358 : i32
    %c4_i32_359 = arith.constant 4 : i32
    %378 = arith.addi %377, %c4_i32_359 : i32
    %c0_i32_360 = arith.constant 0 : i32
    %379 = arith.addi %378, %c0_i32_360 : i32
    %c0_361 = arith.constant 0 : index
    %c2_362 = arith.constant 2 : index
    %380 = arith.index_cast %379 : i32 to index
    %c0_363 = arith.constant 0 : index
    %c0_364 = arith.constant 0 : index
    %381 = vector.load %arg2[%c0_361, %c2_362, %380, %c0_363, %c0_364] : memref<1x4x9x9x4xf32, #tpu.memory_space<vmem>>, vector<1x1x1x8x4xf32>
    %382 = vector.shape_cast %381 : vector<1x1x1x8x4xf32> to vector<8x4xf32>
    %383 = arith.truncf %382 : vector<8x4xf32> to vector<8x4xbf16>
    %c3_365 = arith.constant 3 : index
    %c0_366 = arith.constant 0 : index
    %c0_367 = arith.constant 0 : index
    %384 = vector.load %arg3[%c3_365, %c0_366, %c0_367] : memref<9x4x128xbf16, #tpu.memory_space<vmem>>, vector<1x4x128xbf16>
    %385 = vector.shape_cast %384 : vector<1x4x128xbf16> to vector<4x128xbf16>
    %cst_368 = arith.constant dense<0.000000e+00> : vector<8x128xf32>
    %386 = tpu.matmul %383, %385, %cst_368 {dimension_numbers = #tpu.dot_dimension_numbers<[1], [0], [0], [1], [0, 0, 1, 1], [], []>} : vector<8x4xbf16>, vector<4x128xbf16>, vector<8x128xf32> -> vector<8x128xf32>
    %387 = arith.addf %376, %386 : vector<8x128xf32>
    %c0_369 = arith.constant 0 : index
    %c3_370 = arith.constant 3 : index
    %388 = arith.index_cast %379 : i32 to index
    %c0_371 = arith.constant 0 : index
    %c0_372 = arith.constant 0 : index
    %389 = vector.load %arg2[%c0_369, %c3_370, %388, %c0_371, %c0_372] : memref<1x4x9x9x4xf32, #tpu.memory_space<vmem>>, vector<1x1x1x8x4xf32>
    %390 = vector.shape_cast %389 : vector<1x1x1x8x4xf32> to vector<8x4xf32>
    %391 = arith.truncf %390 : vector<8x4xf32> to vector<8x4xbf16>
    %c4_373 = arith.constant 4 : index
    %c0_374 = arith.constant 0 : index
    %c0_375 = arith.constant 0 : index
    %392 = vector.load %arg3[%c4_373, %c0_374, %c0_375] : memref<9x4x128xbf16, #tpu.memory_space<vmem>>, vector<1x4x128xbf16>
    %393 = vector.shape_cast %392 : vector<1x4x128xbf16> to vector<4x128xbf16>
    %cst_376 = arith.constant dense<0.000000e+00> : vector<8x128xf32>
    %394 = tpu.matmul %391, %393, %cst_376 {dimension_numbers = #tpu.dot_dimension_numbers<[1], [0], [0], [1], [0, 0, 1, 1], [], []>} : vector<8x4xbf16>, vector<4x128xbf16>, vector<8x128xf32> -> vector<8x128xf32>
    %395 = arith.addf %387, %394 : vector<8x128xf32>
    %c0_377 = arith.constant 0 : index
    %c2_378 = arith.constant 2 : index
    %396 = arith.index_cast %379 : i32 to index
    %c1_379 = arith.constant 1 : index
    %c0_380 = arith.constant 0 : index
    %397 = vector.load %arg2[%c0_377, %c2_378, %396, %c1_379, %c0_380] : memref<1x4x9x9x4xf32, #tpu.memory_space<vmem>>, vector<1x1x1x8x4xf32>
    %398 = vector.shape_cast %397 : vector<1x1x1x8x4xf32> to vector<8x4xf32>
    %399 = arith.truncf %398 : vector<8x4xf32> to vector<8x4xbf16>
    %c5_381 = arith.constant 5 : index
    %c0_382 = arith.constant 0 : index
    %c0_383 = arith.constant 0 : index
    %400 = vector.load %arg3[%c5_381, %c0_382, %c0_383] : memref<9x4x128xbf16, #tpu.memory_space<vmem>>, vector<1x4x128xbf16>
    %401 = vector.shape_cast %400 : vector<1x4x128xbf16> to vector<4x128xbf16>
    %cst_384 = arith.constant dense<0.000000e+00> : vector<8x128xf32>
    %402 = tpu.matmul %399, %401, %cst_384 {dimension_numbers = #tpu.dot_dimension_numbers<[1], [0], [0], [1], [0, 0, 1, 1], [], []>} : vector<8x4xbf16>, vector<4x128xbf16>, vector<8x128xf32> -> vector<8x128xf32>
    %403 = arith.addf %395, %402 : vector<8x128xf32>
    %c8_i32_385 = arith.constant 8 : i32
    %404 = arith.muli %arg1, %c8_i32_385 : i32
    %c4_i32_386 = arith.constant 4 : i32
    %405 = arith.addi %404, %c4_i32_386 : i32
    %c1_i32_387 = arith.constant 1 : i32
    %406 = arith.addi %405, %c1_i32_387 : i32
    %c0_388 = arith.constant 0 : index
    %c0_389 = arith.constant 0 : index
    %407 = arith.index_cast %406 : i32 to index
    %c0_390 = arith.constant 0 : index
    %c0_391 = arith.constant 0 : index
    %408 = vector.load %arg2[%c0_388, %c0_389, %407, %c0_390, %c0_391] : memref<1x4x9x9x4xf32, #tpu.memory_space<vmem>>, vector<1x1x1x8x4xf32>
    %409 = vector.shape_cast %408 : vector<1x1x1x8x4xf32> to vector<8x4xf32>
    %410 = arith.truncf %409 : vector<8x4xf32> to vector<8x4xbf16>
    %c6_392 = arith.constant 6 : index
    %c0_393 = arith.constant 0 : index
    %c0_394 = arith.constant 0 : index
    %411 = vector.load %arg3[%c6_392, %c0_393, %c0_394] : memref<9x4x128xbf16, #tpu.memory_space<vmem>>, vector<1x4x128xbf16>
    %412 = vector.shape_cast %411 : vector<1x4x128xbf16> to vector<4x128xbf16>
    %cst_395 = arith.constant dense<0.000000e+00> : vector<8x128xf32>
    %413 = tpu.matmul %410, %412, %cst_395 {dimension_numbers = #tpu.dot_dimension_numbers<[1], [0], [0], [1], [0, 0, 1, 1], [], []>} : vector<8x4xbf16>, vector<4x128xbf16>, vector<8x128xf32> -> vector<8x128xf32>
    %414 = arith.addf %403, %413 : vector<8x128xf32>
    %c0_396 = arith.constant 0 : index
    %c1_397 = arith.constant 1 : index
    %415 = arith.index_cast %406 : i32 to index
    %c0_398 = arith.constant 0 : index
    %c0_399 = arith.constant 0 : index
    %416 = vector.load %arg2[%c0_396, %c1_397, %415, %c0_398, %c0_399] : memref<1x4x9x9x4xf32, #tpu.memory_space<vmem>>, vector<1x1x1x8x4xf32>
    %417 = vector.shape_cast %416 : vector<1x1x1x8x4xf32> to vector<8x4xf32>
    %418 = arith.truncf %417 : vector<8x4xf32> to vector<8x4xbf16>
    %c7_400 = arith.constant 7 : index
    %c0_401 = arith.constant 0 : index
    %c0_402 = arith.constant 0 : index
    %419 = vector.load %arg3[%c7_400, %c0_401, %c0_402] : memref<9x4x128xbf16, #tpu.memory_space<vmem>>, vector<1x4x128xbf16>
    %420 = vector.shape_cast %419 : vector<1x4x128xbf16> to vector<4x128xbf16>
    %cst_403 = arith.constant dense<0.000000e+00> : vector<8x128xf32>
    %421 = tpu.matmul %418, %420, %cst_403 {dimension_numbers = #tpu.dot_dimension_numbers<[1], [0], [0], [1], [0, 0, 1, 1], [], []>} : vector<8x4xbf16>, vector<4x128xbf16>, vector<8x128xf32> -> vector<8x128xf32>
    %422 = arith.addf %414, %421 : vector<8x128xf32>
    %c0_404 = arith.constant 0 : index
    %c0_405 = arith.constant 0 : index
    %423 = arith.index_cast %406 : i32 to index
    %c1_406 = arith.constant 1 : index
    %c0_407 = arith.constant 0 : index
    %424 = vector.load %arg2[%c0_404, %c0_405, %423, %c1_406, %c0_407] : memref<1x4x9x9x4xf32, #tpu.memory_space<vmem>>, vector<1x1x1x8x4xf32>
    %425 = vector.shape_cast %424 : vector<1x1x1x8x4xf32> to vector<8x4xf32>
    %426 = arith.truncf %425 : vector<8x4xf32> to vector<8x4xbf16>
    %c8_408 = arith.constant 8 : index
    %c0_409 = arith.constant 0 : index
    %c0_410 = arith.constant 0 : index
    %427 = vector.load %arg3[%c8_408, %c0_409, %c0_410] : memref<9x4x128xbf16, #tpu.memory_space<vmem>>, vector<1x4x128xbf16>
    %428 = vector.shape_cast %427 : vector<1x4x128xbf16> to vector<4x128xbf16>
    %cst_411 = arith.constant dense<0.000000e+00> : vector<8x128xf32>
    %429 = tpu.matmul %426, %428, %cst_411 {dimension_numbers = #tpu.dot_dimension_numbers<[1], [0], [0], [1], [0, 0, 1, 1], [], []>} : vector<8x4xbf16>, vector<4x128xbf16>, vector<8x128xf32> -> vector<8x128xf32>
    %430 = arith.addf %422, %429 : vector<8x128xf32>
    %431 = vector.broadcast %0 : vector<1x128xf32> to vector<8x128xf32>
    %432 = arith.addf %430, %431 : vector<8x128xf32>
    %c0_412 = arith.constant 0 : index
    %c4_413 = arith.constant 4 : index
    %c0_414 = arith.constant 0 : index
    %c0_415 = arith.constant 0 : index
    %433 = vector.load %arg5[%c0_412, %c4_413, %c0_414, %c0_415] : memref<1x8x8x128xf32, #tpu.memory_space<vmem>>, vector<1x1x8x128xf32>
    %434 = vector.shape_cast %433 : vector<1x1x8x128xf32> to vector<8x128xf32>
    %435 = vector.shape_cast %432 : vector<8x128xf32> to vector<1x1x8x128xf32>
    tpu.vector_store %arg5[%c0_412, %c4_413, %c0_414, %c0_415], %435 {strides = array<i32>} : memref<1x8x8x128xf32, #tpu.memory_space<vmem>>, vector<1x1x8x128xf32>,
    %cst_416 = arith.constant 0.000000e+00 : f32
    %436 = vector.broadcast %cst_416 : f32 to vector<8x128xf32>
    %c8_i32_417 = arith.constant 8 : i32
    %437 = arith.muli %arg1, %c8_i32_417 : i32
    %c5_i32 = arith.constant 5 : i32
    %438 = arith.addi %437, %c5_i32 : i32
    %c0_i32_418 = arith.constant 0 : i32
    %439 = arith.addi %438, %c0_i32_418 : i32
    %c0_419 = arith.constant 0 : index
    %c0_420 = arith.constant 0 : index
    %440 = arith.index_cast %439 : i32 to index
    %c0_421 = arith.constant 0 : index
    %c0_422 = arith.constant 0 : index
    %441 = vector.load %arg2[%c0_419, %c0_420, %440, %c0_421, %c0_422] : memref<1x4x9x9x4xf32, #tpu.memory_space<vmem>>, vector<1x1x1x8x4xf32>
    %442 = vector.shape_cast %441 : vector<1x1x1x8x4xf32> to vector<8x4xf32>
    %443 = arith.truncf %442 : vector<8x4xf32> to vector<8x4xbf16>
    %c0_423 = arith.constant 0 : index
    %c0_424 = arith.constant 0 : index
    %c0_425 = arith.constant 0 : index
    %444 = vector.load %arg3[%c0_423, %c0_424, %c0_425] : memref<9x4x128xbf16, #tpu.memory_space<vmem>>, vector<1x4x128xbf16>
    %445 = vector.shape_cast %444 : vector<1x4x128xbf16> to vector<4x128xbf16>
    %cst_426 = arith.constant dense<0.000000e+00> : vector<8x128xf32>
    %446 = tpu.matmul %443, %445, %cst_426 {dimension_numbers = #tpu.dot_dimension_numbers<[1], [0], [0], [1], [0, 0, 1, 1], [], []>} : vector<8x4xbf16>, vector<4x128xbf16>, vector<8x128xf32> -> vector<8x128xf32>
    %447 = arith.addf %436, %446 : vector<8x128xf32>
    %c0_427 = arith.constant 0 : index
    %c1_428 = arith.constant 1 : index
    %448 = arith.index_cast %439 : i32 to index
    %c0_429 = arith.constant 0 : index
    %c0_430 = arith.constant 0 : index
    %449 = vector.load %arg2[%c0_427, %c1_428, %448, %c0_429, %c0_430] : memref<1x4x9x9x4xf32, #tpu.memory_space<vmem>>, vector<1x1x1x8x4xf32>
    %450 = vector.shape_cast %449 : vector<1x1x1x8x4xf32> to vector<8x4xf32>
    %451 = arith.truncf %450 : vector<8x4xf32> to vector<8x4xbf16>
    %c1_431 = arith.constant 1 : index
    %c0_432 = arith.constant 0 : index
    %c0_433 = arith.constant 0 : index
    %452 = vector.load %arg3[%c1_431, %c0_432, %c0_433] : memref<9x4x128xbf16, #tpu.memory_space<vmem>>, vector<1x4x128xbf16>
    %453 = vector.shape_cast %452 : vector<1x4x128xbf16> to vector<4x128xbf16>
    %cst_434 = arith.constant dense<0.000000e+00> : vector<8x128xf32>
    %454 = tpu.matmul %451, %453, %cst_434 {dimension_numbers = #tpu.dot_dimension_numbers<[1], [0], [0], [1], [0, 0, 1, 1], [], []>} : vector<8x4xbf16>, vector<4x128xbf16>, vector<8x128xf32> -> vector<8x128xf32>
    %455 = arith.addf %447, %454 : vector<8x128xf32>
    %c0_435 = arith.constant 0 : index
    %c0_436 = arith.constant 0 : index
    %456 = arith.index_cast %439 : i32 to index
    %c1_437 = arith.constant 1 : index
    %c0_438 = arith.constant 0 : index
    %457 = vector.load %arg2[%c0_435, %c0_436, %456, %c1_437, %c0_438] : memref<1x4x9x9x4xf32, #tpu.memory_space<vmem>>, vector<1x1x1x8x4xf32>
    %458 = vector.shape_cast %457 : vector<1x1x1x8x4xf32> to vector<8x4xf32>
    %459 = arith.truncf %458 : vector<8x4xf32> to vector<8x4xbf16>
    %c2_439 = arith.constant 2 : index
    %c0_440 = arith.constant 0 : index
    %c0_441 = arith.constant 0 : index
    %460 = vector.load %arg3[%c2_439, %c0_440, %c0_441] : memref<9x4x128xbf16, #tpu.memory_space<vmem>>, vector<1x4x128xbf16>
    %461 = vector.shape_cast %460 : vector<1x4x128xbf16> to vector<4x128xbf16>
    %cst_442 = arith.constant dense<0.000000e+00> : vector<8x128xf32>
    %462 = tpu.matmul %459, %461, %cst_442 {dimension_numbers = #tpu.dot_dimension_numbers<[1], [0], [0], [1], [0, 0, 1, 1], [], []>} : vector<8x4xbf16>, vector<4x128xbf16>, vector<8x128xf32> -> vector<8x128xf32>
    %463 = arith.addf %455, %462 : vector<8x128xf32>
    %c8_i32_443 = arith.constant 8 : i32
    %464 = arith.muli %arg1, %c8_i32_443 : i32
    %c5_i32_444 = arith.constant 5 : i32
    %465 = arith.addi %464, %c5_i32_444 : i32
    %c0_i32_445 = arith.constant 0 : i32
    %466 = arith.addi %465, %c0_i32_445 : i32
    %c0_446 = arith.constant 0 : index
    %c2_447 = arith.constant 2 : index
    %467 = arith.index_cast %466 : i32 to index
    %c0_448 = arith.constant 0 : index
    %c0_449 = arith.constant 0 : index
    %468 = vector.load %arg2[%c0_446, %c2_447, %467, %c0_448, %c0_449] : memref<1x4x9x9x4xf32, #tpu.memory_space<vmem>>, vector<1x1x1x8x4xf32>
    %469 = vector.shape_cast %468 : vector<1x1x1x8x4xf32> to vector<8x4xf32>
    %470 = arith.truncf %469 : vector<8x4xf32> to vector<8x4xbf16>
    %c3_450 = arith.constant 3 : index
    %c0_451 = arith.constant 0 : index
    %c0_452 = arith.constant 0 : index
    %471 = vector.load %arg3[%c3_450, %c0_451, %c0_452] : memref<9x4x128xbf16, #tpu.memory_space<vmem>>, vector<1x4x128xbf16>
    %472 = vector.shape_cast %471 : vector<1x4x128xbf16> to vector<4x128xbf16>
    %cst_453 = arith.constant dense<0.000000e+00> : vector<8x128xf32>
    %473 = tpu.matmul %470, %472, %cst_453 {dimension_numbers = #tpu.dot_dimension_numbers<[1], [0], [0], [1], [0, 0, 1, 1], [], []>} : vector<8x4xbf16>, vector<4x128xbf16>, vector<8x128xf32> -> vector<8x128xf32>
    %474 = arith.addf %463, %473 : vector<8x128xf32>
    %c0_454 = arith.constant 0 : index
    %c3_455 = arith.constant 3 : index
    %475 = arith.index_cast %466 : i32 to index
    %c0_456 = arith.constant 0 : index
    %c0_457 = arith.constant 0 : index
    %476 = vector.load %arg2[%c0_454, %c3_455, %475, %c0_456, %c0_457] : memref<1x4x9x9x4xf32, #tpu.memory_space<vmem>>, vector<1x1x1x8x4xf32>
    %477 = vector.shape_cast %476 : vector<1x1x1x8x4xf32> to vector<8x4xf32>
    %478 = arith.truncf %477 : vector<8x4xf32> to vector<8x4xbf16>
    %c4_458 = arith.constant 4 : index
    %c0_459 = arith.constant 0 : index
    %c0_460 = arith.constant 0 : index
    %479 = vector.load %arg3[%c4_458, %c0_459, %c0_460] : memref<9x4x128xbf16, #tpu.memory_space<vmem>>, vector<1x4x128xbf16>
    %480 = vector.shape_cast %479 : vector<1x4x128xbf16> to vector<4x128xbf16>
    %cst_461 = arith.constant dense<0.000000e+00> : vector<8x128xf32>
    %481 = tpu.matmul %478, %480, %cst_461 {dimension_numbers = #tpu.dot_dimension_numbers<[1], [0], [0], [1], [0, 0, 1, 1], [], []>} : vector<8x4xbf16>, vector<4x128xbf16>, vector<8x128xf32> -> vector<8x128xf32>
    %482 = arith.addf %474, %481 : vector<8x128xf32>
    %c0_462 = arith.constant 0 : index
    %c2_463 = arith.constant 2 : index
    %483 = arith.index_cast %466 : i32 to index
    %c1_464 = arith.constant 1 : index
    %c0_465 = arith.constant 0 : index
    %484 = vector.load %arg2[%c0_462, %c2_463, %483, %c1_464, %c0_465] : memref<1x4x9x9x4xf32, #tpu.memory_space<vmem>>, vector<1x1x1x8x4xf32>
    %485 = vector.shape_cast %484 : vector<1x1x1x8x4xf32> to vector<8x4xf32>
    %486 = arith.truncf %485 : vector<8x4xf32> to vector<8x4xbf16>
    %c5_466 = arith.constant 5 : index
    %c0_467 = arith.constant 0 : index
    %c0_468 = arith.constant 0 : index
    %487 = vector.load %arg3[%c5_466, %c0_467, %c0_468] : memref<9x4x128xbf16, #tpu.memory_space<vmem>>, vector<1x4x128xbf16>
    %488 = vector.shape_cast %487 : vector<1x4x128xbf16> to vector<4x128xbf16>
    %cst_469 = arith.constant dense<0.000000e+00> : vector<8x128xf32>
    %489 = tpu.matmul %486, %488, %cst_469 {dimension_numbers = #tpu.dot_dimension_numbers<[1], [0], [0], [1], [0, 0, 1, 1], [], []>} : vector<8x4xbf16>, vector<4x128xbf16>, vector<8x128xf32> -> vector<8x128xf32>
    %490 = arith.addf %482, %489 : vector<8x128xf32>
    %c8_i32_470 = arith.constant 8 : i32
    %491 = arith.muli %arg1, %c8_i32_470 : i32
    %c5_i32_471 = arith.constant 5 : i32
    %492 = arith.addi %491, %c5_i32_471 : i32
    %c1_i32_472 = arith.constant 1 : i32
    %493 = arith.addi %492, %c1_i32_472 : i32
    %c0_473 = arith.constant 0 : index
    %c0_474 = arith.constant 0 : index
    %494 = arith.index_cast %493 : i32 to index
    %c0_475 = arith.constant 0 : index
    %c0_476 = arith.constant 0 : index
    %495 = vector.load %arg2[%c0_473, %c0_474, %494, %c0_475, %c0_476] : memref<1x4x9x9x4xf32, #tpu.memory_space<vmem>>, vector<1x1x1x8x4xf32>
    %496 = vector.shape_cast %495 : vector<1x1x1x8x4xf32> to vector<8x4xf32>
    %497 = arith.truncf %496 : vector<8x4xf32> to vector<8x4xbf16>
    %c6_477 = arith.constant 6 : index
    %c0_478 = arith.constant 0 : index
    %c0_479 = arith.constant 0 : index
    %498 = vector.load %arg3[%c6_477, %c0_478, %c0_479] : memref<9x4x128xbf16, #tpu.memory_space<vmem>>, vector<1x4x128xbf16>
    %499 = vector.shape_cast %498 : vector<1x4x128xbf16> to vector<4x128xbf16>
    %cst_480 = arith.constant dense<0.000000e+00> : vector<8x128xf32>
    %500 = tpu.matmul %497, %499, %cst_480 {dimension_numbers = #tpu.dot_dimension_numbers<[1], [0], [0], [1], [0, 0, 1, 1], [], []>} : vector<8x4xbf16>, vector<4x128xbf16>, vector<8x128xf32> -> vector<8x128xf32>
    %501 = arith.addf %490, %500 : vector<8x128xf32>
    %c0_481 = arith.constant 0 : index
    %c1_482 = arith.constant 1 : index
    %502 = arith.index_cast %493 : i32 to index
    %c0_483 = arith.constant 0 : index
    %c0_484 = arith.constant 0 : index
    %503 = vector.load %arg2[%c0_481, %c1_482, %502, %c0_483, %c0_484] : memref<1x4x9x9x4xf32, #tpu.memory_space<vmem>>, vector<1x1x1x8x4xf32>
    %504 = vector.shape_cast %503 : vector<1x1x1x8x4xf32> to vector<8x4xf32>
    %505 = arith.truncf %504 : vector<8x4xf32> to vector<8x4xbf16>
    %c7_485 = arith.constant 7 : index
    %c0_486 = arith.constant 0 : index
    %c0_487 = arith.constant 0 : index
    %506 = vector.load %arg3[%c7_485, %c0_486, %c0_487] : memref<9x4x128xbf16, #tpu.memory_space<vmem>>, vector<1x4x128xbf16>
    %507 = vector.shape_cast %506 : vector<1x4x128xbf16> to vector<4x128xbf16>
    %cst_488 = arith.constant dense<0.000000e+00> : vector<8x128xf32>
    %508 = tpu.matmul %505, %507, %cst_488 {dimension_numbers = #tpu.dot_dimension_numbers<[1], [0], [0], [1], [0, 0, 1, 1], [], []>} : vector<8x4xbf16>, vector<4x128xbf16>, vector<8x128xf32> -> vector<8x128xf32>
    %509 = arith.addf %501, %508 : vector<8x128xf32>
    %c0_489 = arith.constant 0 : index
    %c0_490 = arith.constant 0 : index
    %510 = arith.index_cast %493 : i32 to index
    %c1_491 = arith.constant 1 : index
    %c0_492 = arith.constant 0 : index
    %511 = vector.load %arg2[%c0_489, %c0_490, %510, %c1_491, %c0_492] : memref<1x4x9x9x4xf32, #tpu.memory_space<vmem>>, vector<1x1x1x8x4xf32>
    %512 = vector.shape_cast %511 : vector<1x1x1x8x4xf32> to vector<8x4xf32>
    %513 = arith.truncf %512 : vector<8x4xf32> to vector<8x4xbf16>
    %c8_493 = arith.constant 8 : index
    %c0_494 = arith.constant 0 : index
    %c0_495 = arith.constant 0 : index
    %514 = vector.load %arg3[%c8_493, %c0_494, %c0_495] : memref<9x4x128xbf16, #tpu.memory_space<vmem>>, vector<1x4x128xbf16>
    %515 = vector.shape_cast %514 : vector<1x4x128xbf16> to vector<4x128xbf16>
    %cst_496 = arith.constant dense<0.000000e+00> : vector<8x128xf32>
    %516 = tpu.matmul %513, %515, %cst_496 {dimension_numbers = #tpu.dot_dimension_numbers<[1], [0], [0], [1], [0, 0, 1, 1], [], []>} : vector<8x4xbf16>, vector<4x128xbf16>, vector<8x128xf32> -> vector<8x128xf32>
    %517 = arith.addf %509, %516 : vector<8x128xf32>
    %518 = vector.broadcast %0 : vector<1x128xf32> to vector<8x128xf32>
    %519 = arith.addf %517, %518 : vector<8x128xf32>
    %c0_497 = arith.constant 0 : index
    %c5_498 = arith.constant 5 : index
    %c0_499 = arith.constant 0 : index
    %c0_500 = arith.constant 0 : index
    %520 = vector.load %arg5[%c0_497, %c5_498, %c0_499, %c0_500] : memref<1x8x8x128xf32, #tpu.memory_space<vmem>>, vector<1x1x8x128xf32>
    %521 = vector.shape_cast %520 : vector<1x1x8x128xf32> to vector<8x128xf32>
    %522 = vector.shape_cast %519 : vector<8x128xf32> to vector<1x1x8x128xf32>
    tpu.vector_store %arg5[%c0_497, %c5_498, %c0_499, %c0_500], %522 {strides = array<i32>} : memref<1x8x8x128xf32, #tpu.memory_space<vmem>>, vector<1x1x8x128xf32>,
    %cst_501 = arith.constant 0.000000e+00 : f32
    %523 = vector.broadcast %cst_501 : f32 to vector<8x128xf32>
    %c8_i32_502 = arith.constant 8 : i32
    %524 = arith.muli %arg1, %c8_i32_502 : i32
    %c6_i32 = arith.constant 6 : i32
    %525 = arith.addi %524, %c6_i32 : i32
    %c0_i32_503 = arith.constant 0 : i32
    %526 = arith.addi %525, %c0_i32_503 : i32
    %c0_504 = arith.constant 0 : index
    %c0_505 = arith.constant 0 : index
    %527 = arith.index_cast %526 : i32 to index
    %c0_506 = arith.constant 0 : index
    %c0_507 = arith.constant 0 : index
    %528 = vector.load %arg2[%c0_504, %c0_505, %527, %c0_506, %c0_507] : memref<1x4x9x9x4xf32, #tpu.memory_space<vmem>>, vector<1x1x1x8x4xf32>
    %529 = vector.shape_cast %528 : vector<1x1x1x8x4xf32> to vector<8x4xf32>
    %530 = arith.truncf %529 : vector<8x4xf32> to vector<8x4xbf16>
    %c0_508 = arith.constant 0 : index
    %c0_509 = arith.constant 0 : index
    %c0_510 = arith.constant 0 : index
    %531 = vector.load %arg3[%c0_508, %c0_509, %c0_510] : memref<9x4x128xbf16, #tpu.memory_space<vmem>>, vector<1x4x128xbf16>
    %532 = vector.shape_cast %531 : vector<1x4x128xbf16> to vector<4x128xbf16>
    %cst_511 = arith.constant dense<0.000000e+00> : vector<8x128xf32>
    %533 = tpu.matmul %530, %532, %cst_511 {dimension_numbers = #tpu.dot_dimension_numbers<[1], [0], [0], [1], [0, 0, 1, 1], [], []>} : vector<8x4xbf16>, vector<4x128xbf16>, vector<8x128xf32> -> vector<8x128xf32>
    %534 = arith.addf %523, %533 : vector<8x128xf32>
    %c0_512 = arith.constant 0 : index
    %c1_513 = arith.constant 1 : index
    %535 = arith.index_cast %526 : i32 to index
    %c0_514 = arith.constant 0 : index
    %c0_515 = arith.constant 0 : index
    %536 = vector.load %arg2[%c0_512, %c1_513, %535, %c0_514, %c0_515] : memref<1x4x9x9x4xf32, #tpu.memory_space<vmem>>, vector<1x1x1x8x4xf32>
    %537 = vector.shape_cast %536 : vector<1x1x1x8x4xf32> to vector<8x4xf32>
    %538 = arith.truncf %537 : vector<8x4xf32> to vector<8x4xbf16>
    %c1_516 = arith.constant 1 : index
    %c0_517 = arith.constant 0 : index
    %c0_518 = arith.constant 0 : index
    %539 = vector.load %arg3[%c1_516, %c0_517, %c0_518] : memref<9x4x128xbf16, #tpu.memory_space<vmem>>, vector<1x4x128xbf16>
    %540 = vector.shape_cast %539 : vector<1x4x128xbf16> to vector<4x128xbf16>
    %cst_519 = arith.constant dense<0.000000e+00> : vector<8x128xf32>
    %541 = tpu.matmul %538, %540, %cst_519 {dimension_numbers = #tpu.dot_dimension_numbers<[1], [0], [0], [1], [0, 0, 1, 1], [], []>} : vector<8x4xbf16>, vector<4x128xbf16>, vector<8x128xf32> -> vector<8x128xf32>
    %542 = arith.addf %534, %541 : vector<8x128xf32>
    %c0_520 = arith.constant 0 : index
    %c0_521 = arith.constant 0 : index
    %543 = arith.index_cast %526 : i32 to index
    %c1_522 = arith.constant 1 : index
    %c0_523 = arith.constant 0 : index
    %544 = vector.load %arg2[%c0_520, %c0_521, %543, %c1_522, %c0_523] : memref<1x4x9x9x4xf32, #tpu.memory_space<vmem>>, vector<1x1x1x8x4xf32>
    %545 = vector.shape_cast %544 : vector<1x1x1x8x4xf32> to vector<8x4xf32>
    %546 = arith.truncf %545 : vector<8x4xf32> to vector<8x4xbf16>
    %c2_524 = arith.constant 2 : index
    %c0_525 = arith.constant 0 : index
    %c0_526 = arith.constant 0 : index
    %547 = vector.load %arg3[%c2_524, %c0_525, %c0_526] : memref<9x4x128xbf16, #tpu.memory_space<vmem>>, vector<1x4x128xbf16>
    %548 = vector.shape_cast %547 : vector<1x4x128xbf16> to vector<4x128xbf16>
    %cst_527 = arith.constant dense<0.000000e+00> : vector<8x128xf32>
    %549 = tpu.matmul %546, %548, %cst_527 {dimension_numbers = #tpu.dot_dimension_numbers<[1], [0], [0], [1], [0, 0, 1, 1], [], []>} : vector<8x4xbf16>, vector<4x128xbf16>, vector<8x128xf32> -> vector<8x128xf32>
    %550 = arith.addf %542, %549 : vector<8x128xf32>
    %c8_i32_528 = arith.constant 8 : i32
    %551 = arith.muli %arg1, %c8_i32_528 : i32
    %c6_i32_529 = arith.constant 6 : i32
    %552 = arith.addi %551, %c6_i32_529 : i32
    %c0_i32_530 = arith.constant 0 : i32
    %553 = arith.addi %552, %c0_i32_530 : i32
    %c0_531 = arith.constant 0 : index
    %c2_532 = arith.constant 2 : index
    %554 = arith.index_cast %553 : i32 to index
    %c0_533 = arith.constant 0 : index
    %c0_534 = arith.constant 0 : index
    %555 = vector.load %arg2[%c0_531, %c2_532, %554, %c0_533, %c0_534] : memref<1x4x9x9x4xf32, #tpu.memory_space<vmem>>, vector<1x1x1x8x4xf32>
    %556 = vector.shape_cast %555 : vector<1x1x1x8x4xf32> to vector<8x4xf32>
    %557 = arith.truncf %556 : vector<8x4xf32> to vector<8x4xbf16>
    %c3_535 = arith.constant 3 : index
    %c0_536 = arith.constant 0 : index
    %c0_537 = arith.constant 0 : index
    %558 = vector.load %arg3[%c3_535, %c0_536, %c0_537] : memref<9x4x128xbf16, #tpu.memory_space<vmem>>, vector<1x4x128xbf16>
    %559 = vector.shape_cast %558 : vector<1x4x128xbf16> to vector<4x128xbf16>
    %cst_538 = arith.constant dense<0.000000e+00> : vector<8x128xf32>
    %560 = tpu.matmul %557, %559, %cst_538 {dimension_numbers = #tpu.dot_dimension_numbers<[1], [0], [0], [1], [0, 0, 1, 1], [], []>} : vector<8x4xbf16>, vector<4x128xbf16>, vector<8x128xf32> -> vector<8x128xf32>
    %561 = arith.addf %550, %560 : vector<8x128xf32>
    %c0_539 = arith.constant 0 : index
    %c3_540 = arith.constant 3 : index
    %562 = arith.index_cast %553 : i32 to index
    %c0_541 = arith.constant 0 : index
    %c0_542 = arith.constant 0 : index
    %563 = vector.load %arg2[%c0_539, %c3_540, %562, %c0_541, %c0_542] : memref<1x4x9x9x4xf32, #tpu.memory_space<vmem>>, vector<1x1x1x8x4xf32>
    %564 = vector.shape_cast %563 : vector<1x1x1x8x4xf32> to vector<8x4xf32>
    %565 = arith.truncf %564 : vector<8x4xf32> to vector<8x4xbf16>
    %c4_543 = arith.constant 4 : index
    %c0_544 = arith.constant 0 : index
    %c0_545 = arith.constant 0 : index
    %566 = vector.load %arg3[%c4_543, %c0_544, %c0_545] : memref<9x4x128xbf16, #tpu.memory_space<vmem>>, vector<1x4x128xbf16>
    %567 = vector.shape_cast %566 : vector<1x4x128xbf16> to vector<4x128xbf16>
    %cst_546 = arith.constant dense<0.000000e+00> : vector<8x128xf32>
    %568 = tpu.matmul %565, %567, %cst_546 {dimension_numbers = #tpu.dot_dimension_numbers<[1], [0], [0], [1], [0, 0, 1, 1], [], []>} : vector<8x4xbf16>, vector<4x128xbf16>, vector<8x128xf32> -> vector<8x128xf32>
    %569 = arith.addf %561, %568 : vector<8x128xf32>
    %c0_547 = arith.constant 0 : index
    %c2_548 = arith.constant 2 : index
    %570 = arith.index_cast %553 : i32 to index
    %c1_549 = arith.constant 1 : index
    %c0_550 = arith.constant 0 : index
    %571 = vector.load %arg2[%c0_547, %c2_548, %570, %c1_549, %c0_550] : memref<1x4x9x9x4xf32, #tpu.memory_space<vmem>>, vector<1x1x1x8x4xf32>
    %572 = vector.shape_cast %571 : vector<1x1x1x8x4xf32> to vector<8x4xf32>
    %573 = arith.truncf %572 : vector<8x4xf32> to vector<8x4xbf16>
    %c5_551 = arith.constant 5 : index
    %c0_552 = arith.constant 0 : index
    %c0_553 = arith.constant 0 : index
    %574 = vector.load %arg3[%c5_551, %c0_552, %c0_553] : memref<9x4x128xbf16, #tpu.memory_space<vmem>>, vector<1x4x128xbf16>
    %575 = vector.shape_cast %574 : vector<1x4x128xbf16> to vector<4x128xbf16>
    %cst_554 = arith.constant dense<0.000000e+00> : vector<8x128xf32>
    %576 = tpu.matmul %573, %575, %cst_554 {dimension_numbers = #tpu.dot_dimension_numbers<[1], [0], [0], [1], [0, 0, 1, 1], [], []>} : vector<8x4xbf16>, vector<4x128xbf16>, vector<8x128xf32> -> vector<8x128xf32>
    %577 = arith.addf %569, %576 : vector<8x128xf32>
    %c8_i32_555 = arith.constant 8 : i32
    %578 = arith.muli %arg1, %c8_i32_555 : i32
    %c6_i32_556 = arith.constant 6 : i32
    %579 = arith.addi %578, %c6_i32_556 : i32
    %c1_i32_557 = arith.constant 1 : i32
    %580 = arith.addi %579, %c1_i32_557 : i32
    %c0_558 = arith.constant 0 : index
    %c0_559 = arith.constant 0 : index
    %581 = arith.index_cast %580 : i32 to index
    %c0_560 = arith.constant 0 : index
    %c0_561 = arith.constant 0 : index
    %582 = vector.load %arg2[%c0_558, %c0_559, %581, %c0_560, %c0_561] : memref<1x4x9x9x4xf32, #tpu.memory_space<vmem>>, vector<1x1x1x8x4xf32>
    %583 = vector.shape_cast %582 : vector<1x1x1x8x4xf32> to vector<8x4xf32>
    %584 = arith.truncf %583 : vector<8x4xf32> to vector<8x4xbf16>
    %c6_562 = arith.constant 6 : index
    %c0_563 = arith.constant 0 : index
    %c0_564 = arith.constant 0 : index
    %585 = vector.load %arg3[%c6_562, %c0_563, %c0_564] : memref<9x4x128xbf16, #tpu.memory_space<vmem>>, vector<1x4x128xbf16>
    %586 = vector.shape_cast %585 : vector<1x4x128xbf16> to vector<4x128xbf16>
    %cst_565 = arith.constant dense<0.000000e+00> : vector<8x128xf32>
    %587 = tpu.matmul %584, %586, %cst_565 {dimension_numbers = #tpu.dot_dimension_numbers<[1], [0], [0], [1], [0, 0, 1, 1], [], []>} : vector<8x4xbf16>, vector<4x128xbf16>, vector<8x128xf32> -> vector<8x128xf32>
    %588 = arith.addf %577, %587 : vector<8x128xf32>
    %c0_566 = arith.constant 0 : index
    %c1_567 = arith.constant 1 : index
    %589 = arith.index_cast %580 : i32 to index
    %c0_568 = arith.constant 0 : index
    %c0_569 = arith.constant 0 : index
    %590 = vector.load %arg2[%c0_566, %c1_567, %589, %c0_568, %c0_569] : memref<1x4x9x9x4xf32, #tpu.memory_space<vmem>>, vector<1x1x1x8x4xf32>
    %591 = vector.shape_cast %590 : vector<1x1x1x8x4xf32> to vector<8x4xf32>
    %592 = arith.truncf %591 : vector<8x4xf32> to vector<8x4xbf16>
    %c7_570 = arith.constant 7 : index
    %c0_571 = arith.constant 0 : index
    %c0_572 = arith.constant 0 : index
    %593 = vector.load %arg3[%c7_570, %c0_571, %c0_572] : memref<9x4x128xbf16, #tpu.memory_space<vmem>>, vector<1x4x128xbf16>
    %594 = vector.shape_cast %593 : vector<1x4x128xbf16> to vector<4x128xbf16>
    %cst_573 = arith.constant dense<0.000000e+00> : vector<8x128xf32>
    %595 = tpu.matmul %592, %594, %cst_573 {dimension_numbers = #tpu.dot_dimension_numbers<[1], [0], [0], [1], [0, 0, 1, 1], [], []>} : vector<8x4xbf16>, vector<4x128xbf16>, vector<8x128xf32> -> vector<8x128xf32>
    %596 = arith.addf %588, %595 : vector<8x128xf32>
    %c0_574 = arith.constant 0 : index
    %c0_575 = arith.constant 0 : index
    %597 = arith.index_cast %580 : i32 to index
    %c1_576 = arith.constant 1 : index
    %c0_577 = arith.constant 0 : index
    %598 = vector.load %arg2[%c0_574, %c0_575, %597, %c1_576, %c0_577] : memref<1x4x9x9x4xf32, #tpu.memory_space<vmem>>, vector<1x1x1x8x4xf32>
    %599 = vector.shape_cast %598 : vector<1x1x1x8x4xf32> to vector<8x4xf32>
    %600 = arith.truncf %599 : vector<8x4xf32> to vector<8x4xbf16>
    %c8_578 = arith.constant 8 : index
    %c0_579 = arith.constant 0 : index
    %c0_580 = arith.constant 0 : index
    %601 = vector.load %arg3[%c8_578, %c0_579, %c0_580] : memref<9x4x128xbf16, #tpu.memory_space<vmem>>, vector<1x4x128xbf16>
    %602 = vector.shape_cast %601 : vector<1x4x128xbf16> to vector<4x128xbf16>
    %cst_581 = arith.constant dense<0.000000e+00> : vector<8x128xf32>
    %603 = tpu.matmul %600, %602, %cst_581 {dimension_numbers = #tpu.dot_dimension_numbers<[1], [0], [0], [1], [0, 0, 1, 1], [], []>} : vector<8x4xbf16>, vector<4x128xbf16>, vector<8x128xf32> -> vector<8x128xf32>
    %604 = arith.addf %596, %603 : vector<8x128xf32>
    %605 = vector.broadcast %0 : vector<1x128xf32> to vector<8x128xf32>
    %606 = arith.addf %604, %605 : vector<8x128xf32>
    %c0_582 = arith.constant 0 : index
    %c6_583 = arith.constant 6 : index
    %c0_584 = arith.constant 0 : index
    %c0_585 = arith.constant 0 : index
    %607 = vector.load %arg5[%c0_582, %c6_583, %c0_584, %c0_585] : memref<1x8x8x128xf32, #tpu.memory_space<vmem>>, vector<1x1x8x128xf32>
    %608 = vector.shape_cast %607 : vector<1x1x8x128xf32> to vector<8x128xf32>
    %609 = vector.shape_cast %606 : vector<8x128xf32> to vector<1x1x8x128xf32>
    tpu.vector_store %arg5[%c0_582, %c6_583, %c0_584, %c0_585], %609 {strides = array<i32>} : memref<1x8x8x128xf32, #tpu.memory_space<vmem>>, vector<1x1x8x128xf32>,
    %cst_586 = arith.constant 0.000000e+00 : f32
    %610 = vector.broadcast %cst_586 : f32 to vector<8x128xf32>
    %c8_i32_587 = arith.constant 8 : i32
    %611 = arith.muli %arg1, %c8_i32_587 : i32
    %c7_i32 = arith.constant 7 : i32
    %612 = arith.addi %611, %c7_i32 : i32
    %c0_i32_588 = arith.constant 0 : i32
    %613 = arith.addi %612, %c0_i32_588 : i32
    %c0_589 = arith.constant 0 : index
    %c0_590 = arith.constant 0 : index
    %614 = arith.index_cast %613 : i32 to index
    %c0_591 = arith.constant 0 : index
    %c0_592 = arith.constant 0 : index
    %615 = vector.load %arg2[%c0_589, %c0_590, %614, %c0_591, %c0_592] : memref<1x4x9x9x4xf32, #tpu.memory_space<vmem>>, vector<1x1x1x8x4xf32>
    %616 = vector.shape_cast %615 : vector<1x1x1x8x4xf32> to vector<8x4xf32>
    %617 = arith.truncf %616 : vector<8x4xf32> to vector<8x4xbf16>
    %c0_593 = arith.constant 0 : index
    %c0_594 = arith.constant 0 : index
    %c0_595 = arith.constant 0 : index
    %618 = vector.load %arg3[%c0_593, %c0_594, %c0_595] : memref<9x4x128xbf16, #tpu.memory_space<vmem>>, vector<1x4x128xbf16>
    %619 = vector.shape_cast %618 : vector<1x4x128xbf16> to vector<4x128xbf16>
    %cst_596 = arith.constant dense<0.000000e+00> : vector<8x128xf32>
    %620 = tpu.matmul %617, %619, %cst_596 {dimension_numbers = #tpu.dot_dimension_numbers<[1], [0], [0], [1], [0, 0, 1, 1], [], []>} : vector<8x4xbf16>, vector<4x128xbf16>, vector<8x128xf32> -> vector<8x128xf32>
    %621 = arith.addf %610, %620 : vector<8x128xf32>
    %c0_597 = arith.constant 0 : index
    %c1_598 = arith.constant 1 : index
    %622 = arith.index_cast %613 : i32 to index
    %c0_599 = arith.constant 0 : index
    %c0_600 = arith.constant 0 : index
    %623 = vector.load %arg2[%c0_597, %c1_598, %622, %c0_599, %c0_600] : memref<1x4x9x9x4xf32, #tpu.memory_space<vmem>>, vector<1x1x1x8x4xf32>
    %624 = vector.shape_cast %623 : vector<1x1x1x8x4xf32> to vector<8x4xf32>
    %625 = arith.truncf %624 : vector<8x4xf32> to vector<8x4xbf16>
    %c1_601 = arith.constant 1 : index
    %c0_602 = arith.constant 0 : index
    %c0_603 = arith.constant 0 : index
    %626 = vector.load %arg3[%c1_601, %c0_602, %c0_603] : memref<9x4x128xbf16, #tpu.memory_space<vmem>>, vector<1x4x128xbf16>
    %627 = vector.shape_cast %626 : vector<1x4x128xbf16> to vector<4x128xbf16>
    %cst_604 = arith.constant dense<0.000000e+00> : vector<8x128xf32>
    %628 = tpu.matmul %625, %627, %cst_604 {dimension_numbers = #tpu.dot_dimension_numbers<[1], [0], [0], [1], [0, 0, 1, 1], [], []>} : vector<8x4xbf16>, vector<4x128xbf16>, vector<8x128xf32> -> vector<8x128xf32>
    %629 = arith.addf %621, %628 : vector<8x128xf32>
    %c0_605 = arith.constant 0 : index
    %c0_606 = arith.constant 0 : index
    %630 = arith.index_cast %613 : i32 to index
    %c1_607 = arith.constant 1 : index
    %c0_608 = arith.constant 0 : index
    %631 = vector.load %arg2[%c0_605, %c0_606, %630, %c1_607, %c0_608] : memref<1x4x9x9x4xf32, #tpu.memory_space<vmem>>, vector<1x1x1x8x4xf32>
    %632 = vector.shape_cast %631 : vector<1x1x1x8x4xf32> to vector<8x4xf32>
    %633 = arith.truncf %632 : vector<8x4xf32> to vector<8x4xbf16>
    %c2_609 = arith.constant 2 : index
    %c0_610 = arith.constant 0 : index
    %c0_611 = arith.constant 0 : index
    %634 = vector.load %arg3[%c2_609, %c0_610, %c0_611] : memref<9x4x128xbf16, #tpu.memory_space<vmem>>, vector<1x4x128xbf16>
    %635 = vector.shape_cast %634 : vector<1x4x128xbf16> to vector<4x128xbf16>
    %cst_612 = arith.constant dense<0.000000e+00> : vector<8x128xf32>
    %636 = tpu.matmul %633, %635, %cst_612 {dimension_numbers = #tpu.dot_dimension_numbers<[1], [0], [0], [1], [0, 0, 1, 1], [], []>} : vector<8x4xbf16>, vector<4x128xbf16>, vector<8x128xf32> -> vector<8x128xf32>
    %637 = arith.addf %629, %636 : vector<8x128xf32>
    %c8_i32_613 = arith.constant 8 : i32
    %638 = arith.muli %arg1, %c8_i32_613 : i32
    %c7_i32_614 = arith.constant 7 : i32
    %639 = arith.addi %638, %c7_i32_614 : i32
    %c0_i32_615 = arith.constant 0 : i32
    %640 = arith.addi %639, %c0_i32_615 : i32
    %c0_616 = arith.constant 0 : index
    %c2_617 = arith.constant 2 : index
    %641 = arith.index_cast %640 : i32 to index
    %c0_618 = arith.constant 0 : index
    %c0_619 = arith.constant 0 : index
    %642 = vector.load %arg2[%c0_616, %c2_617, %641, %c0_618, %c0_619] : memref<1x4x9x9x4xf32, #tpu.memory_space<vmem>>, vector<1x1x1x8x4xf32>
    %643 = vector.shape_cast %642 : vector<1x1x1x8x4xf32> to vector<8x4xf32>
    %644 = arith.truncf %643 : vector<8x4xf32> to vector<8x4xbf16>
    %c3_620 = arith.constant 3 : index
    %c0_621 = arith.constant 0 : index
    %c0_622 = arith.constant 0 : index
    %645 = vector.load %arg3[%c3_620, %c0_621, %c0_622] : memref<9x4x128xbf16, #tpu.memory_space<vmem>>, vector<1x4x128xbf16>
    %646 = vector.shape_cast %645 : vector<1x4x128xbf16> to vector<4x128xbf16>
    %cst_623 = arith.constant dense<0.000000e+00> : vector<8x128xf32>
    %647 = tpu.matmul %644, %646, %cst_623 {dimension_numbers = #tpu.dot_dimension_numbers<[1], [0], [0], [1], [0, 0, 1, 1], [], []>} : vector<8x4xbf16>, vector<4x128xbf16>, vector<8x128xf32> -> vector<8x128xf32>
    %648 = arith.addf %637, %647 : vector<8x128xf32>
    %c0_624 = arith.constant 0 : index
    %c3_625 = arith.constant 3 : index
    %649 = arith.index_cast %640 : i32 to index
    %c0_626 = arith.constant 0 : index
    %c0_627 = arith.constant 0 : index
    %650 = vector.load %arg2[%c0_624, %c3_625, %649, %c0_626, %c0_627] : memref<1x4x9x9x4xf32, #tpu.memory_space<vmem>>, vector<1x1x1x8x4xf32>
    %651 = vector.shape_cast %650 : vector<1x1x1x8x4xf32> to vector<8x4xf32>
    %652 = arith.truncf %651 : vector<8x4xf32> to vector<8x4xbf16>
    %c4_628 = arith.constant 4 : index
    %c0_629 = arith.constant 0 : index
    %c0_630 = arith.constant 0 : index
    %653 = vector.load %arg3[%c4_628, %c0_629, %c0_630] : memref<9x4x128xbf16, #tpu.memory_space<vmem>>, vector<1x4x128xbf16>
    %654 = vector.shape_cast %653 : vector<1x4x128xbf16> to vector<4x128xbf16>
    %cst_631 = arith.constant dense<0.000000e+00> : vector<8x128xf32>
    %655 = tpu.matmul %652, %654, %cst_631 {dimension_numbers = #tpu.dot_dimension_numbers<[1], [0], [0], [1], [0, 0, 1, 1], [], []>} : vector<8x4xbf16>, vector<4x128xbf16>, vector<8x128xf32> -> vector<8x128xf32>
    %656 = arith.addf %648, %655 : vector<8x128xf32>
    %c0_632 = arith.constant 0 : index
    %c2_633 = arith.constant 2 : index
    %657 = arith.index_cast %640 : i32 to index
    %c1_634 = arith.constant 1 : index
    %c0_635 = arith.constant 0 : index
    %658 = vector.load %arg2[%c0_632, %c2_633, %657, %c1_634, %c0_635] : memref<1x4x9x9x4xf32, #tpu.memory_space<vmem>>, vector<1x1x1x8x4xf32>
    %659 = vector.shape_cast %658 : vector<1x1x1x8x4xf32> to vector<8x4xf32>
    %660 = arith.truncf %659 : vector<8x4xf32> to vector<8x4xbf16>
    %c5_636 = arith.constant 5 : index
    %c0_637 = arith.constant 0 : index
    %c0_638 = arith.constant 0 : index
    %661 = vector.load %arg3[%c5_636, %c0_637, %c0_638] : memref<9x4x128xbf16, #tpu.memory_space<vmem>>, vector<1x4x128xbf16>
    %662 = vector.shape_cast %661 : vector<1x4x128xbf16> to vector<4x128xbf16>
    %cst_639 = arith.constant dense<0.000000e+00> : vector<8x128xf32>
    %663 = tpu.matmul %660, %662, %cst_639 {dimension_numbers = #tpu.dot_dimension_numbers<[1], [0], [0], [1], [0, 0, 1, 1], [], []>} : vector<8x4xbf16>, vector<4x128xbf16>, vector<8x128xf32> -> vector<8x128xf32>
    %664 = arith.addf %656, %663 : vector<8x128xf32>
    %c8_i32_640 = arith.constant 8 : i32
    %665 = arith.muli %arg1, %c8_i32_640 : i32
    %c7_i32_641 = arith.constant 7 : i32
    %666 = arith.addi %665, %c7_i32_641 : i32
    %c1_i32_642 = arith.constant 1 : i32
    %667 = arith.addi %666, %c1_i32_642 : i32
    %c0_643 = arith.constant 0 : index
    %c0_644 = arith.constant 0 : index
    %668 = arith.index_cast %667 : i32 to index
    %c0_645 = arith.constant 0 : index
    %c0_646 = arith.constant 0 : index
    %669 = vector.load %arg2[%c0_643, %c0_644, %668, %c0_645, %c0_646] : memref<1x4x9x9x4xf32, #tpu.memory_space<vmem>>, vector<1x1x1x8x4xf32>
    %670 = vector.shape_cast %669 : vector<1x1x1x8x4xf32> to vector<8x4xf32>
    %671 = arith.truncf %670 : vector<8x4xf32> to vector<8x4xbf16>
    %c6_647 = arith.constant 6 : index
    %c0_648 = arith.constant 0 : index
    %c0_649 = arith.constant 0 : index
    %672 = vector.load %arg3[%c6_647, %c0_648, %c0_649] : memref<9x4x128xbf16, #tpu.memory_space<vmem>>, vector<1x4x128xbf16>
    %673 = vector.shape_cast %672 : vector<1x4x128xbf16> to vector<4x128xbf16>
    %cst_650 = arith.constant dense<0.000000e+00> : vector<8x128xf32>
    %674 = tpu.matmul %671, %673, %cst_650 {dimension_numbers = #tpu.dot_dimension_numbers<[1], [0], [0], [1], [0, 0, 1, 1], [], []>} : vector<8x4xbf16>, vector<4x128xbf16>, vector<8x128xf32> -> vector<8x128xf32>
    %675 = arith.addf %664, %674 : vector<8x128xf32>
    %c0_651 = arith.constant 0 : index
    %c1_652 = arith.constant 1 : index
    %676 = arith.index_cast %667 : i32 to index
    %c0_653 = arith.constant 0 : index
    %c0_654 = arith.constant 0 : index
    %677 = vector.load %arg2[%c0_651, %c1_652, %676, %c0_653, %c0_654] : memref<1x4x9x9x4xf32, #tpu.memory_space<vmem>>, vector<1x1x1x8x4xf32>
    %678 = vector.shape_cast %677 : vector<1x1x1x8x4xf32> to vector<8x4xf32>
    %679 = arith.truncf %678 : vector<8x4xf32> to vector<8x4xbf16>
    %c7_655 = arith.constant 7 : index
    %c0_656 = arith.constant 0 : index
    %c0_657 = arith.constant 0 : index
    %680 = vector.load %arg3[%c7_655, %c0_656, %c0_657] : memref<9x4x128xbf16, #tpu.memory_space<vmem>>, vector<1x4x128xbf16>
    %681 = vector.shape_cast %680 : vector<1x4x128xbf16> to vector<4x128xbf16>
    %cst_658 = arith.constant dense<0.000000e+00> : vector<8x128xf32>
    %682 = tpu.matmul %679, %681, %cst_658 {dimension_numbers = #tpu.dot_dimension_numbers<[1], [0], [0], [1], [0, 0, 1, 1], [], []>} : vector<8x4xbf16>, vector<4x128xbf16>, vector<8x128xf32> -> vector<8x128xf32>
    %683 = arith.addf %675, %682 : vector<8x128xf32>
    %c0_659 = arith.constant 0 : index
    %c0_660 = arith.constant 0 : index
    %684 = arith.index_cast %667 : i32 to index
    %c1_661 = arith.constant 1 : index
    %c0_662 = arith.constant 0 : index
    %685 = vector.load %arg2[%c0_659, %c0_660, %684, %c1_661, %c0_662] : memref<1x4x9x9x4xf32, #tpu.memory_space<vmem>>, vector<1x1x1x8x4xf32>
    %686 = vector.shape_cast %685 : vector<1x1x1x8x4xf32> to vector<8x4xf32>
    %687 = arith.truncf %686 : vector<8x4xf32> to vector<8x4xbf16>
    %c8_663 = arith.constant 8 : index
    %c0_664 = arith.constant 0 : index
    %c0_665 = arith.constant 0 : index
    %688 = vector.load %arg3[%c8_663, %c0_664, %c0_665] : memref<9x4x128xbf16, #tpu.memory_space<vmem>>, vector<1x4x128xbf16>
    %689 = vector.shape_cast %688 : vector<1x4x128xbf16> to vector<4x128xbf16>
    %cst_666 = arith.constant dense<0.000000e+00> : vector<8x128xf32>
    %690 = tpu.matmul %687, %689, %cst_666 {dimension_numbers = #tpu.dot_dimension_numbers<[1], [0], [0], [1], [0, 0, 1, 1], [], []>} : vector<8x4xbf16>, vector<4x128xbf16>, vector<8x128xf32> -> vector<8x128xf32>
    %691 = arith.addf %683, %690 : vector<8x128xf32>
    %692 = vector.broadcast %0 : vector<1x128xf32> to vector<8x128xf32>
    %693 = arith.addf %691, %692 : vector<8x128xf32>
    %c0_667 = arith.constant 0 : index
    %c7_668 = arith.constant 7 : index
    %c0_669 = arith.constant 0 : index
    %c0_670 = arith.constant 0 : index
    %694 = vector.load %arg5[%c0_667, %c7_668, %c0_669, %c0_670] : memref<1x8x8x128xf32, #tpu.memory_space<vmem>>, vector<1x1x8x128xf32>
    %695 = vector.shape_cast %694 : vector<1x1x8x128xf32> to vector<8x128xf32>
    %696 = vector.shape_cast %693 : vector<8x128xf32> to vector<1x1x8x128xf32>
    tpu.vector_store %arg5[%c0_667, %c7_668, %c0_669, %c0_670], %696 {strides = array<i32>} : memref<1x8x8x128xf32, #tpu.memory_space<vmem>>, vector<1x1x8x128xf32>,
    return
  }
  func.func @transform_0(%arg0: i32, %arg1: i32) -> (i32, i32, i32, i32, i32) {
    %c0_i32 = arith.constant 0 : i32
    %c0_i32_0 = arith.constant 0 : i32
    %c0_i32_1 = arith.constant 0 : i32
    %c0_i32_2 = arith.constant 0 : i32
    %c0_i32_3 = arith.constant 0 : i32
    return %arg0, %c0_i32, %c0_i32_0, %c0_i32_1, %c0_i32_2 : i32, i32, i32, i32, i32
  }
  func.func @transform_1(%arg0: i32, %arg1: i32) -> (i32, i32, i32) {
    %c0_i32 = arith.constant 0 : i32
    %c0_i32_0 = arith.constant 0 : i32
    %c0_i32_1 = arith.constant 0 : i32
    %c0_i32_2 = arith.constant 0 : i32
    return %c0_i32, %c0_i32_0, %c0_i32_1 : i32, i32, i32
  }
  func.func @transform_2(%arg0: i32, %arg1: i32) -> (i32, i32) {
    %c0_i32 = arith.constant 0 : i32
    %c0_i32_0 = arith.constant 0 : i32
    %c0_i32_1 = arith.constant 0 : i32
    return %c0_i32, %c0_i32_0 : i32, i32
  }
  func.func @transform_3(%arg0: i32, %arg1: i32) -> (i32, i32, i32, i32) {
    %c0_i32 = arith.constant 0 : i32
    %c0_i32_0 = arith.constant 0 : i32
    %c0_i32_1 = arith.constant 0 : i32
    return %arg0, %arg1, %c0_i32, %c0_i32_0 : i32, i32, i32, i32
  }
}

</mosaic_0001>

<bundles_post_ra>
// kernel: conv2d_same.1
= control target key start
LH: loop header
LB: loop body
LE: loop exit
PB: predicated region body
PF: predicated region fallthrough
CT: control target
= control target key end

     0   :  { %s4982_s12 = smov 0   ;;  %s4984_s13 = smov 0   ;;  %s5671_s0 = inlined_call_operand.vmem [shape: f32[2,4,9,9,4], index: 0, kind: input, shape index: {}]   ;;  %s5672_s1 = inlined_call_operand.vmem [shape: bf16[9,4,128], index: 1, kind: input, shape index: {}]   ;;  %s5673_s2 = inlined_call_operand.vmem [shape: f32[1,128], index: 2, kind: input, shape index: {}]   ;;  %s5674_s3 = inlined_call_operand.vmem [shape: f32[2,8,8,128], index: 3, kind: output, shape index: {}]  }
   0x1   :  { %s4986_s14 = smov 0  }
   0x2 LB: > { %s25_s15 = sadd.s32 1, %s4954_s13  ;;  %p4112_p0 = scmp.ge.s32.totalorder %s4958_s14, 1  ;;  %s4958_s14 = sphi %s4986_s14, %s13_s14   ;;  %s4954_s13 = sphi %s4984_s13, %s5676_s13   ;;  %s4950_s12 = sphi %s4982_s12, %s5675_s12  }
   0x3   : > { %p27_p1 = scmp.ge.s32.totalorder %s25_s15, 2  ;;  %p151_p2 = scmp.lt.s32.totalorder %s4958_s14, 3 }
   0x5   : > { %s5678_s15 = smov (%p27_p1, %s25_s15), 0  ;;  %p152_p3 = pnand %p4112_p0, %p151_p2 }
   0x6   : > { %v4117_v0 = vld [vmem:[%s5672_s1 + $0x2] sm:$0x3] (!%p152_p3)  ;;  %vm212_vm0 = vcmask (!%p152_p3), 1041408   ;;  %v201_v1 = vld [vmem:[%s5672_s1] sm:$0x3] (!%p152_p3)  ;;  %v4960_v2 = vmov (!%p152_p3), 0.0  }
   0x7   : > { %155 = sbr.rel (%p152_p3) target bundleno = 520 (0x208), region = 32  ;;  %4477 = vmatprep.subr.bf16.mxu0 (!%p152_p3), %v4960_v2  ;;  %v214_v3 = vsel (!%p152_p3), %vm212_vm0, %v4117_v0, 0  ;;  %4483 = vmatprep.subr.bf16.mxu1 (!%p152_p3), %v4960_v2  ;;  %v260_v4 = vsel (!%p152_p3), %vm212_vm0, %v201_v1, 0  ;;  %p179_p4 = scmp.lt.s32.totalorder (!%p152_p3), %s4950_s12, 1  ;;  %vm4961_vm1 = vmmov (!%p152_p3), 0   ;;  %vm208_vm2 = vcmask (!%p152_p3), 31744  }
   0x8   : > { %4478 = vmatpush3.bf16.msra.mxu0 (!%p152_p3), %v214_v3  ;;  %4484 = vmatpush3.bf16.msra.mxu1 (!%p152_p3), %v260_v4  ;;  %v4120_v5 = vld [vmem:[%s5672_s1 + $0x4] sm:$0x3] (!%p152_p3)  ;;  %v4123_v6 = vld [vmem:[%s5672_s1 + $0x6] sm:$0x3] (!%p152_p3)  ;;  %v4126_v15 = vld [vmem:[%s5672_s1 + $0x8] sm:$0x3] (!%p152_p3) }
   0x9   : > { %4479 = vmatprep.mubr.msk.bf16.mxu0 (!%p152_p3), %vm4961_vm1, %v4960_v2  ;;  %4485 = vmatprep.mubr.msk.bf16.mxu1 (!%p152_p3), %vm4961_vm1, %v4960_v2  ;;  %v310_v11 = vsel (!%p152_p3), %vm212_vm0, %v4120_v5, 0  ;;  %v363_v12 = vsel (!%p152_p3), %vm212_vm0, %v4123_v6, 0  ;;  %v4129_v16 = vld [vmem:[%s5672_s1 + $0xa] sm:$0x3] (!%p152_p3)  ;;  %v416_v19 = vsel (!%p152_p3), %vm212_vm0, %v4126_v15, 0 }
   0xa   : > { %4489 = vmatprep.subr.bf16.mxu0 (!%p152_p3), %v4960_v2  ;;  %4495 = vmatprep.subr.bf16.mxu1 (!%p152_p3), %v4960_v2  ;;  %v467_v20 = vsel (!%p152_p3), %vm212_vm0, %v4129_v16, 0  ;;  %v4132_v23 = vld [vmem:[%s5672_s1 + $0xc] sm:$0x3] (!%p152_p3)  ;;  %v4135_v24 = vld [vmem:[%s5672_s1 + $0xe] sm:$0x3] (!%p152_p3) }
   0xb   : > { %v521_v27 = vsel (!%p152_p3), %vm212_vm0, %v4132_v23, 0  ;;  %v574_v28 = vsel (!%p152_p3), %vm212_vm0, %v4135_v24, 0  ;;  %v4138_v31 = vld [vmem:[%s5672_s1 + $0x10] sm:$0x3] (!%p152_p3)  ;;  %v4143_v32 = vld [vmem:[%s5672_s1 + $0x2] sm:$0x3] (!%p152_p3) }
   0xc   : > { %v625_v35 = vsel (!%p152_p3), %vm212_vm0, %v4138_v31, 0  ;;  %v686_v36 = vsel (!%p152_p3), %vm212_vm0, %v4143_v32, 0  ;;  %v678_v38 = vld [vmem:[%s5672_s1] sm:$0x3] (!%p152_p3)  ;;  %v4147_v39 = vld [vmem:[%s5672_s1 + $0x4] sm:$0x3] (!%p152_p3) }
   0xd   : > { %v732_v41 = vsel (!%p152_p3), %vm212_vm0, %v678_v38, 0  ;;  %v781_v42 = vsel (!%p152_p3), %vm212_vm0, %v4147_v39, 0  ;;  %v4150_v43 = vld [vmem:[%s5672_s1 + $0x6] sm:$0x3] (!%p152_p3)  ;;  %v4153_v44 = vld [vmem:[%s5672_s1 + $0x8] sm:$0x3] (!%p152_p3) }
   0xe   : > { %s5680_s12 = smov (!%p179_p4, %s4950_s12), 1  ;;  %v833_v45 = vsel %vm212_vm0, %v4150_v43, 0  ;;  %v885_v46 = vsel %vm212_vm0, %v4153_v44, 0  ;;  %v4156_v49 = vld [vmem:[%s5672_s1 + $0xa] sm:$0x3] }
   0xf   : > { %s4909_s20 = smul.u32 576, %s5680_s12  ;;  %v4159_v50 = vld [vmem:[%s5672_s1 + $0xc] sm:$0x3]  ;;  %v935_v53 = vsel %vm212_vm0, %v4156_v49, 0  ;;  %v4162_v57 = vld [vmem:[%s5672_s1 + $0xe] sm:$0x3] }
  0x10   : > { %v988_v54 = vsel %vm212_vm0, %v4159_v50, 0  ;;  %v4165_v58 = vld [vmem:[%s5672_s1 + $0x10] sm:$0x3]  ;;  %v1040_v61 = vsel %vm212_vm0, %v4162_v57, 0  ;;  %v4170_v1 = vld [vmem:[%s5672_s1 + $0x2] sm:$0x3] }
  0x11   : > { %s5028_s27 = scalar_lea.vmem %s5671_s0, %s4909_s20  ;;  %v1090_v62 = vsel %vm212_vm0, %v4165_v58, 0  ;;  %v1138_v3 = vld [vmem:[%s5672_s1] sm:$0x3]  ;;  %v1146_v6 = vsel %vm212_vm0, %v4170_v1, 0  ;;  %s4332_s11 = sshll.u32 %s5680_s12, 6 }
  0x12   : > { %v4116_v7 = vld [vmem:[%s5028_s27 + $0x90] sm:$0xff]  ;;  %v199_v8 = vld [vmem:[%s5028_s27] sm:$0xff]  ;;  %s5580_s23 = scalar_lea.vmem %s5674_s3, %s4332_s11 }
  0x13   : > { %v205_v9 = vpack.c.bf16 %v4116_v7, %v4116_v7  ;;  %v200_v10 = vpack.c.bf16 %v199_v8, %v199_v8  ;;  %v302_v13 = vld [vmem:[%s5028_s27 + $0x1] sm:$0xff]  ;;  %v4125_v21 = vld [vmem:[%s5028_s27 + $0x1b0] sm:$0xff]  ;;  %v1192_v7 = vsel %vm212_vm0, %v1138_v3, 0 }
  0x14   : > { %v4122_v14 = vld [vmem:[%s5028_s27 + $0x120] sm:$0xff]  ;;  %v303_v17 = vpack.c.bf16 %v302_v13, %v302_v13  ;;  %v409_v25 = vpack.c.bf16 %v4125_v21, %v4125_v21  ;;  %v4131_v29 = vld [vmem:[%s5028_s27 + $0x10] sm:$0xff]  ;;  %v4180_v13 = vld [vmem:[%s5672_s1 + $0x8] sm:$0x3] }
  0x15   : > { %4480 = vmatmul.mubr.msk.bf16.vlgmr.msra.gmra.mrb[0].mxu0 %vm208_vm2, %v205_v9  ;;  %4486 = vmatmul.mubr.msk.bf16.vlgmr.msra.gmra.mrb[0].mxu1 %vm208_vm2, %v200_v10  ;;  %v356_v18 = vpack.c.bf16 %v4122_v14, %v4122_v14  ;;  %v4128_v22 = vld [vmem:[%s5028_s27 + $0x121] sm:$0xff]  ;;  %v514_v33 = vpack.c.bf16 %v4131_v29, %v4131_v29  ;;  %v4137_v37 = vld [vmem:[%s5028_s27 + $0x11] sm:$0xff]  ;;  %v4183_v14 = vld [vmem:[%s5672_s1 + $0xa] sm:$0x3]  ;;  %v1345_v16 = vsel %vm212_vm0, %v4180_v13, 0 }
  0x16   : > { %4490 = vmatpush3.bf16.msra.mxu0 %v310_v11  ;;  %4496 = vmatpush3.bf16.msra.mxu1 %v363_v12  ;;  %v460_v26 = vpack.c.bf16 %v4128_v22, %v4128_v22  ;;  %v4134_v30 = vld [vmem:[%s5028_s27 + $0xa0] sm:$0xff]  ;;  %v618_v40 = vpack.c.bf16 %v4137_v37, %v4137_v37  ;;  %v4149_v47 = vld [vmem:[%s5028_s27 + $0x130] sm:$0xff]  ;;  %v4189_v21 = vld [vmem:[%s5672_s1 + $0xe] sm:$0x3] }
  0x17   : > { %4491 = vmatprep.mubr.msk.bf16.mxu0 %vm4961_vm1, %v4960_v2  ;;  %4497 = vmatprep.mubr.msk.bf16.mxu1 %vm4961_vm1, %v4960_v2  ;;  %v567_v34 = vpack.c.bf16 %v4134_v30, %v4134_v30  ;;  %v4152_v48 = vld [vmem:[%s5028_s27 + $0x1c0] sm:$0xff]  ;;  %v827_v51 = vpack.c.bf16 %v4149_v47, %v4149_v47  ;;  %v4155_v55 = vld [vmem:[%s5028_s27 + $0x131] sm:$0xff]  ;;  %v4213_v47 = vld [vmem:[%s5672_s1 + $0xc] sm:$0x3] }
  0x18   : > { %4501 = vmatprep.subr.bf16.mxu0 %v4960_v2  ;;  %4507 = vmatprep.subr.bf16.mxu1 %v4960_v2  ;;  %v879_v52 = vpack.c.bf16 %v4152_v48, %v4152_v48  ;;  %v4158_v56 = vld [vmem:[%s5028_s27 + $0x20] sm:$0xff]  ;;  %v929_v59 = vpack.c.bf16 %v4155_v55, %v4155_v55  ;;  %v4161_v63 = vld [vmem:[%s5028_s27 + $0xb0] sm:$0xff] }
  0x19   : > { %v982_v60 = vpack.c.bf16 %v4158_v56, %v4158_v56  ;;  %v4164_v0 = vld [vmem:[%s5028_s27 + $0x21] sm:$0xff]  ;;  %v1034_v4 = vpack.c.bf16 %v4161_v63, %v4161_v63  ;;  %v4203_v44 = vld [vmem:[%s5028_s27 + $0x150] sm:$0xff] }
  0x1a   : > { %v1084_v5 = vpack.c.bf16 %v4164_v0, %v4164_v0  ;;  %v4174_v8 = vld [vmem:[%s5672_s1 + $0x4] sm:$0x3]  ;;  %v4177_v9 = vld [vmem:[%s5672_s1 + $0x6] sm:$0x3]  ;;  %v4197_v29 = vld [vmem:[%s5672_s1 + $0x2] sm:$0x3]  ;;  %v1747_v48 = vpack.c.bf16 %v4203_v44, %v4203_v44 }
  0x1b   : > { %v1241_v10 = vsel %vm212_vm0, %v4174_v8, 0  ;;  %v1293_v11 = vsel %vm212_vm0, %v4177_v9, 0  ;;  %v4176_v12 = vld [vmem:[%s5028_s27 + $0x140] sm:$0xff]  ;;  %v4219_v55 = vld [vmem:[%s5672_s1 + $0x10] sm:$0x3] }
  0x1c   : > { %v1287_v15 = vpack.c.bf16 %v4176_v12, %v4176_v12  ;;  %v2058_v63 = vld [vmem:[%s5672_s1] sm:$0x3]  ;;  %v4267_v44 = vld [vmem:[%s5672_s1 + $0xc] sm:$0x3] }
  0x1d   : > { %4492 = vmatmul.mubr.msk.bf16.vlgmr.msra.gmra.mrb[4].mxu0 %vm208_vm2, %v303_v17  ;;  %4498 = vmatmul.mubr.msk.bf16.vlgmr.msra.gmra.mrb[4].mxu1 %vm208_vm2, %v356_v18  ;;  %v1395_v17 = vsel %vm212_vm0, %v4183_v14, 0  ;;  %v4179_v18 = vld [vmem:[%s5028_s27 + $0x1d0] sm:$0xff]  ;;  %v4230_v9 = vld [vmem:[%s5028_s27 + $0x160] sm:$0xff] }
  0x1e   : > { %4502 = vmatpush3.bf16.msra.mxu0 %v416_v19  ;;  %4508 = vmatpush3.bf16.msra.mxu1 %v467_v20  ;;  %v4182_v19 = vld [vmem:[%s5028_s27 + $0x141] sm:$0xff]  ;;  %v4186_v20 = vld [vmem:[%s5672_s1 + $0xc] sm:$0x3]  ;;  %v1339_v22 = vpack.c.bf16 %v4179_v18, %v4179_v18  ;;  %v2207_v12 = vpack.c.bf16 %v4230_v9, %v4230_v9  ;;  %v4243_v18 = vld [vmem:[%s5672_s1 + $0xe] sm:$0x3] }
  0x1f   : > { %4503 = vmatprep.mubr.msk.bf16.mxu0 %vm4961_vm1, %v4960_v2  ;;  %4509 = vmatprep.mubr.msk.bf16.mxu1 %vm4961_vm1, %v4960_v2  ;;  %v1389_v23 = vpack.c.bf16 %v4182_v19, %v4182_v19  ;;  %v1448_v24 = vsel %vm212_vm0, %v4186_v20, 0 }
  0x20   : > { %4513 = vmatprep.subr.bf16.mxu0 %v4960_v2  ;;  %4519 = vmatprep.subr.bf16.mxu1 %v4960_v2 }
  0x25   : > { %4504 = vmatmul.mubr.msk.bf16.vlgmr.msra.gmra.mrb[8].mxu0 %vm208_vm2, %v409_v25  ;;  %4510 = vmatmul.mubr.msk.bf16.vlgmr.msra.gmra.mrb[8].mxu1 %vm208_vm2, %v460_v26  ;;  %v1500_v25 = vsel %vm212_vm0, %v4189_v21, 0  ;;  %v4185_v26 = vld [vmem:[%s5028_s27 + $0x30] sm:$0xff] }
  0x26   : > { %4514 = vmatpush3.bf16.msra.mxu0 %v521_v27  ;;  %4520 = vmatpush3.bf16.msra.mxu1 %v574_v28  ;;  %v4188_v27 = vld [vmem:[%s5028_s27 + $0xc0] sm:$0xff]  ;;  %v4192_v28 = vld [vmem:[%s5672_s1 + $0x10] sm:$0x3]  ;;  %v1442_v30 = vpack.c.bf16 %v4185_v26, %v4185_v26 }
  0x27   : > { %4515 = vmatprep.mubr.msk.bf16.mxu0 %vm4961_vm1, %v4960_v2  ;;  %4521 = vmatprep.mubr.msk.bf16.mxu1 %vm4961_vm1, %v4960_v2  ;;  %v1494_v31 = vpack.c.bf16 %v4188_v27, %v4188_v27  ;;  %v1550_v32 = vsel %vm212_vm0, %v4192_v28, 0  ;;  %v4251_v26 = vld [vmem:[%s5672_s1 + $0x2] sm:$0x3] }
  0x28   : > { %4525 = vmatprep.subr.bf16.mxu0 %v4960_v2  ;;  %4531 = vmatprep.subr.bf16.mxu1 %v4960_v2 }
  0x2d   : > { %4516 = vmatmul.mubr.msk.bf16.vlgmr.msra.gmra.mrb[12].mxu0 %vm208_vm2, %v514_v33  ;;  %4522 = vmatmul.mubr.msk.bf16.vlgmr.msra.gmra.mrb[12].mxu1 %vm208_vm2, %v567_v34 }
  0x2e   : > { %4526 = vmatpush3.bf16.msra.mxu0 %v625_v35  ;;  %4532 = vmatpush3.bf16.msra.mxu1 %v686_v36  ;;  %v1598_v35 = vld [vmem:[%s5672_s1] sm:$0x3]  ;;  %v4201_v36 = vld [vmem:[%s5672_s1 + $0x4] sm:$0x3] }
  0x2f   : > { %4527 = vmatprep.mubr.msk.bf16.mxu0 %vm4961_vm1, %v4960_v2  ;;  %4533 = vmatprep.mubr.msk.bf16.mxu1 %vm4961_vm1, %v4960_v2  ;;  %v1652_v38 = vsel %vm212_vm0, %v1598_v35, 0  ;;  %v1701_v39 = vsel %vm212_vm0, %v4201_v36, 0 }
  0x30   : > { %4537 = vmatprep.subr.bf16.mxu0 %v4960_v2  ;;  %4543 = vmatprep.subr.bf16.mxu1 %v4960_v2 }
  0x35   : > { %4528 = vmatmul.mubr.msk.bf16.vlgmr.msra.gmra.mrb[16].mxu0 %vm208_vm2, %v618_v40  ;;  %4534 = vmatmul.mubr.msk.bf16.vlgmr.msra.gmra.mrb[16].mxu1 %vm208_vm2, %v567_v34  ;;  %v4191_v34 = vld [vmem:[%s5028_s27 + $0x31] sm:$0xff] }
  0x36   : > { %4538 = vmatpush3.bf16.msra.mxu0 %v732_v41  ;;  %4544 = vmatpush3.bf16.msra.mxu1 %v781_v42  ;;  %v1544_v37 = vpack.c.bf16 %v4191_v34, %v4191_v34  ;;  %v4207_v41 = vld [vmem:[%s5672_s1 + $0x8] sm:$0x3] }
  0x37   : > { %4539 = vmatprep.mubr.msk.bf16.mxu0 %vm4961_vm1, %v4960_v2  ;;  %4545 = vmatprep.mubr.msk.bf16.mxu1 %vm4961_vm1, %v4960_v2  ;;  %v1805_v43 = vsel %vm212_vm0, %v4207_v41, 0  ;;  %v4257_v41 = vld [vmem:[%s5028_s27 + $0x170] sm:$0xff] }
  0x38   : > { %4549 = vmatprep.subr.bf16.mxu0 %v4960_v2  ;;  %4555 = vmatprep.subr.bf16.mxu1 %v4960_v2 }
  0x3d   : > { %4540 = vmatmul.mubr.msk.bf16.vlgmr.msra.gmra.mrb[20].mxu0 %vm208_vm2, %v514_v33  ;;  %4546 = vmatmul.mubr.msk.bf16.vlgmr.msra.gmra.mrb[20].mxu1 %vm208_vm2, %v618_v40  ;;  %v1606_v33 = vsel %vm212_vm0, %v4197_v29, 0  ;;  %v4204_v40 = vld [vmem:[%s5672_s1 + $0x6] sm:$0x3] }
  0x3e   : > { %4550 = vmatpush3.bf16.msra.mxu0 %v833_v45  ;;  %4556 = vmatpush3.bf16.msra.mxu1 %v885_v46  ;;  %v1753_v42 = vsel %vm212_vm0, %v4204_v40, 0  ;;  %v4206_v45 = vld [vmem:[%s5028_s27 + $0x1e0] sm:$0xff]  ;;  %v4210_v46 = vld [vmem:[%s5672_s1 + $0xa] sm:$0x3] }
  0x3f   : > { %4551 = vmatprep.mubr.msk.bf16.mxu0 %vm4961_vm1, %v4960_v2  ;;  %4557 = vmatprep.mubr.msk.bf16.mxu1 %vm4961_vm1, %v4960_v2  ;;  %v1799_v49 = vpack.c.bf16 %v4206_v45, %v4206_v45  ;;  %v1855_v50 = vsel %vm212_vm0, %v4210_v46, 0  ;;  %v2667_v45 = vpack.c.bf16 %v4257_v41, %v4257_v41 }
  0x40   : > { %4561 = vmatprep.subr.bf16.mxu0 %v4960_v2  ;;  %4567 = vmatprep.subr.bf16.mxu1 %v4960_v2 }
  0x45   : > { %4552 = vmatmul.mubr.msk.bf16.vlgmr.msra.gmra.mrb[24].mxu0 %vm208_vm2, %v827_v51  ;;  %4558 = vmatmul.mubr.msk.bf16.vlgmr.msra.gmra.mrb[24].mxu1 %vm208_vm2, %v879_v52  ;;  %v1908_v51 = vsel %vm212_vm0, %v4213_v47, 0  ;;  %v4209_v52 = vld [vmem:[%s5028_s27 + $0x151] sm:$0xff] }
  0x46   : > { %4562 = vmatpush3.bf16.msra.mxu0 %v935_v53  ;;  %4568 = vmatpush3.bf16.msra.mxu1 %v988_v54  ;;  %v4212_v53 = vld [vmem:[%s5028_s27 + $0x40] sm:$0xff]  ;;  %v4216_v54 = vld [vmem:[%s5672_s1 + $0xe] sm:$0x3]  ;;  %v1849_v56 = vpack.c.bf16 %v4209_v52, %v4209_v52  ;;  %v4273_v52 = vld [vmem:[%s5672_s1 + $0x10] sm:$0x3] }
  0x47   : > { %4563 = vmatprep.mubr.msk.bf16.mxu0 %vm4961_vm1, %v4960_v2  ;;  %4569 = vmatprep.mubr.msk.bf16.mxu1 %vm4961_vm1, %v4960_v2  ;;  %v1902_v57 = vpack.c.bf16 %v4212_v53, %v4212_v53  ;;  %v1960_v58 = vsel %vm212_vm0, %v4216_v54, 0 }
  0x48   : > { %4573 = vmatprep.subr.bf16.mxu0 %v4960_v2  ;;  %4579 = vmatprep.subr.bf16.mxu1 %v4960_v2 }
  0x4d   : > { %4564 = vmatmul.mubr.msk.bf16.vlgmr.msra.gmra.mrb[28].mxu0 %vm208_vm2, %v929_v59  ;;  %4570 = vmatmul.mubr.msk.bf16.vlgmr.msra.gmra.mrb[28].mxu1 %vm208_vm2, %v982_v60  ;;  %v2010_v59 = vsel %vm212_vm0, %v4219_v55, 0 }
  0x4e   : > { %4574 = vmatpush3.bf16.msra.mxu0 %v1040_v61  ;;  %4580 = vmatpush3.bf16.msra.mxu1 %v1090_v62  ;;  %v4218_v61 = vld [vmem:[%s5028_s27 + $0x41] sm:$0xff] }
  0x4f   : > { %4575 = vmatprep.mubr.msk.bf16.mxu0 %vm4961_vm1, %v4960_v2  ;;  %4581 = vmatprep.mubr.msk.bf16.mxu1 %vm4961_vm1, %v4960_v2  ;;  %v4224_v62 = vld [vmem:[%s5672_s1 + $0x2] sm:$0x3]  ;;  %v2004_v1 = vpack.c.bf16 %v4218_v61, %v4218_v61 }
  0x50   : > { %4585 = vmatprep.subr.bf16.mxu0 %v4960_v2  ;;  %4591 = vmatprep.subr.bf16.mxu1 %v4960_v2  ;;  %v2066_v3 = vsel %vm212_vm0, %v4224_v62, 0 }
  0x55   : > { %4576 = vmatmul.mubr.msk.bf16.vlgmr.msra.gmra.mrb[32].mxu0 %vm208_vm2, %v1034_v4  ;;  %4582 = vmatmul.mubr.msk.bf16.vlgmr.msra.gmra.mrb[32].mxu1 %vm208_vm2, %v1084_v5 }
  0x56   : > { %4586 = vmatpush3.bf16.msra.mxu0 %v1146_v6  ;;  %4592 = vmatpush3.bf16.msra.mxu1 %v1192_v7  ;;  %v4231_v6 = vld [vmem:[%s5672_s1 + $0x6] sm:$0x3] }
  0x57   : > { %4587 = vmatprep.mubr.msk.bf16.mxu0 %vm4961_vm1, %v4960_v2  ;;  %4593 = vmatprep.mubr.msk.bf16.mxu1 %vm4961_vm1, %v4960_v2  ;;  %v2213_v8 = vsel %vm212_vm0, %v4231_v6, 0 }
  0x58   : > { %4597 = vmatprep.subr.bf16.mxu0 %v4960_v2  ;;  %4603 = vmatprep.subr.bf16.mxu1 %v4960_v2 }
  0x5d   : > { %4588 = vmatmul.mubr.msk.bf16.vlgmr.msra.gmra.mrb[36].mxu0 %vm208_vm2, %v1034_v4  ;;  %4594 = vmatmul.mubr.msk.bf16.vlgmr.msra.gmra.mrb[36].mxu1 %vm208_vm2, %v982_v60  ;;  %v4215_v60 = vld [vmem:[%s5028_s27 + $0xd0] sm:$0xff]  ;;  %v2112_v4 = vsel %vm212_vm0, %v2058_v63, 0 }
  0x5e   : > { %4598 = vmatpush3.bf16.msra.mxu0 %v1241_v10  ;;  %4604 = vmatpush3.bf16.msra.mxu1 %v1293_v11  ;;  %v1954_v0 = vpack.c.bf16 %v4215_v60, %v4215_v60  ;;  %v4234_v10 = vld [vmem:[%s5672_s1 + $0x8] sm:$0x3]  ;;  %v4237_v11 = vld [vmem:[%s5672_s1 + $0xa] sm:$0x3]  ;;  %v2978_v60 = vld [vmem:[%s5672_s1] sm:$0x3] }
  0x5f   : > { %4599 = vmatprep.mubr.msk.bf16.mxu0 %vm4961_vm1, %v4960_v2  ;;  %4605 = vmatprep.mubr.msk.bf16.mxu1 %vm4961_vm1, %v4960_v2  ;;  %v2265_v13 = vsel %vm212_vm0, %v4234_v10, 0  ;;  %v2315_v14 = vsel %vm212_vm0, %v4237_v11, 0 }
  0x60   : > { %4609 = vmatprep.subr.bf16.mxu0 %v4960_v2  ;;  %4615 = vmatprep.subr.bf16.mxu1 %v4960_v2 }
  0x65   : > { %4600 = vmatmul.mubr.msk.bf16.vlgmr.msra.gmra.mrb[40].mxu0 %vm208_vm2, %v1084_v5  ;;  %4606 = vmatmul.mubr.msk.bf16.vlgmr.msra.gmra.mrb[40].mxu1 %vm208_vm2, %v1287_v15  ;;  %v4228_v5 = vld [vmem:[%s5672_s1 + $0x4] sm:$0x3]  ;;  %v4233_v15 = vld [vmem:[%s5028_s27 + $0x1f0] sm:$0xff] }
  0x66   : > { %4610 = vmatpush3.bf16.msra.mxu0 %v1345_v16  ;;  %4616 = vmatpush3.bf16.msra.mxu1 %v1395_v17  ;;  %v2161_v7 = vsel %vm212_vm0, %v4228_v5, 0  ;;  %v4236_v16 = vld [vmem:[%s5028_s27 + $0x161] sm:$0xff]  ;;  %v4240_v17 = vld [vmem:[%s5672_s1 + $0xc] sm:$0x3]  ;;  %v2259_v19 = vpack.c.bf16 %v4233_v15, %v4233_v15 }
  0x67   : > { %4611 = vmatprep.mubr.msk.bf16.mxu0 %vm4961_vm1, %v4960_v2  ;;  %4617 = vmatprep.mubr.msk.bf16.mxu1 %vm4961_vm1, %v4960_v2  ;;  %v2309_v20 = vpack.c.bf16 %v4236_v16, %v4236_v16  ;;  %v2368_v21 = vsel %vm212_vm0, %v4240_v17, 0  ;;  %v4285_v5 = vld [vmem:[%s5672_s1 + $0x6] sm:$0x3] }
  0x68   : > { %4621 = vmatprep.subr.bf16.mxu0 %v4960_v2  ;;  %4627 = vmatprep.subr.bf16.mxu1 %v4960_v2  ;;  %v4284_v15 = vld [vmem:[%s5028_s27 + $0x180] sm:$0xff] }
  0x6d   : > { %4612 = vmatmul.mubr.msk.bf16.vlgmr.msra.gmra.mrb[44].mxu0 %vm208_vm2, %v1339_v22  ;;  %4618 = vmatmul.mubr.msk.bf16.vlgmr.msra.gmra.mrb[44].mxu1 %vm208_vm2, %v1389_v23  ;;  %v2420_v22 = vsel %vm212_vm0, %v4243_v18, 0  ;;  %v4239_v23 = vld [vmem:[%s5028_s27 + $0x50] sm:$0xff]  ;;  %v4288_v18 = vld [vmem:[%s5672_s1 + $0x8] sm:$0x3] }
  0x6e   : > { %4622 = vmatpush3.bf16.msra.mxu0 %v1448_v24  ;;  %4628 = vmatpush3.bf16.msra.mxu1 %v1500_v25  ;;  %v4242_v24 = vld [vmem:[%s5028_s27 + $0xe0] sm:$0xff]  ;;  %v4246_v25 = vld [vmem:[%s5672_s1 + $0x10] sm:$0x3]  ;;  %v2362_v27 = vpack.c.bf16 %v4239_v23, %v4239_v23  ;;  %v3127_v23 = vpack.c.bf16 %v4284_v15, %v4284_v15 }
  0x6f   : > { %4623 = vmatprep.mubr.msk.bf16.mxu0 %vm4961_vm1, %v4960_v2  ;;  %4629 = vmatprep.mubr.msk.bf16.mxu1 %vm4961_vm1, %v4960_v2  ;;  %v2414_v28 = vpack.c.bf16 %v4242_v24, %v4242_v24  ;;  %v2470_v29 = vsel %vm212_vm0, %v4246_v25, 0 }
  0x70   : > { %4633 = vmatprep.subr.bf16.mxu0 %v4960_v2  ;;  %4639 = vmatprep.subr.bf16.mxu1 %v4960_v2 }
  0x75   : > { %4624 = vmatmul.mubr.msk.bf16.vlgmr.msra.gmra.mrb[48].mxu0 %vm208_vm2, %v1442_v30  ;;  %4630 = vmatmul.mubr.msk.bf16.vlgmr.msra.gmra.mrb[48].mxu1 %vm208_vm2, %v1494_v31 }
  0x76   : > { %4634 = vmatpush3.bf16.msra.mxu0 %v1550_v32  ;;  %4640 = vmatpush3.bf16.msra.mxu1 %v1606_v33  ;;  %v2518_v32 = vld [vmem:[%s5672_s1] sm:$0x3]  ;;  %v4255_v33 = vld [vmem:[%s5672_s1 + $0x4] sm:$0x3] }
  0x77   : > { %4635 = vmatprep.mubr.msk.bf16.mxu0 %vm4961_vm1, %v4960_v2  ;;  %4641 = vmatprep.mubr.msk.bf16.mxu1 %vm4961_vm1, %v4960_v2  ;;  %v2572_v35 = vsel %vm212_vm0, %v2518_v32, 0  ;;  %v2621_v36 = vsel %vm212_vm0, %v4255_v33, 0  ;;  %v4290_v32 = vld [vmem:[%s5028_s27 + $0x181] sm:$0xff] }
  0x78   : > { %4645 = vmatprep.subr.bf16.mxu0 %v4960_v2  ;;  %4651 = vmatprep.subr.bf16.mxu1 %v4960_v2  ;;  %v3229_v41 = vpack.c.bf16 %v4290_v32, %v4290_v32 }
  0x7d   : > { %4636 = vmatmul.mubr.msk.bf16.vlgmr.msra.gmra.mrb[52].mxu0 %vm208_vm2, %v1544_v37  ;;  %4642 = vmatmul.mubr.msk.bf16.vlgmr.msra.gmra.mrb[52].mxu1 %vm208_vm2, %v1494_v31  ;;  %v4245_v31 = vld [vmem:[%s5028_s27 + $0x51] sm:$0xff] }
  0x7e   : > { %4646 = vmatpush3.bf16.msra.mxu0 %v1652_v38  ;;  %4652 = vmatpush3.bf16.msra.mxu1 %v1701_v39  ;;  %v2464_v34 = vpack.c.bf16 %v4245_v31, %v4245_v31  ;;  %v4261_v38 = vld [vmem:[%s5672_s1 + $0x8] sm:$0x3]  ;;  %v4287_v31 = vld [vmem:[%s5028_s27 + $0x210] sm:$0xff] }
  0x7f   : > { %4647 = vmatprep.mubr.msk.bf16.mxu0 %vm4961_vm1, %v4960_v2  ;;  %4653 = vmatprep.mubr.msk.bf16.mxu1 %vm4961_vm1, %v4960_v2  ;;  %v2725_v40 = vsel %vm212_vm0, %v4261_v38, 0 }
  0x80   : > { %4657 = vmatprep.subr.bf16.mxu0 %v4960_v2  ;;  %4663 = vmatprep.subr.bf16.mxu1 %v4960_v2 }
  0x85   : > { %4648 = vmatmul.mubr.msk.bf16.vlgmr.msra.gmra.mrb[56].mxu0 %vm208_vm2, %v1442_v30  ;;  %4654 = vmatmul.mubr.msk.bf16.vlgmr.msra.gmra.mrb[56].mxu1 %vm208_vm2, %v1544_v37  ;;  %v2526_v30 = vsel %vm212_vm0, %v4251_v26, 0  ;;  %v4258_v37 = vld [vmem:[%s5672_s1 + $0x6] sm:$0x3] }
  0x86   : > { %4658 = vmatpush3.bf16.msra.mxu0 %v1753_v42  ;;  %4664 = vmatpush3.bf16.msra.mxu1 %v1805_v43  ;;  %v2673_v39 = vsel %vm212_vm0, %v4258_v37, 0  ;;  %v4260_v42 = vld [vmem:[%s5028_s27 + $0x200] sm:$0xff]  ;;  %v4264_v43 = vld [vmem:[%s5672_s1 + $0xa] sm:$0x3] }
  0x87   : > { %4659 = vmatprep.mubr.msk.bf16.mxu0 %vm4961_vm1, %v4960_v2  ;;  %4665 = vmatprep.mubr.msk.bf16.mxu1 %vm4961_vm1, %v4960_v2  ;;  %v2719_v46 = vpack.c.bf16 %v4260_v42, %v4260_v42  ;;  %v2775_v47 = vsel %vm212_vm0, %v4264_v43, 0 }
  0x88   : > { %4669 = vmatprep.subr.bf16.mxu0 %v4960_v2  ;;  %4675 = vmatprep.subr.bf16.mxu1 %v4960_v2 }
  0x8d   : > { %4660 = vmatmul.mubr.msk.bf16.vlgmr.msra.gmra.mrb[60].mxu0 %vm208_vm2, %v1747_v48  ;;  %4666 = vmatmul.mubr.msk.bf16.vlgmr.msra.gmra.mrb[60].mxu1 %vm208_vm2, %v1799_v49  ;;  %v2828_v48 = vsel %vm212_vm0, %v4267_v44, 0  ;;  %v4263_v49 = vld [vmem:[%s5028_s27 + $0x171] sm:$0xff] }
  0x8e   : > { %4670 = vmatpush3.bf16.msra.mxu0 %v1855_v50  ;;  %4676 = vmatpush3.bf16.msra.mxu1 %v1908_v51  ;;  %v4266_v50 = vld [vmem:[%s5028_s27 + $0x60] sm:$0xff]  ;;  %v4270_v51 = vld [vmem:[%s5672_s1 + $0xe] sm:$0x3]  ;;  %v2769_v53 = vpack.c.bf16 %v4263_v49, %v4263_v49  ;;  %v4293_v49 = vld [vmem:[%s5028_s27 + $0x70] sm:$0xff] }
  0x8f   : > { %4671 = vmatprep.mubr.msk.bf16.mxu0 %vm4961_vm1, %v4960_v2  ;;  %4677 = vmatprep.mubr.msk.bf16.mxu1 %vm4961_vm1, %v4960_v2  ;;  %v2822_v54 = vpack.c.bf16 %v4266_v50, %v4266_v50  ;;  %v2880_v55 = vsel %vm212_vm0, %v4270_v51, 0  ;;  %v4296_v50 = vld [vmem:[%s5028_s27 + $0x100] sm:$0xff] }
  0x90   : > { %4681 = vmatprep.subr.bf16.mxu0 %v4960_v2  ;;  %4687 = vmatprep.subr.bf16.mxu1 %v4960_v2 }
  0x95   : > { %4672 = vmatmul.mubr.msk.bf16.vlgmr.msra.gmra.mrb[64].mxu0 %vm208_vm2, %v1849_v56  ;;  %4678 = vmatmul.mubr.msk.bf16.vlgmr.msra.gmra.mrb[64].mxu1 %vm208_vm2, %v1902_v57  ;;  %v2930_v56 = vsel %vm212_vm0, %v4273_v52, 0 }
  0x96   : > { %4682 = vmatpush3.bf16.msra.mxu0 %v1960_v58  ;;  %4688 = vmatpush3.bf16.msra.mxu1 %v2010_v59  ;;  %v4272_v58 = vld [vmem:[%s5028_s27 + $0x61] sm:$0xff] }
  0x97   : > { %4683 = vmatprep.mubr.msk.bf16.mxu0 %vm4961_vm1, %v4960_v2  ;;  %4689 = vmatprep.mubr.msk.bf16.mxu1 %vm4961_vm1, %v4960_v2  ;;  %v4278_v59 = vld [vmem:[%s5672_s1 + $0x2] sm:$0x3]  ;;  %v2924_v62 = vpack.c.bf16 %v4272_v58, %v4272_v58  ;;  %v3282_v58 = vpack.c.bf16 %v4293_v49, %v4293_v49 }
  0x98   : > { %4693 = vmatprep.subr.bf16.mxu0 %v4960_v2  ;;  %4699 = vmatprep.subr.bf16.mxu1 %v4960_v2  ;;  %v2986_v63 = vsel %vm212_vm0, %v4278_v59, 0  ;;  %v3334_v59 = vpack.c.bf16 %v4296_v50, %v4296_v50 }
  0x9d   : > { %4684 = vmatmul.mubr.msk.bf16.vlgmr.msra.gmra.mrb[68].mxu0 %vm208_vm2, %v1954_v0  ;;  %4690 = vmatmul.mubr.msk.bf16.vlgmr.msra.gmra.mrb[68].mxu1 %vm208_vm2, %v2004_v1 }
  0x9e   : > { %4694 = vmatpush3.bf16.msra.mxu0 %v2066_v3  ;;  %4700 = vmatpush3.bf16.msra.mxu1 %v2112_v4  ;;  %v4282_v4 = vld [vmem:[%s5672_s1 + $0x4] sm:$0x3] }
  0x9f   : > { %4695 = vmatprep.mubr.msk.bf16.mxu0 %vm4961_vm1, %v4960_v2  ;;  %4701 = vmatprep.mubr.msk.bf16.mxu1 %vm4961_vm1, %v4960_v2 }
  0xa0   : > { %4705 = vmatprep.subr.bf16.mxu0 %v4960_v2  ;;  %4711 = vmatprep.subr.bf16.mxu1 %v4960_v2 }
  0xa5   : > { %4696 = vmatmul.mubr.msk.bf16.vlgmr.msra.gmra.mrb[72].mxu0 %vm208_vm2, %v1954_v0  ;;  %4702 = vmatmul.mubr.msk.bf16.vlgmr.msra.gmra.mrb[72].mxu1 %vm208_vm2, %v1902_v57  ;;  %v4269_v57 = vld [vmem:[%s5028_s27 + $0xf0] sm:$0xff]  ;;  %v3032_v0 = vsel %vm212_vm0, %v2978_v60, 0 }
  0xa6   : > { %4706 = vmatpush3.bf16.msra.mxu0 %v2161_v7  ;;  %4712 = vmatpush3.bf16.msra.mxu1 %v2213_v8  ;;  %v2874_v61 = vpack.c.bf16 %v4269_v57, %v4269_v57 }
  0xa7   : > { %4707 = vmatprep.mubr.msk.bf16.mxu0 %vm4961_vm1, %v4960_v2  ;;  %4713 = vmatprep.mubr.msk.bf16.mxu1 %vm4961_vm1, %v4960_v2 }
  0xa8   : > { %4717 = vmatprep.subr.bf16.mxu0 %v4960_v2  ;;  %4723 = vmatprep.subr.bf16.mxu1 %v4960_v2 }
  0xad   : > { %4708 = vmatmul.mubr.msk.bf16.vlgmr.msra.gmra.mrb[76].mxu0 %vm208_vm2, %v2004_v1  ;;  %4714 = vmatmul.mubr.msk.bf16.vlgmr.msra.gmra.mrb[76].mxu1 %vm208_vm2, %v2207_v12 }
  0xae   : > { %4718 = vmatpush3.bf16.msra.mxu0 %v2265_v13  ;;  %4724 = vmatpush3.bf16.msra.mxu1 %v2315_v14  ;;  %v3081_v13 = vsel %vm212_vm0, %v4282_v4, 0  ;;  %v3133_v14 = vsel %vm212_vm0, %v4285_v5, 0  ;;  %v4299_v4 = vld [vmem:[%s5028_s27 + $0x71] sm:$0xff]  ;;  %v5563_v5 = vld [vmem:[%s5673_s2] ss:$0 sm:$0xff] }
  0xaf   : > { %4719 = vmatprep.mubr.msk.bf16.mxu0 %vm4961_vm1, %v4960_v2  ;;  %4725 = vmatprep.mubr.msk.bf16.mxu1 %vm4961_vm1, %v4960_v2 }
  0xb0   : > { %4729 = vmatprep.subr.bf16.mxu0 %v4960_v2  ;;  %4735 = vmatprep.subr.bf16.mxu1 %v4960_v2 }
  0xb5   : > { %4720 = vmatmul.mubr.msk.bf16.vlgmr.msra.gmra.mrb[80].mxu0 %vm208_vm2, %v2259_v19  ;;  %4726 = vmatmul.mubr.msk.bf16.vlgmr.msra.gmra.mrb[80].mxu1 %vm208_vm2, %v2309_v20  ;;  %v4291_v19 = vld [vmem:[%s5672_s1 + $0xa] sm:$0x3] }
  0xb6   : > { %4730 = vmatpush3.bf16.msra.mxu0 %v2368_v21  ;;  %4736 = vmatpush3.bf16.msra.mxu1 %v2420_v22 }
  0xb7   : > { %4731 = vmatprep.mubr.msk.bf16.mxu0 %vm4961_vm1, %v4960_v2  ;;  %4737 = vmatprep.mubr.msk.bf16.mxu1 %vm4961_vm1, %v4960_v2 }
  0xb8   : > { %4741 = vmatprep.subr.bf16.mxu0 %v4960_v2  ;;  %4747 = vmatprep.subr.bf16.mxu1 %v4960_v2 }
  0xbd   : > { %4732 = vmatmul.mubr.msk.bf16.vlgmr.msra.gmra.mrb[84].mxu0 %vm208_vm2, %v2362_v27  ;;  %4738 = vmatmul.mubr.msk.bf16.vlgmr.msra.gmra.mrb[84].mxu1 %vm208_vm2, %v2414_v28 }
  0xbe   : > { %4742 = vmatpush3.bf16.msra.mxu0 %v2470_v29  ;;  %4748 = vmatpush3.bf16.msra.mxu1 %v2526_v30  ;;  %v3185_v29 = vsel %vm212_vm0, %v4288_v18, 0  ;;  %v3235_v30 = vsel %vm212_vm0, %v4291_v19, 0 }
  0xbf   : > { %4743 = vmatprep.mubr.msk.bf16.mxu0 %vm4961_vm1, %v4960_v2  ;;  %4749 = vmatprep.mubr.msk.bf16.mxu1 %vm4961_vm1, %v4960_v2 }
  0xc0   : > { %4753 = vmatprep.subr.bf16.mxu0 %v4960_v2  ;;  %4759 = vmatprep.subr.bf16.mxu1 %v4960_v2 }
  0xc5   : > { %4744 = vmatmul.mubr.msk.bf16.vlgmr.msra.gmra.mrb[88].mxu0 %vm208_vm2, %v2464_v34  ;;  %4750 = vmatmul.mubr.msk.bf16.vlgmr.msra.gmra.mrb[88].mxu1 %vm208_vm2, %v2414_v28 }
  0xc6   : > { %4754 = vmatpush3.bf16.msra.mxu0 %v2572_v35  ;;  %4760 = vmatpush3.bf16.msra.mxu1 %v2621_v36  ;;  %v4294_v35 = vld [vmem:[%s5672_s1 + $0xc] sm:$0x3]  ;;  %v4297_v36 = vld [vmem:[%s5672_s1 + $0xe] sm:$0x3] }
  0xc7   : > { %4755 = vmatprep.mubr.msk.bf16.mxu0 %vm4961_vm1, %v4960_v2  ;;  %4761 = vmatprep.mubr.msk.bf16.mxu1 %vm4961_vm1, %v4960_v2 }
  0xc8   : > { %4765 = vmatprep.subr.bf16.mxu0 %v4960_v2  ;;  %4771 = vmatprep.subr.bf16.mxu1 %v4960_v2 }
  0xcd   : > { %4756 = vmatmul.mubr.msk.bf16.vlgmr.msra.gmra.mrb[92].mxu0 %vm208_vm2, %v2362_v27  ;;  %4762 = vmatmul.mubr.msk.bf16.vlgmr.msra.gmra.mrb[92].mxu1 %vm208_vm2, %v2464_v34 }
  0xce   : > { %4766 = vmatpush3.bf16.msra.mxu0 %v2673_v39  ;;  %4772 = vmatpush3.bf16.msra.mxu1 %v2725_v40  ;;  %v3179_v40 = vpack.c.bf16 %v4287_v31, %v4287_v31 }
  0xcf   : > { %4767 = vmatprep.mubr.msk.bf16.mxu0 %vm4961_vm1, %v4960_v2  ;;  %4773 = vmatprep.mubr.msk.bf16.mxu1 %vm4961_vm1, %v4960_v2 }
  0xd0   : > { %4777 = vmatprep.subr.bf16.mxu0 %v4960_v2  ;;  %4783 = vmatprep.subr.bf16.mxu1 %v4960_v2 }
  0xd5   : > { %4768 = vmatmul.mubr.msk.bf16.vlgmr.msra.gmra.mrb[96].mxu0 %vm208_vm2, %v2667_v45  ;;  %4774 = vmatmul.mubr.msk.bf16.vlgmr.msra.gmra.mrb[96].mxu1 %vm208_vm2, %v2719_v46 }
  0xd6   : > { %4778 = vmatpush3.bf16.msra.mxu0 %v2775_v47  ;;  %4784 = vmatpush3.bf16.msra.mxu1 %v2828_v48  ;;  %v3288_v47 = vsel %vm212_vm0, %v4294_v35, 0  ;;  %v3340_v48 = vsel %vm212_vm0, %v4297_v36, 0  ;;  %v4311_v35 = vld [vmem:[%s5028_s27 + $0x190] sm:$0xff]  ;;  %v4314_v36 = vld [vmem:[%s5028_s27 + $0x220] sm:$0xff] }
  0xd7   : > { %4779 = vmatprep.mubr.msk.bf16.mxu0 %vm4961_vm1, %v4960_v2  ;;  %4785 = vmatprep.mubr.msk.bf16.mxu1 %vm4961_vm1, %v4960_v2 }
  0xd8   : > { %4789 = vmatprep.subr.bf16.mxu0 %v4960_v2  ;;  %4795 = vmatprep.subr.bf16.mxu1 %v4960_v2 }
  0xdd   : > { %4780 = vmatmul.mubr.msk.bf16.vlgmr.msra.gmra.mrb[100].mxu0 %vm208_vm2, %v2769_v53  ;;  %4786 = vmatmul.mubr.msk.bf16.vlgmr.msra.gmra.mrb[100].mxu1 %vm208_vm2, %v2822_v54  ;;  %v4300_v53 = vld [vmem:[%s5672_s1 + $0x10] sm:$0x3] }
  0xde   : > { %4790 = vmatpush3.bf16.msra.mxu0 %v2880_v55  ;;  %4796 = vmatpush3.bf16.msra.mxu1 %v2930_v56 }
  0xdf   : > { %4791 = vmatprep.mubr.msk.bf16.mxu0 %vm4961_vm1, %v4960_v2  ;;  %4797 = vmatprep.mubr.msk.bf16.mxu1 %vm4961_vm1, %v4960_v2 }
  0xe0   : > { %4801 = vmatprep.subr.bf16.mxu0 %v4960_v2  ;;  %4807 = vmatprep.subr.bf16.mxu1 %v4960_v2 }
  0xe5   : > { %4792 = vmatmul.mubr.msk.bf16.vlgmr.msra.gmra.mrb[104].mxu0 %vm208_vm2, %v2874_v61  ;;  %4798 = vmatmul.mubr.msk.bf16.vlgmr.msra.gmra.mrb[104].mxu1 %vm208_vm2, %v2924_v62 }
  0xe6   : > { %4802 = vmatpush3.bf16.msra.mxu0 %v2986_v63  ;;  %4808 = vmatpush3.bf16.msra.mxu1 %v3032_v0 }
  0xe7   : > { %4803 = vmatprep.mubr.msk.bf16.mxu0 %vm4961_vm1, %v4960_v2  ;;  %4809 = vmatprep.mubr.msk.bf16.mxu1 %vm4961_vm1, %v4960_v2 }
  0xe8   : > { %v250_v1 = vpop.f32.mrb[0].mxu0  ;;  %v296_v3 = vpop.f32.mrb[0].mxu1  ;;  %4813 = vmatprep.subr.bf16.mxu0 %v4960_v2  ;;  %4819 = vmatprep.subr.bf16.mxu1 %v4960_v2 }
  0xe9   : > { %v297_v6 = vadd.f32 %v296_v3, %v250_v1  ;;  %v4481_v7 = vpop.f32.mrb[1].mxu0  ;;  %v4487_v8 = vpop.f32.mrb[1].mxu1  ;;  %v3390_v1 = vsel %vm212_vm0, %v4300_v53, 0  ;;  %v4317_v53 = vld [vmem:[%s5028_s27 + $0x191] sm:$0xff] }
  0xea   : > { %v253_v9 = vpop.f32.mrb[2].mxu0  ;;  %v299_v10 = vpop.f32.mrb[2].mxu1  ;;  %v3438_v8 = vld [vmem:[%s5672_s1] sm:$0x3] }
  0xeb   : > { %v4482_v11 = vpop.f32.mrb[3].mxu0  ;;  %v4488_v12 = vpop.f32.mrb[3].mxu1  ;;  %v4309_v9 = vld [vmem:[%s5672_s1 + $0x4] sm:$0x3]  ;;  %v3492_v19 = vsel %vm212_vm0, %v3438_v8, 0 }
  0xed   : > { %4804 = vmatmul.mubr.msk.bf16.vlgmr.msra.gmra.mrb[108].mxu0 %vm208_vm2, %v2874_v61  ;;  %4810 = vmatmul.mubr.msk.bf16.vlgmr.msra.gmra.mrb[108].mxu1 %vm208_vm2, %v2822_v54  ;;  %v4305_v54 = vld [vmem:[%s5672_s1 + $0x2] sm:$0x3] }
  0xee   : > { %4814 = vmatpush3.bf16.msra.mxu0 %v3081_v13  ;;  %4820 = vmatpush3.bf16.msra.mxu1 %v3133_v14  ;;  %v3446_v3 = vsel %vm212_vm0, %v4305_v54, 0  ;;  %v3384_v13 = vpack.c.bf16 %v4299_v4, %v4299_v4  ;;  %v4320_v54 = vld [vmem:[%s5028_s27 + $0x80] sm:$0xff] }
  0xef   : > { %4815 = vmatprep.mubr.msk.bf16.mxu0 %vm4961_vm1, %v4960_v2  ;;  %4821 = vmatprep.mubr.msk.bf16.mxu1 %vm4961_vm1, %v4960_v2 }
  0xf0   : > { %v346_v16 = vpop.f32.mrb[4].mxu0  ;;  %v399_v17 = vpop.f32.mrb[4].mxu1  ;;  %4825 = vmatprep.subr.bf16.mxu0 %v4960_v2  ;;  %4831 = vmatprep.subr.bf16.mxu1 %v4960_v2 }
  0xf1   : > { %v352_v20 = vadd.f32 %v346_v16, %v297_v6  ;;  %v4493_v21 = vpop.f32.mrb[5].mxu0  ;;  %v4499_v22 = vpop.f32.mrb[5].mxu1 }
  0xf2   : > { %v349_v24 = vpop.f32.mrb[6].mxu0  ;;  %v402_v25 = vpop.f32.mrb[6].mxu1 }
  0xf3   : > { %v405_v26 = vadd.f32 %v399_v17, %v352_v20  ;;  %v4494_v27 = vpop.f32.mrb[7].mxu0  ;;  %v4500_v28 = vpop.f32.mrb[7].mxu1  ;;  %v3541_v20 = vsel %vm212_vm0, %v4309_v9, 0  ;;  %v4315_v24 = vld [vmem:[%s5672_s1 + $0x8] sm:$0x3]  ;;  %v4323_v9 = vld [vmem:[%s5028_s27 + $0x110] sm:$0xff] }
  0xf5   : > { %4816 = vmatmul.mubr.msk.bf16.vlgmr.msra.gmra.mrb[112].mxu0 %vm208_vm2, %v2924_v62  ;;  %4822 = vmatmul.mubr.msk.bf16.vlgmr.msra.gmra.mrb[112].mxu1 %vm208_vm2, %v3127_v23  ;;  %v4312_v23 = vld [vmem:[%s5672_s1 + $0x6] sm:$0x3] }
  0xf6   : > { %4826 = vmatpush3.bf16.msra.mxu0 %v3185_v29  ;;  %4832 = vmatpush3.bf16.msra.mxu1 %v3235_v30 }
  0xf7   : > { %4827 = vmatprep.mubr.msk.bf16.mxu0 %vm4961_vm1, %v4960_v2  ;;  %4833 = vmatprep.mubr.msk.bf16.mxu1 %vm4961_vm1, %v4960_v2 }
  0xf8   : > { %v452_v33 = vpop.f32.mrb[8].mxu0  ;;  %v503_v34 = vpop.f32.mrb[8].mxu1  ;;  %4837 = vmatprep.subr.bf16.mxu0 %v4960_v2  ;;  %4843 = vmatprep.subr.bf16.mxu1 %v4960_v2 }
  0xf9   : > { %v458_v37 = vadd.f32 %v452_v33, %v405_v26  ;;  %v4505_v38 = vpop.f32.mrb[9].mxu0  ;;  %v4511_v39 = vpop.f32.mrb[9].mxu1  ;;  %v3593_v33 = vsel %vm212_vm0, %v4312_v23, 0 }
  0xfa   : > { %v455_v42 = vpop.f32.mrb[10].mxu0  ;;  %v506_v43 = vpop.f32.mrb[10].mxu1  ;;  %v4318_v39 = vld [vmem:[%s5672_s1 + $0xa] sm:$0x3] }
  0xfb   : > { %v509_v44 = vadd.f32 %v503_v34, %v458_v37  ;;  %v4506_v45 = vpop.f32.mrb[11].mxu0  ;;  %v4512_v46 = vpop.f32.mrb[11].mxu1  ;;  %v3645_v34 = vsel %vm212_vm0, %v4315_v24, 0 }
  0xfc   : > { %v3639_v45 = vpack.c.bf16 %v4314_v36, %v4314_v36 }
  0xfd   : > { %4828 = vmatmul.mubr.msk.bf16.vlgmr.msra.gmra.mrb[116].mxu0 %vm208_vm2, %v3179_v40  ;;  %4834 = vmatmul.mubr.msk.bf16.vlgmr.msra.gmra.mrb[116].mxu1 %vm208_vm2, %v3229_v41  ;;  %v4321_v40 = vld [vmem:[%s5672_s1 + $0xc] sm:$0x3] }
  0xfe   : > { %4838 = vmatpush3.bf16.msra.mxu0 %v3288_v47  ;;  %4844 = vmatpush3.bf16.msra.mxu1 %v3340_v48 }
  0xff   : > { %4839 = vmatprep.mubr.msk.bf16.mxu0 %vm4961_vm1, %v4960_v2  ;;  %4845 = vmatprep.mubr.msk.bf16.mxu1 %vm4961_vm1, %v4960_v2 }
 0x100   : > { %v557_v51 = vpop.f32.mrb[12].mxu0  ;;  %v610_v52 = vpop.f32.mrb[12].mxu1  ;;  %4849 = vmatprep.subr.bf16.mxu0 %v4960_v2  ;;  %4855 = vmatprep.subr.bf16.mxu1 %v4960_v2 }
 0x101   : > { %v563_v55 = vadd.f32 %v557_v51, %v509_v44  ;;  %v4517_v56 = vpop.f32.mrb[13].mxu0  ;;  %v4523_v57 = vpop.f32.mrb[13].mxu1  ;;  %v3587_v44 = vpack.c.bf16 %v4311_v35, %v4311_v35  ;;  %v3695_v51 = vsel %vm212_vm0, %v4318_v39, 0 }
 0x102   : > { %v560_v60 = vpop.f32.mrb[14].mxu0  ;;  %v613_v61 = vpop.f32.mrb[14].mxu1  ;;  %v4324_v57 = vld [vmem:[%s5672_s1 + $0xe] sm:$0x3] }
 0x103   : > { %v616_v62 = vadd.f32 %v610_v52, %v563_v55  ;;  %v4518_v63 = vpop.f32.mrb[15].mxu0  ;;  %v4524_v0 = vpop.f32.mrb[15].mxu1  ;;  %v3748_v52 = vsel %vm212_vm0, %v4321_v40, 0 }
 0x104   : > { %v3742_v63 = vpack.c.bf16 %v4320_v54, %v4320_v54 }
 0x105   : > { %4840 = vmatmul.mubr.msk.bf16.vlgmr.msra.gmra.mrb[120].mxu0 %vm208_vm2, %v3282_v58  ;;  %4846 = vmatmul.mubr.msk.bf16.vlgmr.msra.gmra.mrb[120].mxu1 %vm208_vm2, %v3334_v59 }
 0x106   : > { %4850 = vmatpush3.bf16.msra.mxu0 %v3390_v1  ;;  %4856 = vmatpush3.bf16.msra.mxu1 %v3446_v3 }
 0x107   : > { %4851 = vmatprep.mubr.msk.bf16.mxu0 %vm4961_vm1, %v4960_v2  ;;  %4857 = vmatprep.mubr.msk.bf16.mxu1 %vm4961_vm1, %v4960_v2 }
 0x108   : > { %v661_v6 = vpop.f32.mrb[16].mxu0  ;;  %v722_v7 = vpop.f32.mrb[16].mxu1  ;;  %4861 = vmatprep.subr.bf16.mxu0 %v4960_v2  ;;  %4867 = vmatprep.subr.bf16.mxu1 %v4960_v2 }
 0x109   : > { %v667_v10 = vadd.f32 %v661_v6, %v616_v62  ;;  %v4529_v11 = vpop.f32.mrb[17].mxu0  ;;  %v4535_v12 = vpop.f32.mrb[17].mxu1  ;;  %v3689_v62 = vpack.c.bf16 %v4317_v53, %v4317_v53 }
 0x10a   : > { %v664_v14 = vpop.f32.mrb[18].mxu0  ;;  %v725_v15 = vpop.f32.mrb[18].mxu1 }
 0x10b   : > { %v674_v16 = vadd.f32 %v5563_v5, %v667_v10  ;;  %v4530_v17 = vpop.f32.mrb[19].mxu0  ;;  %v4536_v18 = vpop.f32.mrb[19].mxu1  ;;  %v4326_v10 = vld [vmem:[%s5028_s27 + $0x81] sm:$0xff] }
 0x10c   : > { %v3844_v17 = vpack.c.bf16 %v4326_v10, %v4326_v10 }
 0x10d   : > { %675 = vst [vmem:[%s5580_s23] sm:$0xff] %v674_v16  ;;  %4852 = vmatmul.mubr.msk.bf16.vlgmr.msra.gmra.mrb[124].mxu0 %vm208_vm2, %v3384_v13  ;;  %4858 = vmatmul.mubr.msk.bf16.vlgmr.msra.gmra.mrb[124].mxu1 %vm208_vm2, %v3334_v59  ;;  %v3794_v16 = vpack.c.bf16 %v4323_v9, %v4323_v9 }
 0x10e   : > { %4862 = vmatpush3.bf16.msra.mxu0 %v3492_v19  ;;  %4868 = vmatpush3.bf16.msra.mxu1 %v3541_v20 }
 0x10f   : > { %4863 = vmatprep.mubr.msk.bf16.mxu0 %vm4961_vm1, %v4960_v2  ;;  %4869 = vmatprep.mubr.msk.bf16.mxu1 %vm4961_vm1, %v4960_v2 }
 0x110   : > { %v768_v21 = vpop.f32.mrb[20].mxu0  ;;  %v817_v22 = vpop.f32.mrb[20].mxu1  ;;  %4873 = vmatprep.subr.bf16.mxu0 %v4960_v2  ;;  %4879 = vmatprep.subr.bf16.mxu1 %v4960_v2 }
 0x111   : > { %v769_v25 = vadd.f32 %v768_v21, %v722_v7  ;;  %v4541_v26 = vpop.f32.mrb[21].mxu0  ;;  %v4547_v27 = vpop.f32.mrb[21].mxu1  ;;  %v3800_v7 = vsel %vm212_vm0, %v4324_v57, 0 }
 0x112   : > { %v771_v28 = vpop.f32.mrb[22].mxu0  ;;  %v820_v29 = vpop.f32.mrb[22].mxu1 }
 0x113   : > { %v823_v30 = vadd.f32 %v817_v22, %v769_v25  ;;  %v4542_v31 = vpop.f32.mrb[23].mxu0  ;;  %v4548_v32 = vpop.f32.mrb[23].mxu1 }
 0x115   : > { %4864 = vmatmul.mubr.msk.bf16.vlgmr.msra.gmra.mrb[128].mxu0 %vm208_vm2, %v3282_v58  ;;  %4870 = vmatmul.mubr.msk.bf16.vlgmr.msra.gmra.mrb[128].mxu1 %vm208_vm2, %v3384_v13  ;;  %v4327_v58 = vld [vmem:[%s5672_s1 + $0x10] sm:$0x3] }
 0x116   : > { %4874 = vmatpush3.bf16.msra.mxu0 %v3593_v33  ;;  %4880 = vmatpush3.bf16.msra.mxu1 %v3645_v34  ;;  %v3850_v8 = vsel %vm212_vm0, %v4327_v58, 0 }
 0x117   : > { %4875 = vmatprep.mubr.msk.bf16.mxu0 %vm4961_vm1, %v4960_v2  ;;  %4881 = vmatprep.mubr.msk.bf16.mxu1 %vm4961_vm1, %v4960_v2 }
 0x118   : > { %v869_v37 = vpop.f32.mrb[24].mxu0  ;;  %v921_v38 = vpop.f32.mrb[24].mxu1  ;;  %4885 = vmatprep.subr.bf16.mxu0 %v4960_v2  ;;  %4891 = vmatprep.subr.bf16.mxu1 %v4960_v2 }
 0x119   : > { %v875_v41 = vadd.f32 %v869_v37, %v823_v30  ;;  %v4553_v42 = vpop.f32.mrb[25].mxu0  ;;  %v4559_v43 = vpop.f32.mrb[25].mxu1 }
 0x11a   : > { %v872_v46 = vpop.f32.mrb[26].mxu0  ;;  %v924_v47 = vpop.f32.mrb[26].mxu1 }
 0x11b   : > { %v927_v48 = vadd.f32 %v921_v38, %v875_v41  ;;  %v4554_v49 = vpop.f32.mrb[27].mxu0  ;;  %v4560_v50 = vpop.f32.mrb[27].mxu1 }
 0x11d   : > { %4876 = vmatmul.mubr.msk.bf16.vlgmr.msra.gmra.mrb[132].mxu0 %vm208_vm2, %v3587_v44  ;;  %4882 = vmatmul.mubr.msk.bf16.vlgmr.msra.gmra.mrb[132].mxu1 %vm208_vm2, %v3639_v45 }
 0x11e   : > { %4886 = vmatpush3.bf16.msra.mxu0 %v3695_v51  ;;  %4892 = vmatpush3.bf16.msra.mxu1 %v3748_v52 }
 0x11f   : > { %4887 = vmatprep.mubr.msk.bf16.mxu0 %vm4961_vm1, %v4960_v2  ;;  %4893 = vmatprep.mubr.msk.bf16.mxu1 %vm4961_vm1, %v4960_v2 }
 0x120   : > { %v971_v55 = vpop.f32.mrb[28].mxu0  ;;  %v1024_v56 = vpop.f32.mrb[28].mxu1  ;;  %4897 = vmatprep.subr.bf16.mxu0 %v4960_v2  ;;  %4903 = vmatprep.subr.bf16.mxu1 %v4960_v2 }
 0x121   : > { %v977_v59 = vadd.f32 %v971_v55, %v927_v48  ;;  %v4565_v60 = vpop.f32.mrb[29].mxu0  ;;  %v4571_v61 = vpop.f32.mrb[29].mxu1 }
 0x122   : > { %v974_v0 = vpop.f32.mrb[30].mxu0  ;;  %v1027_v1 = vpop.f32.mrb[30].mxu1 }
 0x123   : > { %v1030_v3 = vadd.f32 %v1024_v56, %v977_v59  ;;  %v4566_v4 = vpop.f32.mrb[31].mxu0  ;;  %v4572_v6 = vpop.f32.mrb[31].mxu1 }
 0x125   : > { %4888 = vmatmul.mubr.msk.bf16.vlgmr.msra.gmra.mrb[136].mxu0 %vm208_vm2, %v3689_v62  ;;  %4894 = vmatmul.mubr.msk.bf16.vlgmr.msra.gmra.mrb[136].mxu1 %vm208_vm2, %v3742_v63 }
 0x126   : > { %4898 = vmatpush3.bf16.msra.mxu0 %v3800_v7  ;;  %4904 = vmatpush3.bf16.msra.mxu1 %v3850_v8 }
 0x127   : > { %4899 = vmatprep.mubr.msk.bf16.mxu0 %vm4961_vm1, %v4960_v2  ;;  %4905 = vmatprep.mubr.msk.bf16.mxu1 %vm4961_vm1, %v4960_v2 }
 0x128   : > { %v1076_v11 = vpop.f32.mrb[32].mxu0  ;;  %v1126_v12 = vpop.f32.mrb[32].mxu1 }
 0x129   : > { %v1082_v13 = vadd.f32 %v1076_v11, %v1030_v3  ;;  %v4577_v14 = vpop.f32.mrb[33].mxu0  ;;  %v4583_v15 = vpop.f32.mrb[33].mxu1 }
 0x12a   : > { %v1079_v18 = vpop.f32.mrb[34].mxu0  ;;  %v1129_v19 = vpop.f32.mrb[34].mxu1 }
 0x12b   : > { %v1132_v20 = vadd.f32 %v1126_v12, %v1082_v13  ;;  %v4578_v21 = vpop.f32.mrb[35].mxu0  ;;  %v4584_v22 = vpop.f32.mrb[35].mxu1 }
 0x12d   : > { %v1133_v23 = vadd.f32 %v5563_v5, %v1132_v20  ;;  %4900 = vmatmul.mubr.msk.bf16.vlgmr.msra.gmra.mrb[140].mxu0 %vm208_vm2, %v3794_v16  ;;  %4906 = vmatmul.mubr.msk.bf16.vlgmr.msra.gmra.mrb[140].mxu1 %vm208_vm2, %v3844_v17 }
 0x12f   : > { %4167 = vst [vmem:[%s5580_s23 + $0x8] sm:$0xff] %v1133_v23 }
 0x130   : > { %v1182_v2 = vpop.f32.mrb[36].mxu0  ;;  %v1228_v24 = vpop.f32.mrb[36].mxu1 }
 0x131   : > { %v1229_v25 = vadd.f32 %v1228_v24, %v1182_v2  ;;  %v4589_v26 = vpop.f32.mrb[37].mxu0  ;;  %v4595_v27 = vpop.f32.mrb[37].mxu1 }
 0x132   : > { %v1185_v28 = vpop.f32.mrb[38].mxu0  ;;  %v1231_v29 = vpop.f32.mrb[38].mxu1 }
 0x133   : > { %v4590_v30 = vpop.f32.mrb[39].mxu0  ;;  %v4596_v31 = vpop.f32.mrb[39].mxu1 }
 0x138   : > { %v1277_v32 = vpop.f32.mrb[40].mxu0  ;;  %v1329_v33 = vpop.f32.mrb[40].mxu1 }
 0x139   : > { %v1283_v34 = vadd.f32 %v1277_v32, %v1229_v25  ;;  %v4601_v35 = vpop.f32.mrb[41].mxu0  ;;  %v4607_v36 = vpop.f32.mrb[41].mxu1 }
 0x13a   : > { %v1280_v37 = vpop.f32.mrb[42].mxu0  ;;  %v1332_v38 = vpop.f32.mrb[42].mxu1 }
 0x13b   : > { %v1335_v39 = vadd.f32 %v1329_v33, %v1283_v34  ;;  %v4602_v40 = vpop.f32.mrb[43].mxu0  ;;  %v4608_v41 = vpop.f32.mrb[43].mxu1 }
 0x140   : > { %v1381_v42 = vpop.f32.mrb[44].mxu0  ;;  %v1431_v43 = vpop.f32.mrb[44].mxu1 }
 0x141   : > { %v1387_v44 = vadd.f32 %v1381_v42, %v1335_v39  ;;  %v4613_v45 = vpop.f32.mrb[45].mxu0  ;;  %v4619_v46 = vpop.f32.mrb[45].mxu1 }
 0x142   : > { %v1384_v47 = vpop.f32.mrb[46].mxu0  ;;  %v1434_v48 = vpop.f32.mrb[46].mxu1 }
 0x143   : > { %v1437_v49 = vadd.f32 %v1431_v43, %v1387_v44  ;;  %v4614_v50 = vpop.f32.mrb[47].mxu0  ;;  %v4620_v51 = vpop.f32.mrb[47].mxu1 }
 0x148   : > { %v1484_v52 = vpop.f32.mrb[48].mxu0  ;;  %v1536_v53 = vpop.f32.mrb[48].mxu1 }
 0x149   : > { %v1490_v54 = vadd.f32 %v1484_v52, %v1437_v49  ;;  %v4625_v55 = vpop.f32.mrb[49].mxu0  ;;  %v4631_v56 = vpop.f32.mrb[49].mxu1 }
 0x14a   : > { %v1487_v57 = vpop.f32.mrb[50].mxu0  ;;  %v1539_v58 = vpop.f32.mrb[50].mxu1 }
 0x14b   : > { %v1542_v59 = vadd.f32 %v1536_v53, %v1490_v54  ;;  %v4626_v60 = vpop.f32.mrb[51].mxu0  ;;  %v4632_v61 = vpop.f32.mrb[51].mxu1 }
 0x150   : > { %v1586_v62 = vpop.f32.mrb[52].mxu0  ;;  %v1642_v63 = vpop.f32.mrb[52].mxu1 }
 0x151   : > { %v1592_v0 = vadd.f32 %v1586_v62, %v1542_v59  ;;  %v4637_v1 = vpop.f32.mrb[53].mxu0  ;;  %v4643_v3 = vpop.f32.mrb[53].mxu1 }
 0x152   : > { %v1589_v4 = vpop.f32.mrb[54].mxu0  ;;  %v1645_v6 = vpop.f32.mrb[54].mxu1 }
 0x153   : > { %v1593_v7 = vadd.f32 %v5563_v5, %v1592_v0  ;;  %v4638_v8 = vpop.f32.mrb[55].mxu0  ;;  %v4644_v9 = vpop.f32.mrb[55].mxu1 }
 0x155   : > { %4194 = vst [vmem:[%s5580_s23 + $0x10] sm:$0xff] %v1593_v7 }
 0x158   : > { %v1688_v10 = vpop.f32.mrb[56].mxu0  ;;  %v1737_v11 = vpop.f32.mrb[56].mxu1 }
 0x159   : > { %v1689_v12 = vadd.f32 %v1688_v10, %v1642_v63  ;;  %v4649_v13 = vpop.f32.mrb[57].mxu0  ;;  %v4655_v14 = vpop.f32.mrb[57].mxu1 }
 0x15a   : > { %v1691_v15 = vpop.f32.mrb[58].mxu0  ;;  %v1740_v16 = vpop.f32.mrb[58].mxu1 }
 0x15b   : > { %v1743_v17 = vadd.f32 %v1737_v11, %v1689_v12  ;;  %v4650_v18 = vpop.f32.mrb[59].mxu0  ;;  %v4656_v19 = vpop.f32.mrb[59].mxu1 }
 0x160   : > { %v1789_v20 = vpop.f32.mrb[60].mxu0  ;;  %v1841_v21 = vpop.f32.mrb[60].mxu1 }
 0x161   : > { %v1795_v22 = vadd.f32 %v1789_v20, %v1743_v17  ;;  %v4661_v23 = vpop.f32.mrb[61].mxu0  ;;  %v4667_v2 = vpop.f32.mrb[61].mxu1 }
 0x162   : > { %v1792_v24 = vpop.f32.mrb[62].mxu0  ;;  %v1844_v25 = vpop.f32.mrb[62].mxu1 }
 0x163   : > { %v1847_v26 = vadd.f32 %v1841_v21, %v1795_v22  ;;  %v4662_v27 = vpop.f32.mrb[63].mxu0  ;;  %v4668_v28 = vpop.f32.mrb[63].mxu1 }
 0x168   : > { %v1891_v29 = vpop.f32.mrb[64].mxu0  ;;  %v1944_v30 = vpop.f32.mrb[64].mxu1 }
 0x169   : > { %v1897_v31 = vadd.f32 %v1891_v29, %v1847_v26  ;;  %v4673_v32 = vpop.f32.mrb[65].mxu0  ;;  %v4679_v33 = vpop.f32.mrb[65].mxu1 }
 0x16a   : > { %v1894_v34 = vpop.f32.mrb[66].mxu0  ;;  %v1947_v35 = vpop.f32.mrb[66].mxu1 }
 0x16b   : > { %v1950_v36 = vadd.f32 %v1944_v30, %v1897_v31  ;;  %v4674_v37 = vpop.f32.mrb[67].mxu0  ;;  %v4680_v38 = vpop.f32.mrb[67].mxu1 }
 0x170   : > { %v1996_v39 = vpop.f32.mrb[68].mxu0  ;;  %v2046_v40 = vpop.f32.mrb[68].mxu1 }
 0x171   : > { %v2002_v41 = vadd.f32 %v1996_v39, %v1950_v36  ;;  %v4685_v42 = vpop.f32.mrb[69].mxu0  ;;  %v4691_v43 = vpop.f32.mrb[69].mxu1 }
 0x172   : > { %v1999_v44 = vpop.f32.mrb[70].mxu0  ;;  %v2049_v45 = vpop.f32.mrb[70].mxu1 }
 0x173   : > { %v2052_v46 = vadd.f32 %v2046_v40, %v2002_v41  ;;  %v4686_v47 = vpop.f32.mrb[71].mxu0  ;;  %v4692_v48 = vpop.f32.mrb[71].mxu1 }
 0x175   : > { %v2053_v49 = vadd.f32 %v5563_v5, %v2052_v46 }
 0x177   : > { %4221 = vst [vmem:[%s5580_s23 + $0x18] sm:$0xff] %v2053_v49 }
 0x178   : > { %v2102_v50 = vpop.f32.mrb[72].mxu0  ;;  %v2148_v51 = vpop.f32.mrb[72].mxu1 }
 0x179   : > { %v2149_v52 = vadd.f32 %v2148_v51, %v2102_v50  ;;  %v4697_v53 = vpop.f32.mrb[73].mxu0  ;;  %v4703_v54 = vpop.f32.mrb[73].mxu1 }
 0x17a   : > { %v2105_v55 = vpop.f32.mrb[74].mxu0  ;;  %v2151_v56 = vpop.f32.mrb[74].mxu1 }
 0x17b   : > { %v4698_v57 = vpop.f32.mrb[75].mxu0  ;;  %v4704_v58 = vpop.f32.mrb[75].mxu1 }
 0x180   : > { %v2197_v59 = vpop.f32.mrb[76].mxu0  ;;  %v2249_v60 = vpop.f32.mrb[76].mxu1 }
 0x181   : > { %v2203_v61 = vadd.f32 %v2197_v59, %v2149_v52  ;;  %v4709_v62 = vpop.f32.mrb[77].mxu0  ;;  %v4715_v63 = vpop.f32.mrb[77].mxu1 }
 0x182   : > { %v2200_v0 = vpop.f32.mrb[78].mxu0  ;;  %v2252_v1 = vpop.f32.mrb[78].mxu1 }
 0x183   : > { %v2255_v3 = vadd.f32 %v2249_v60, %v2203_v61  ;;  %v4710_v4 = vpop.f32.mrb[79].mxu0  ;;  %v4716_v6 = vpop.f32.mrb[79].mxu1 }
 0x188   : > { %v2301_v7 = vpop.f32.mrb[80].mxu0  ;;  %v2351_v8 = vpop.f32.mrb[80].mxu1 }
 0x189   : > { %v2307_v9 = vadd.f32 %v2301_v7, %v2255_v3  ;;  %v4721_v10 = vpop.f32.mrb[81].mxu0  ;;  %v4727_v11 = vpop.f32.mrb[81].mxu1 }
 0x18a   : > { %v2304_v12 = vpop.f32.mrb[82].mxu0  ;;  %v2354_v13 = vpop.f32.mrb[82].mxu1 }
 0x18b   : > { %v2357_v14 = vadd.f32 %v2351_v8, %v2307_v9  ;;  %v4722_v15 = vpop.f32.mrb[83].mxu0  ;;  %v4728_v16 = vpop.f32.mrb[83].mxu1 }
 0x190   : > { %v2404_v17 = vpop.f32.mrb[84].mxu0  ;;  %v2456_v18 = vpop.f32.mrb[84].mxu1 }
 0x191   : > { %v2410_v19 = vadd.f32 %v2404_v17, %v2357_v14  ;;  %v4733_v20 = vpop.f32.mrb[85].mxu0  ;;  %v4739_v21 = vpop.f32.mrb[85].mxu1 }
 0x192   : > { %v2407_v22 = vpop.f32.mrb[86].mxu0  ;;  %v2459_v23 = vpop.f32.mrb[86].mxu1 }
 0x193   : > { %v2462_v2 = vadd.f32 %v2456_v18, %v2410_v19  ;;  %v4734_v24 = vpop.f32.mrb[87].mxu0  ;;  %v4740_v25 = vpop.f32.mrb[87].mxu1 }
 0x198   : > { %v2506_v26 = vpop.f32.mrb[88].mxu0  ;;  %v2562_v27 = vpop.f32.mrb[88].mxu1 }
 0x199   : > { %v2512_v28 = vadd.f32 %v2506_v26, %v2462_v2  ;;  %v4745_v29 = vpop.f32.mrb[89].mxu0  ;;  %v4751_v30 = vpop.f32.mrb[89].mxu1 }
 0x19a   : > { %v2509_v31 = vpop.f32.mrb[90].mxu0  ;;  %v2565_v32 = vpop.f32.mrb[90].mxu1 }
 0x19b   : > { %v2513_v33 = vadd.f32 %v5563_v5, %v2512_v28  ;;  %v4746_v34 = vpop.f32.mrb[91].mxu0  ;;  %v4752_v35 = vpop.f32.mrb[91].mxu1 }
 0x19d   : > { %4248 = vst [vmem:[%s5580_s23 + $0x20] sm:$0xff] %v2513_v33 }
 0x1a0   : > { %v2608_v36 = vpop.f32.mrb[92].mxu0  ;;  %v2657_v37 = vpop.f32.mrb[92].mxu1 }
 0x1a1   : > { %v2609_v38 = vadd.f32 %v2608_v36, %v2562_v27  ;;  %v4757_v39 = vpop.f32.mrb[93].mxu0  ;;  %v4763_v40 = vpop.f32.mrb[93].mxu1 }
 0x1a2   : > { %v2611_v41 = vpop.f32.mrb[94].mxu0  ;;  %v2660_v42 = vpop.f32.mrb[94].mxu1 }
 0x1a3   : > { %v2663_v43 = vadd.f32 %v2657_v37, %v2609_v38  ;;  %v4758_v44 = vpop.f32.mrb[95].mxu0  ;;  %v4764_v45 = vpop.f32.mrb[95].mxu1 }
 0x1a8   : > { %v2709_v46 = vpop.f32.mrb[96].mxu0  ;;  %v2761_v47 = vpop.f32.mrb[96].mxu1 }
 0x1a9   : > { %v2715_v48 = vadd.f32 %v2709_v46, %v2663_v43  ;;  %v4769_v49 = vpop.f32.mrb[97].mxu0  ;;  %v4775_v50 = vpop.f32.mrb[97].mxu1 }
 0x1aa   : > { %v2712_v51 = vpop.f32.mrb[98].mxu0  ;;  %v2764_v52 = vpop.f32.mrb[98].mxu1 }
 0x1ab   : > { %v2767_v53 = vadd.f32 %v2761_v47, %v2715_v48  ;;  %v4770_v54 = vpop.f32.mrb[99].mxu0  ;;  %v4776_v55 = vpop.f32.mrb[99].mxu1 }
 0x1b0   : > { %v2811_v56 = vpop.f32.mrb[100].mxu0  ;;  %v2864_v57 = vpop.f32.mrb[100].mxu1 }
 0x1b1   : > { %v2817_v58 = vadd.f32 %v2811_v56, %v2767_v53  ;;  %v4781_v59 = vpop.f32.mrb[101].mxu0  ;;  %v4787_v60 = vpop.f32.mrb[101].mxu1 }
 0x1b2   : > { %v2814_v61 = vpop.f32.mrb[102].mxu0  ;;  %v2867_v62 = vpop.f32.mrb[102].mxu1 }
 0x1b3   : > { %v2870_v63 = vadd.f32 %v2864_v57, %v2817_v58  ;;  %v4782_v0 = vpop.f32.mrb[103].mxu0  ;;  %v4788_v1 = vpop.f32.mrb[103].mxu1 }
 0x1b8   : > { %v2916_v3 = vpop.f32.mrb[104].mxu0  ;;  %v2966_v4 = vpop.f32.mrb[104].mxu1 }
 0x1b9   : > { %v2922_v6 = vadd.f32 %v2916_v3, %v2870_v63  ;;  %v4793_v7 = vpop.f32.mrb[105].mxu0  ;;  %v4799_v8 = vpop.f32.mrb[105].mxu1 }
 0x1ba   : > { %v2919_v9 = vpop.f32.mrb[106].mxu0  ;;  %v2969_v10 = vpop.f32.mrb[106].mxu1 }
 0x1bb   : > { %v2972_v11 = vadd.f32 %v2966_v4, %v2922_v6  ;;  %v4794_v12 = vpop.f32.mrb[107].mxu0  ;;  %v4800_v13 = vpop.f32.mrb[107].mxu1 }
 0x1bd   : > { %v2973_v14 = vadd.f32 %v5563_v5, %v2972_v11 }
 0x1bf   : > { %4275 = vst [vmem:[%s5580_s23 + $0x28] sm:$0xff] %v2973_v14 }
 0x1c0   : > { %v3022_v15 = vpop.f32.mrb[108].mxu0  ;;  %v3068_v16 = vpop.f32.mrb[108].mxu1 }
 0x1c1   : > { %v3069_v17 = vadd.f32 %v3068_v16, %v3022_v15  ;;  %v4805_v18 = vpop.f32.mrb[109].mxu0  ;;  %v4811_v19 = vpop.f32.mrb[109].mxu1 }
 0x1c2   : > { %v3025_v20 = vpop.f32.mrb[110].mxu0  ;;  %v3071_v21 = vpop.f32.mrb[110].mxu1 }
 0x1c3   : > { %v4806_v22 = vpop.f32.mrb[111].mxu0  ;;  %v4812_v23 = vpop.f32.mrb[111].mxu1 }
 0x1c8   : > { %v3117_v2 = vpop.f32.mrb[112].mxu0  ;;  %v3169_v24 = vpop.f32.mrb[112].mxu1 }
 0x1c9   : > { %v3123_v25 = vadd.f32 %v3117_v2, %v3069_v17  ;;  %v4817_v26 = vpop.f32.mrb[113].mxu0  ;;  %v4823_v27 = vpop.f32.mrb[113].mxu1 }
 0x1ca   : > { %v3120_v28 = vpop.f32.mrb[114].mxu0  ;;  %v3172_v29 = vpop.f32.mrb[114].mxu1 }
 0x1cb   : > { %v3175_v30 = vadd.f32 %v3169_v24, %v3123_v25  ;;  %v4818_v31 = vpop.f32.mrb[115].mxu0  ;;  %v4824_v32 = vpop.f32.mrb[115].mxu1 }
 0x1d0   : > { %v3221_v33 = vpop.f32.mrb[116].mxu0  ;;  %v3271_v34 = vpop.f32.mrb[116].mxu1 }
 0x1d1   : > { %v3227_v35 = vadd.f32 %v3221_v33, %v3175_v30  ;;  %v4829_v36 = vpop.f32.mrb[117].mxu0  ;;  %v4835_v37 = vpop.f32.mrb[117].mxu1 }
 0x1d2   : > { %v3224_v38 = vpop.f32.mrb[118].mxu0  ;;  %v3274_v39 = vpop.f32.mrb[118].mxu1 }
 0x1d3   : > { %v3277_v40 = vadd.f32 %v3271_v34, %v3227_v35  ;;  %v4830_v41 = vpop.f32.mrb[119].mxu0  ;;  %v4836_v42 = vpop.f32.mrb[119].mxu1 }
 0x1d8   : > { %v3324_v43 = vpop.f32.mrb[120].mxu0  ;;  %v3376_v44 = vpop.f32.mrb[120].mxu1 }
 0x1d9   : > { %v3330_v45 = vadd.f32 %v3324_v43, %v3277_v40  ;;  %v4841_v46 = vpop.f32.mrb[121].mxu0  ;;  %v4847_v47 = vpop.f32.mrb[121].mxu1 }
 0x1da   : > { %v3327_v48 = vpop.f32.mrb[122].mxu0  ;;  %v3379_v49 = vpop.f32.mrb[122].mxu1 }
 0x1db   : > { %v3382_v50 = vadd.f32 %v3376_v44, %v3330_v45  ;;  %v4842_v51 = vpop.f32.mrb[123].mxu0  ;;  %v4848_v52 = vpop.f32.mrb[123].mxu1 }
 0x1e0   : > { %v3426_v53 = vpop.f32.mrb[124].mxu0  ;;  %v3482_v54 = vpop.f32.mrb[124].mxu1 }
 0x1e1   : > { %v3432_v55 = vadd.f32 %v3426_v53, %v3382_v50  ;;  %v4853_v56 = vpop.f32.mrb[125].mxu0  ;;  %v4859_v57 = vpop.f32.mrb[125].mxu1 }
 0x1e2   : > { %v3429_v58 = vpop.f32.mrb[126].mxu0  ;;  %v3485_v59 = vpop.f32.mrb[126].mxu1 }
 0x1e3   : > { %v3433_v60 = vadd.f32 %v5563_v5, %v3432_v55  ;;  %v4854_v61 = vpop.f32.mrb[127].mxu0  ;;  %v4860_v62 = vpop.f32.mrb[127].mxu1 }
 0x1e5   : > { %4302 = vst [vmem:[%s5580_s23 + $0x30] sm:$0xff] %v3433_v60 }
 0x1e8   : > { %v3528_v63 = vpop.f32.mrb[128].mxu0  ;;  %v3577_v0 = vpop.f32.mrb[128].mxu1 }
 0x1e9   : > { %v3529_v1 = vadd.f32 %v3528_v63, %v3482_v54  ;;  %v4865_v3 = vpop.f32.mrb[129].mxu0  ;;  %v4871_v4 = vpop.f32.mrb[129].mxu1 }
 0x1ea   : > { %v3531_v6 = vpop.f32.mrb[130].mxu0  ;;  %v3580_v7 = vpop.f32.mrb[130].mxu1 }
 0x1eb   : > { %v3583_v8 = vadd.f32 %v3577_v0, %v3529_v1  ;;  %v4866_v9 = vpop.f32.mrb[131].mxu0  ;;  %v4872_v10 = vpop.f32.mrb[131].mxu1 }
 0x1f0   : > { %v3629_v11 = vpop.f32.mrb[132].mxu0  ;;  %v3681_v12 = vpop.f32.mrb[132].mxu1 }
 0x1f1   : > { %v3635_v13 = vadd.f32 %v3629_v11, %v3583_v8  ;;  %v4877_v14 = vpop.f32.mrb[133].mxu0  ;;  %v4883_v15 = vpop.f32.mrb[133].mxu1 }
 0x1f2   : > { %v3632_v16 = vpop.f32.mrb[134].mxu0  ;;  %v3684_v17 = vpop.f32.mrb[134].mxu1 }
 0x1f3   : > { %v3687_v18 = vadd.f32 %v3681_v12, %v3635_v13  ;;  %v4878_v19 = vpop.f32.mrb[135].mxu0  ;;  %v4884_v20 = vpop.f32.mrb[135].mxu1 }
 0x1f8   : > { %v3731_v21 = vpop.f32.mrb[136].mxu0  ;;  %v3784_v22 = vpop.f32.mrb[136].mxu1 }
 0x1f9   : > { %v3737_v23 = vadd.f32 %v3731_v21, %v3687_v18  ;;  %v4889_v2 = vpop.f32.mrb[137].mxu0  ;;  %v4895_v24 = vpop.f32.mrb[137].mxu1 }
 0x1fa   : > { %v3734_v25 = vpop.f32.mrb[138].mxu0  ;;  %v3787_v26 = vpop.f32.mrb[138].mxu1 }
 0x1fb   : > { %v3790_v27 = vadd.f32 %v3784_v22, %v3737_v23  ;;  %v4890_v28 = vpop.f32.mrb[139].mxu0  ;;  %v4896_v29 = vpop.f32.mrb[139].mxu1 }
 0x200   : > { %v3836_v30 = vpop.f32.mrb[140].mxu0  ;;  %v3886_v31 = vpop.f32.mrb[140].mxu1 }
 0x201   : > { %v3842_v32 = vadd.f32 %v3836_v30, %v3790_v27  ;;  %v4901_v33 = vpop.f32.mrb[141].mxu0  ;;  %v4907_v34 = vpop.f32.mrb[141].mxu1 }
 0x202   : > { %v3839_v35 = vpop.f32.mrb[142].mxu0  ;;  %v3889_v36 = vpop.f32.mrb[142].mxu1 }
 0x203   : > { %v3892_v37 = vadd.f32 %v3886_v31, %v3842_v32  ;;  %v4902_v38 = vpop.f32.mrb[143].mxu0  ;;  %v4908_v39 = vpop.f32.mrb[143].mxu1 }
 0x205   : > { %v3893_v40 = vadd.f32 %v5563_v5, %v3892_v37 }
 0x207   : > { %4329 = vst [vmem:[%s5580_s23 + $0x38] sm:$0xff] %v3893_v40 }
 0x208 PF: > { %s13_s14 = sadd.s32 1, %s4958_s14   ;;  %s5675_s12 = smov %s4954_s13 }
 0x209   : > { %p10_p5 = scmp.ge.s32.totalorder %s13_s14, 4   ;;  %s5676_s13 = smov %s5678_s15 }
 0x20b   :  { %12 = sbr.rel (!%p10_p5) target bundleno = 2 (0x2), region = 111 }

</bundles_post_ra>
